<compile_context>
chip_gen: v7x
topology: tpu7x:2x2x1
jax: 0.10.0
libtpu: 0.0.40
codegen_flags: <defaults>
</compile_context>

<pallas_src>
import jax
import jax.numpy as jnp
from jax.experimental import pallas as pl
from jax.experimental.pallas import tpu as pltpu

NUM_FEATURES = 1280          # per-backbone feature width (fixed by the module)
NUM_CLASSES = 4
OUT_PAD = 128                # lane-dense padded head width (sliced back to 4)
TK = 2048                    # reduction tile for the streamed path (multiple of 256)
FAST_PATH_MAX_DIN = 2048     # single-shot path limit (fits v5e's 16 MiB default scope)
N_PAD = 16                   # bf16 sublane granularity for the (tiny) batch


def _round_up(v, m):
    return ((v + m - 1) // m) * m


# --------------------------------------------------------------------------
# Kernels. Grid axis 0 (size 2, "parallel") selects one 1280-wide backbone
# half; on v7x it shards across the two TensorCores.
# --------------------------------------------------------------------------
def _ensemble_single_kernel(x_ref, w_ref, b_ref, wa_ref, o_ref):
    """Fast path: whole reduction in one step, no accumulator scratch."""
    feats = jnp.dot(x_ref[...], w_ref[...], preferred_element_type=jnp.float32)
    feats = jnp.maximum(feats + b_ref[...], 0.0)            # f32 bias + ReLU (v5e-safe)
    out = jnp.dot(feats.astype(wa_ref.dtype), wa_ref[...],
                  preferred_element_type=jnp.float32)
    o_ref[0] = out.astype(o_ref.dtype)                       # partial head result


def _ensemble_tiled_kernel(x_ref, w_ref, b_ref, wa_ref, o_ref, acc_ref):
    """Streamed path: grid axis 1 tiles the flattened-input (reduction) dim."""
    k = pl.program_id(1)

    @pl.when(k == 0)
    def _init():
        acc_ref[...] = jnp.zeros_like(acc_ref)

    # Backbone matmul for this (half, K-tile): bf16 in, f32 MXU accumulation.
    acc_ref[...] += jnp.dot(x_ref[...], w_ref[...],
                            preferred_element_type=jnp.float32)

    @pl.when(k == pl.num_programs(1) - 1)
    def _finalize():
        feats = jnp.maximum(acc_ref[...] + b_ref[...], 0.0)  # f32 bias + ReLU
        out = jnp.dot(feats.astype(wa_ref.dtype), wa_ref[...],
                      preferred_element_type=jnp.float32)
        o_ref[0] = out.astype(o_ref.dtype)                    # partial head result


# --------------------------------------------------------------------------
# One-time host-side packing (call at init, NOT per forward call).
# --------------------------------------------------------------------------
def pack_params(params, d_in):
    d_in_fast = _round_up(d_in, 256)
    if d_in_fast <= FAST_PATH_MAX_DIN:
        d_in_pad, nk, fast = d_in_fast, 1, True
    else:
        d_in_pad = _round_up(d_in, TK)
        nk, fast = d_in_pad // TK, False

    # Fused model1 || model2 backbone weights, bf16, zero-padded along d_in
    # (zero rows contribute nothing to the accumulator).
    w_f = jnp.concatenate([params["w1"], params["w2"]], axis=1)      # [d_in, 2560]
    w_p = jnp.zeros((d_in_pad, 2 * NUM_FEATURES), jnp.bfloat16)
    w_p = w_p.at[:d_in, :].set(w_f.astype(jnp.bfloat16))

    b_f = jnp.concatenate([params["b1"], params["b2"]], axis=1)      # [1, 2560]
    b_f = b_f.astype(jnp.float32)

    # Head weight padded to a lane-dense width (unmasked stores, full MXU cols).
    wa_p = jnp.zeros((2 * NUM_FEATURES, OUT_PAD), jnp.float32)
    wa_p = wa_p.at[:, :NUM_CLASSES].set(params["wa"]).astype(jnp.bfloat16)

    return {
        "w": w_p,                         # [d_in_pad, 2560] bf16
        "b": b_f,                         # [1, 2560] f32
        "wa": wa_p,                       # [2560, OUT_PAD] bf16
        "ba": params["ba"].astype(jnp.float32),   # [1, NUM_CLASSES] f32
        "d_in": d_in, "d_in_pad": d_in_pad, "nk": nk, "fast": fast,
    }


# --------------------------------------------------------------------------
# Forward pass. x: [N, C, H, W] float32. Returns [N, NUM_CLASSES] float32.
# --------------------------------------------------------------------------
def adaptive_ensemble_forward(x, packed):
    n = x.shape[0]
    d_in = x.shape[1] * x.shape[2] * x.shape[3]
    assert d_in == packed["d_in"], "params were packed for a different input size"
    d_in_pad, nk, fast = packed["d_in_pad"], packed["nk"], packed["fast"]

    n_pad = max(N_PAD, _round_up(n, N_PAD))
    x_flat = x.reshape(n, d_in)                               # == torch.flatten(x, 1)
    x_p = jnp.zeros((n_pad, d_in_pad), jnp.bfloat16)
    x_p = x_p.at[:n, :d_in].set(x_flat.astype(jnp.bfloat16))

    flops = (2 * n_pad * d_in_pad * (2 * NUM_FEATURES)
             + 2 * n_pad * (2 * NUM_FEATURES) * OUT_PAD)
    bytes_accessed = (x_p.size * 2 + packed["w"].size * 2 + packed["b"].size * 4
                      + packed["wa"].size * 2 + 2 * n_pad * OUT_PAD * 4)
    cost = pl.CostEstimate(flops=flops, transcendentals=0,
                           bytes_accessed=bytes_accessed)

    out_shape = jax.ShapeDtypeStruct((2, n_pad, OUT_PAD), jnp.float32)

    if fast:
        partial = pl.pallas_call(
            _ensemble_single_kernel,
            out_shape=out_shape,
            grid_spec=pltpu.PrefetchScalarGridSpec(
                num_scalar_prefetch=0,
                grid=(2,),
                in_specs=[
                    pl.BlockSpec((n_pad, d_in_pad), lambda j: (0, 0)),        # x
                    pl.BlockSpec((d_in_pad, NUM_FEATURES), lambda j: (0, j)),  # W half
                    pl.BlockSpec((1, NUM_FEATURES), lambda j: (0, j)),         # bias half
                    pl.BlockSpec((NUM_FEATURES, OUT_PAD), lambda j: (j, 0)),   # head rows
                ],
                out_specs=pl.BlockSpec((1, n_pad, OUT_PAD), lambda j: (j, 0, 0)),
            ),
            compiler_params=pltpu.CompilerParams(
                dimension_semantics=("parallel",)),
            cost_estimate=cost,
        )(x_p, packed["w"], packed["b"], packed["wa"])
    else:
        partial = pl.pallas_call(
            _ensemble_tiled_kernel,
            out_shape=out_shape,
            grid_spec=pltpu.PrefetchScalarGridSpec(
                num_scalar_prefetch=0,
                grid=(2, nk),
                in_specs=[
                    pl.BlockSpec((n_pad, TK), lambda j, k: (0, k)),            # x tile
                    pl.BlockSpec((TK, NUM_FEATURES), lambda j, k: (k, j)),      # W tile
                    pl.BlockSpec((1, NUM_FEATURES), lambda j, k: (0, j)),       # bias half
                    pl.BlockSpec((NUM_FEATURES, OUT_PAD), lambda j, k: (j, 0)),  # head rows
                ],
                out_specs=pl.BlockSpec((1, n_pad, OUT_PAD), lambda j, k: (j, 0, 0)),
                scratch_shapes=[pltpu.VMEM((n_pad, NUM_FEATURES), jnp.float32)],
            ),
            compiler_params=pltpu.CompilerParams(
                # Half-feature axis parallel (v7x megacore), reduction arbitrary.
                dimension_semantics=("parallel", "arbitrary")),
            cost_estimate=cost,
        )(x_p, packed["w"], packed["b"], packed["wa"])

    # Sum the two partial head results, add the head bias, strip padding.
    head = partial[0, :n, :NUM_CLASSES] + partial[1, :n, :NUM_CLASSES]
    return head + packed["ba"]


# --------------------------------------------------------------------------
# Parameter init (PyTorch-Linear-style uniform +/- 1/sqrt(fan_in)) + reference.
# --------------------------------------------------------------------------
def init_params(key, d_in):
    ks = jax.random.split(key, 6)

    def lin(kw, kb, fan_in, fan_out):
        bound = 1.0 / jnp.sqrt(jnp.float32(fan_in))
        w = jax.random.uniform(kw, (fan_in, fan_out), jnp.float32, -bound, bound)
        b = jax.random.uniform(kb, (1, fan_out), jnp.float32, -bound, bound)
        return w, b

    w1, b1 = lin(ks[0], ks[1], d_in, NUM_FEATURES)
    w2, b2 = lin(ks[2], ks[3], d_in, NUM_FEATURES)
    wa, ba = lin(ks[4], ks[5], 2 * NUM_FEATURES, NUM_CLASSES)
    return {"w1": w1, "b1": b1, "w2": w2, "b2": b2, "wa": wa, "ba": ba}


def reference_forward(x, params):
    """Plain-JAX reference using the same bf16-rounded operands as the kernel."""
    n = x.shape[0]
    xb = x.reshape(n, -1).astype(jnp.bfloat16)
    w1 = params["w1"].astype(jnp.bfloat16)
    w2 = params["w2"].astype(jnp.bfloat16)
    f1 = jnp.maximum(jnp.dot(xb, w1, preferred_element_type=jnp.float32)
                     + params["b1"], 0.0)
    f2 = jnp.maximum(jnp.dot(xb, w2, preferred_element_type=jnp.float32)
                     + params["b2"], 0.0)
    combined = jnp.concatenate([f1, f2], axis=1).astype(jnp.bfloat16)
    wa = params["wa"].astype(jnp.bfloat16)
    return jnp.dot(combined, wa, preferred_element_type=jnp.float32) + params["ba"]


if __name__ == "__main__":
    key = jax.random.PRNGKey(0)

    # --- Case 1: small NCHW input (fast single-step path, d_in = 1024) -----
    k_x1, k_p1, k_x2, k_p2 = jax.random.split(key, 4)
    x1 = jax.random.normal(k_x1, (2, 4, 16, 16), dtype=jnp.float32)
    d_in1 = 4 * 16 * 16
    params1 = init_params(k_p1, d_in1)
    packed1 = pack_params(params1, d_in1)          # one-time packing
    out1 = jax.block_until_ready(adaptive_ensemble_forward(x1, packed1))
    ref1 = reference_forward(x1, params1)
    assert out1.shape == (2, NUM_CLASSES)
    assert jnp.allclose(out1, ref1, atol=1e-2, rtol=1e-2), "mismatch (fast path)"

    # --- Case 2: larger flattened input (streamed K-tiled path, nk = 2) ----
    x2 = jax.random.normal(k_x2, (2, 4, 32, 32), dtype=jnp.float32)
    d_in2 = 4 * 32 * 32
    params2 = init_params(k_p2, d_in2)
    packed2 = pack_params(params2, d_in2)
    out2 = jax.block_until_ready(adaptive_ensemble_forward(x2, packed2))
    ref2 = reference_forward(x2, params2)
    assert out2.shape == (2, NUM_CLASSES)
    assert jnp.allclose(out2, ref2, atol=1e-2, rtol=1e-2), "mismatch (tiled path)"

    print("KERNEL_OK")
</pallas_src>

<mosaic_0001>
module attributes {stable_mosaic.version = 11 : i64} {
  func.func @_ensemble_single_kernel(%arg0: i32, %arg1: memref<16x1024xbf16, #tpu.memory_space<vmem>>, %arg2: memref<1024x1280xbf16, #tpu.memory_space<vmem>>, %arg3: memref<1x1280xf32, #tpu.memory_space<vmem>>, %arg4: memref<1280x128xbf16, #tpu.memory_space<vmem>>, %arg5: memref<1x16x128xf32, #tpu.memory_space<vmem>>) attributes {dimension_semantics = [#tpu.dimension_semantics<parallel>], iteration_bounds = array<i64: 2>, scalar_prefetch = 0 : i64, scratch_operands = 0 : i64, tpu.core_type = #tpu.core_type<tc>, window_params = [{pipeline_mode = #tpu.pipeline_mode<synchronous>, transform_indices = @transform_0, window_bounds = array<i64: 16, 1024>}, {transform_indices = @transform_1, window_bounds = array<i64: 1024, 1280>}, {transform_indices = @transform_2, window_bounds = array<i64: 1, 1280>}, {transform_indices = @transform_3, window_bounds = array<i64: 1280, 128>}, {transform_indices = @transform_4, window_bounds = array<i64: 1, 16, 128>}]} {
    %c0 = arith.constant 0 : index
    %c0_0 = arith.constant 0 : index
    %0 = vector.load %arg1[%c0, %c0_0] : memref<16x1024xbf16, #tpu.memory_space<vmem>>, vector<16x1024xbf16>
    %c0_1 = arith.constant 0 : index
    %c0_2 = arith.constant 0 : index
    %1 = vector.load %arg2[%c0_1, %c0_2] : memref<1024x1280xbf16, #tpu.memory_space<vmem>>, vector<1024x1280xbf16>
    %cst = arith.constant dense<0.000000e+00> : vector<16x1280xf32>
    %2 = tpu.matmul %0, %1, %cst {dimension_numbers = #tpu.dot_dimension_numbers<[1], [0], [0], [1], [0, 0, 1, 1], [], []>} : vector<16x1024xbf16>, vector<1024x1280xbf16>, vector<16x1280xf32> -> vector<16x1280xf32>
    %c0_3 = arith.constant 0 : index
    %c0_4 = arith.constant 0 : index
    %3 = vector.load %arg3[%c0_3, %c0_4] : memref<1x1280xf32, #tpu.memory_space<vmem>>, vector<1x1280xf32>
    %4 = vector.broadcast %3 : vector<1x1280xf32> to vector<16x1280xf32>
    %5 = arith.addf %2, %4 : vector<16x1280xf32>
    %cst_5 = arith.constant 0.000000e+00 : f32
    %6 = vector.broadcast %cst_5 : f32 to vector<16x1280xf32>
    %7 = arith.maximumf %5, %6 : vector<16x1280xf32>
    %8 = arith.truncf %7 : vector<16x1280xf32> to vector<16x1280xbf16>
    %c0_6 = arith.constant 0 : index
    %c0_7 = arith.constant 0 : index
    %9 = vector.load %arg4[%c0_6, %c0_7] : memref<1280x128xbf16, #tpu.memory_space<vmem>>, vector<1280x128xbf16>
    %cst_8 = arith.constant dense<0.000000e+00> : vector<16x128xf32>
    %10 = tpu.matmul %8, %9, %cst_8 {dimension_numbers = #tpu.dot_dimension_numbers<[1], [0], [0], [1], [0, 0, 1, 1], [], []>} : vector<16x1280xbf16>, vector<1280x128xbf16>, vector<16x128xf32> -> vector<16x128xf32>
    %c0_9 = arith.constant 0 : index
    %c0_10 = arith.constant 0 : index
    %c0_11 = arith.constant 0 : index
    %11 = vector.load %arg5[%c0_9, %c0_10, %c0_11] : memref<1x16x128xf32, #tpu.memory_space<vmem>>, vector<1x16x128xf32>
    %12 = vector.shape_cast %11 : vector<1x16x128xf32> to vector<16x128xf32>
    %13 = vector.shape_cast %10 : vector<16x128xf32> to vector<1x16x128xf32>
    tpu.vector_store %arg5[%c0_9, %c0_10, %c0_11], %13 {strides = array<i32>} : memref<1x16x128xf32, #tpu.memory_space<vmem>>, vector<1x16x128xf32>,
    return
  }
  func.func @transform_0(%arg0: i32) -> (i32, i32) {
    %c0_i32 = arith.constant 0 : i32
    %c0_i32_0 = arith.constant 0 : i32
    %c0_i32_1 = arith.constant 0 : i32
    return %c0_i32, %c0_i32_0 : i32, i32
  }
  func.func @transform_1(%arg0: i32) -> (i32, i32) {
    %c0_i32 = arith.constant 0 : i32
    %c0_i32_0 = arith.constant 0 : i32
    return %c0_i32, %arg0 : i32, i32
  }
  func.func @transform_2(%arg0: i32) -> (i32, i32) {
    %c0_i32 = arith.constant 0 : i32
    %c0_i32_0 = arith.constant 0 : i32
    return %c0_i32, %arg0 : i32, i32
  }
  func.func @transform_3(%arg0: i32) -> (i32, i32) {
    %c0_i32 = arith.constant 0 : i32
    %c0_i32_0 = arith.constant 0 : i32
    return %arg0, %c0_i32 : i32, i32
  }
  func.func @transform_4(%arg0: i32) -> (i32, i32, i32) {
    %c0_i32 = arith.constant 0 : i32
    %c0_i32_0 = arith.constant 0 : i32
    %c0_i32_1 = arith.constant 0 : i32
    return %arg0, %c0_i32, %c0_i32_0 : i32, i32, i32
  }
}

</mosaic_0001>

<bundles_post_ra>
// kernel: tpu_custom_call.1
= control target key start
LH: loop header
LB: loop body
LE: loop exit
PB: predicated region body
PF: predicated region fallthrough
CT: control target
= control target key end

     0   :  { %s9558_s0 = inlined_call_operand.hbm [shape: bf16[16,1024], index: 0, kind: input, shape index: {}]   ;;  %s9559_s1 = inlined_call_operand.hbm [shape: bf16[1024,2560], index: 1, kind: input, shape index: {}]   ;;  %s9560_s2 = inlined_call_operand.hbm [shape: f32[1,2560], index: 2, kind: input, shape index: {}]   ;;  %s9561_s3 = inlined_call_operand.hbm [shape: bf16[2560,128], index: 3, kind: input, shape index: {}]   ;;  %s9562_s4 = inlined_call_operand.hbm [shape: f32[2,16,128], index: 4, kind: output, shape index: {}]  }
   0x1   :  { %9577 = sst [smem:[#allocation20_spill]] %s9559_s1 }
   0x2   :  { %9 = vsyncpa [#allocation3], 0 }
   0x3   :  { %10 = vsyncpa [#allocation6], 0 }
   0x4   :  { %12 = vsyncpa [#allocation6 + $0x1], 0 }
   0x5   :  { %13 = vsyncpa [#allocation9], 0 }
   0x6   :  { %15 = vsyncpa [#allocation9 + $0x1], 0 }
   0x7   :  { %16 = vsyncpa [#allocation4], 0 }
   0x8   :  { %18 = vsyncpa [#allocation4 + $0x1], 0  ;;  %s8424_s15 = smov 0   ;;  %s8426_s16 = smov 0  }
   0x9   :  { %s8428_s17 = smov 0   ;;  %s8430_s18 = smov 0  }
   0xa LB: > { %9578 = sst [smem:[#allocation15_spill]] %s8371_s15  ;;  %s8445_s19 = sadd.s32 1, %s8383_s18   ;;  %s8383_s18 = sphi %s8430_s18, %s9604_s18   ;;  %s8379_s17 = sphi %s8428_s17, %s9606_s17   ;;  %s8375_s16 = sphi %s8426_s16, %s9608_s16   ;;  %s8371_s15 = sphi %s8424_s15, %s9607_s15  }
   0xb   : > { %9579 = sst [smem:[#allocation16_spill]] %s8379_s17  ;;  %s52_s20 = sadd.s32 1, %s8379_s17 }
   0xc   : > { %9580 = sst [smem:[#allocation17_spill]] %s8445_s19  ;;  %s49_s21 = ssub.s32 %s8383_s18, %s8445_s19 }
   0xd   : > { %p9563_p0 = scmp.ne.s32.totalorder %s8379_s17, %s8375_s16  ;;  %p50_p1 = scmp.eq.s32.totalorder %s49_s21, 0 }
   0xe   : > { %p60_p2 = scmp.eq.s32.totalorder %s8383_s18, 0  ;;  %p7105_p4 = scmp.lt.s32.totalorder %s8383_s18, 2 }
   0xf   : > { %s8456_s22 = scalar_select %p50_p1, %s8379_s17, %s52_s20  }
  0x10   : > { %p61_p5 = por %p60_p2, %p9563_p0  ;;  %s180_s23 = sand.u32 1, %s8383_s18  }
  0x11   : > { %9581 = sst [smem:[#allocation18_spill]] %s8456_s22  ;;  %s8463_s24 = sand.u32 1, %s8379_s17  }
  0x12   : > { %s7068_s25 = smul.u32 5120, %s8463_s24  ;;  %p8466_p6 = pnand %p7105_p4, %p61_p5 }
  0x13   : > { %s6874_s27 = smul.u32 640, %s8383_s18  ;;  %s9583_s1 = sld [smem:[#allocation20_spill]] }
  0x14   : > { %s9582_s26 = scalar_select %p8466_p6, 1, 0 }
  0x15   : > { %s184_s5 = scalar_lea.vmem [#allocation5], %s7068_s25  ;;  %s8478_s7 = scalar_lea.sflag [#allocation6], %s180_s23 }
  0x16   : > { %s191_s6 = sshll.u32 %s184_s5, 4  ;;  %p8484_p8 = pneg %p8466_p6  ;;  %s8476_s6 = int_to_ptr.vmem [resolvable:$true] %s191_s6 }
  0x18   : > { %s9584_s9 = scalar_select %p8484_p8, 1, 0 }
  0x19   : > { %s8474_s30 = scalar_lea.hbm %s9583_s1, %s6874_s27  ;;  %s8196_s12 = scalar_lea.hbm %s9583_s1, 163840 }
  0x1a   : > { %s8191_s8 = scalar_lea.hbm %s8474_s30, 81920  ;;  %p8197_p11 = scmp.lt.u32.totalorder %s8474_s30, %s9583_s1 }
  0x1b   : > { %p8192_p7 = scmp.ne.s32.totalorder %s8474_s30, %s8191_s8  ;;  %p8198_p12 = scmp.lt.u32.totalorder %s8196_s12, %s8191_s8 }
  0x1c   : > { %p8200_p1 = scmp.lt.u32.totalorder %s8191_s8, %s8474_s30 }
  0x1d   : > { %p8194_p9 = pnand %p8484_p8, %p8192_p7  ;;  %p8199_p13 = por %p8198_p12, %p8197_p11 }
  0x1f   : > { %p8195_p10 = pneg %p8194_p9  ;;  %p8201_p2 = por %p8200_p1, %p8199_p13 }
  0x21   : > { %p8202_p4 = pnand %p8201_p2, %p8195_p10 }
  0x23   : > { %8205 = shalt.err (!%p8202_p4)
}
  0x24   : > { %s8206_s20 = scalar_lea.vmem %s8476_s6, 81920  ;;  %s8385_s21 = smov [#allocation5]  }
  0x25   : > { %p8207_p5 = scmp.ne.s32.totalorder %s8476_s6, %s8206_s20  ;;  %s8211_s23 = sshll.u32 %s8385_s21, 4  ;;  %s8212_s23 = int_to_ptr.vmem [resolvable:$false] %s8211_s23 }
  0x26   : > { %s8213_s25 = scalar_lea.vmem %s8212_s23, 163840  ;;  %p8214_p3 = scmp.lt.s32.totalorder %s8476_s6, %s8212_s23 }
  0x27   : > { %p8209_p7 = pnand %p8207_p5, %p8484_p8  ;;  %p8215_p0 = scmp.lt.s32.totalorder %s8213_s25, %s8206_s20 }
  0x29   : > { %p8210_p9 = pneg %p8209_p7  ;;  %p8216_p11 = por %p8215_p0, %p8214_p3 }
  0x2b   : > { %p8217_p12 = pnand %p8216_p11, %p8210_p9 }
  0x2d   : > { %8220 = shalt.err (!%p8217_p12)
}
  0x2e   : > { %s8386_s27 = smov 1280   ;;  %s8387_s28 = smov 640  }
  0x2f   : > { %s8388_s29 = smov 40   ;;  %s8509_s5 = sadd.s32 4294967295, %s8383_s18  }
  0x30   : > { %7093 = dma.hbm_to_vmem [thread:$0]  (!%p8466_p6), %s8474_s30, 81920, %s8476_s6, %s8478_s7, %s8386_s27, %s8387_s28, %s8388_s29  }
  0x31   : > { %s6131_s8 = sadd.s32 4294967294, %s8383_s18   ;;  %p65_p0 = scmp.ne.s32.totalorder %s8375_s16, %s8371_s15 }
  0x32   : > { %p9567_p3 = scmp.eq.s32.totalorder %s8509_s5, 0  ;;  %p141_p10 = scmp.eq.s32.totalorder %s8509_s5, 1 }
  0x33   : > { %p147_p13 = scmp.eq.s32.totalorder %s6131_s8, 1  ;;  %p6132_p1 = scmp.ge.s32.totalorder %s8383_s18, 1 }
  0x34   : > { %p8519_p2 = por %p9567_p3, %p65_p0  ;;  %p9586_p4 = scmp.ne.s32.totalorder %s8379_s17, %s8375_s16 }
  0x35   : > { %p8530_p7 = por %p147_p13, %p65_p0  ;;  %p154_p9 = scmp.lt.s32.totalorder %s8383_s18, 3 }
  0x36   : > { %s9585_s10 = scalar_select %p8519_p2, 1, 0 }
  0x37   : > { %p8526_p5 = por %p141_p10, %p9586_p4  ;;  %p8535_p11 = pnand %p6132_p1, %p154_p9 }
  0x38   : > { %s9588_s6 = scalar_select %p8530_p7, 1, 0 }
  0x39   : > { %s9587_s30 = scalar_select %p8526_p5, 1, 0 }
  0x3a   : > { %9589 = sst [smem:[#allocation19_spill]] %s9588_s6  ;;  %s8389_s12 = smov [#allocation2]  }
  0x3b   : > { %s9590_s11 = scalar_select %p8535_p11, 1, 0 }
  0x3c   : > { %s166_s13 = sshll.u32 %s8389_s12, 4  ;;  %p7086_p12 = pneg %p8535_p11  ;;  %s8539_s13 = int_to_ptr.vmem [resolvable:$true] %s166_s13 }
  0x3d   : > { %s7069_s14 = smul.u32 10, %s8463_s24  ;;  %s8221_s12 = scalar_lea.hbm %s9558_s0, 1024 }
  0x3e   : > { %p8546_p10 = pnand %p7086_p12, %p9567_p3  ;;  %s6875_s21 = smul.u32 160, %s8383_s18 }
  0x3f   : > { %p8222_p0 = scmp.ne.s32.totalorder %s9558_s0, %s8221_s12  ;;  %p8228_p9 = scmp.lt.u32.totalorder %s8221_s12, %s9558_s0 }
  0x40   : > { %s8555_s28 = scalar_lea.hbm %s9560_s2, %s6875_s21  ;;  %p8223_p13 = pneg %p8546_p10 }
  0x42   : > { %p8224_p1 = pnand %p8223_p13, %p8222_p0 }
  0x44   : > { %p8225_p4 = pneg %p8224_p1 }
  0x46   : > { %p8230_p12 = pnand %p8228_p9, %p8225_p4 }
  0x48   : > { %8233 = shalt.err (!%p8230_p12)
}
  0x49   : > { %s8234_s21 = scalar_lea.vmem %s8539_s13, 1024  ;;  %p8242_p2 = scmp.lt.s32.totalorder %s8539_s13, %s8539_s13 }
  0x4a   : > { %p8235_p3 = scmp.ne.s32.totalorder %s8539_s13, %s8234_s21  ;;  %p8243_p11 = scmp.lt.s32.totalorder %s8234_s21, %s8234_s21 }
  0x4c   : > { %p8237_p7 = pnand %p8235_p3, %p8223_p13  ;;  %p8244_p6 = por %p8243_p11, %p8242_p2 }
  0x4e   : > { %p8238_p5 = pneg %p8237_p7 }
  0x50   : > { %p8245_p8 = pnand %p8244_p6, %p8238_p5 }
  0x52   : > { %8248 = shalt.err (!%p8245_p8)
}
  0x53   : > { %s8390_s1 = smov 512   ;;  %s8391_s17 = smov 32  }
  0x54   : > { %7089 = dma.hbm_to_vmem [thread:$0]  (!%p8546_p10), %s9558_s0, 1024, %s8539_s13, [#allocation3], %s8390_s1, %s8390_s1, %s8391_s17  }
  0x55   : > { %s205_s25 = scalar_lea.vmem [#allocation7], %s7069_s14  ;;  %s6876_s29 = smul.u32 10240, %s8383_s18 }
  0x56   : > { %s213_s27 = sshll.u32 %s205_s25, 4  ;;  %s8249_s8 = scalar_lea.hbm %s8555_s28, 160  ;;  %s214_s27 = int_to_ptr.vmem [resolvable:$true] %s213_s27 }
  0x57   : > { %p8250_p6 = scmp.ne.s32.totalorder %s8555_s28, %s8249_s8  ;;  %p9592_p8 = scmp.ne.s32.totalorder %s9584_s9, 0 }
  0x58   : > { %s8254_s23 = scalar_lea.hbm %s9560_s2, 320  ;;  %p8255_p5 = scmp.lt.u32.totalorder %s8555_s28, %s9560_s2 }
  0x59   : > { %p8252_p3 = pnand %p8250_p6, %p9592_p8  ;;  %p8256_p7 = scmp.lt.u32.totalorder %s8254_s23, %s8249_s8 }
  0x5a   : > { %p8258_p10 = scmp.lt.u32.totalorder %s8249_s8, %s8555_s28 }
  0x5b   : > { %p8253_p2 = pneg %p8252_p3  ;;  %p8257_p11 = por %p8256_p7, %p8255_p5 }
  0x5d   : > { %p8259_p0 = por %p8258_p10, %p8257_p11 }
  0x5f   : > { %p8260_p13 = pnand %p8259_p0, %p8253_p2 }
  0x61   : > { %8263 = shalt.err (!%p8260_p13)
}
  0x62   : > { %s8264_s13 = scalar_lea.vmem %s214_s27, 160  ;;  %s8392_s14 = smov [#allocation7]  }
  0x63   : > { %p8265_p1 = scmp.ne.s32.totalorder %s214_s27, %s8264_s13  ;;  %s8269_s20 = sshll.u32 %s8392_s14, 4  ;;  %s8270_s20 = int_to_ptr.vmem [resolvable:$false] %s8269_s20 }
  0x64   : > { %s8271_s1 = scalar_lea.vmem %s8270_s20, 320  ;;  %p8272_p12 = scmp.lt.s32.totalorder %s214_s27, %s8270_s20 }
  0x65   : > { %p8267_p4 = pnand %p8265_p1, %p9592_p8  ;;  %p8273_p6 = scmp.lt.s32.totalorder %s8271_s1, %s8264_s13 }
  0x67   : > { %p8268_p9 = pneg %p8267_p4  ;;  %p8274_p3 = por %p8273_p6, %p8272_p12 }
  0x69   : > { %p8275_p5 = pnand %p8274_p3, %p8268_p9 }
  0x6b   : > { %8278 = shalt.err (!%p8275_p5)
}
  0x6c   : > { %p9593_p7 = scmp.ne.s32.totalorder %s9582_s26, 0  ;;  %s8600_s23 = scalar_lea.hbm %s9561_s3, %s6876_s29 }
  0x6d   : > { %s9594_s17 = smul.u32 640, %s8463_s24  ;;  %s221_s25 = scalar_lea.sflag [#allocation9], %s8463_s24 }
  0x6e   : > { %7096 = dma.hbm_to_vmem [thread:$0]  (!%p9593_p7), %s8555_s28, 160, %s214_s27, %s8478_s7  }
  0x6f   : > { %s224_s19 = scalar_lea.vmem [#allocation8], %s9594_s17  ;;  %s8279_s8 = scalar_lea.hbm %s8600_s23, 10240 }
  0x70   : > { %s231_s22 = sshll.u32 %s224_s19, 4  ;;  %p8280_p2 = scmp.ne.s32.totalorder %s8600_s23, %s8279_s8  ;;  %s8604_s22 = int_to_ptr.vmem [resolvable:$true] %s231_s22 }
  0x71   : > { %s8284_s27 = scalar_lea.hbm %s9561_s3, 20480  ;;  %p8285_p0 = scmp.lt.u32.totalorder %s8600_s23, %s9561_s3 }
  0x72   : > { %p8282_p11 = pnand %p8280_p2, %p9592_p8  ;;  %p8286_p13 = scmp.lt.u32.totalorder %s8284_s27, %s8279_s8 }
  0x73   : > { %p8288_p4 = scmp.lt.u32.totalorder %s8279_s8, %s8600_s23 }
  0x74   : > { %p8283_p10 = pneg %p8282_p11  ;;  %p8287_p1 = por %p8286_p13, %p8285_p0 }
  0x76   : > { %p8289_p9 = por %p8288_p4, %p8287_p1 }
  0x78   : > { %p8290_p12 = pnand %p8289_p9, %p8283_p10 }
  0x7a   : > { %8293 = shalt.err (!%p8290_p12)
}
  0x7b   : > { %s8294_s21 = scalar_lea.vmem %s8604_s22, 10240  ;;  %s8393_s13 = smov [#allocation8]  }
  0x7c   : > { %p8295_p6 = scmp.ne.s32.totalorder %s8604_s22, %s8294_s21  ;;  %s8299_s14 = sshll.u32 %s8393_s13, 4  ;;  %s8300_s14 = int_to_ptr.vmem [resolvable:$false] %s8299_s14 }
  0x7d   : > { %s8301_s20 = scalar_lea.vmem %s8300_s14, 20480  ;;  %p8302_p2 = scmp.lt.s32.totalorder %s8604_s22, %s8300_s14 }
  0x7e   : > { %p8297_p3 = pnand %p8295_p6, %p9592_p8  ;;  %p8303_p11 = scmp.lt.s32.totalorder %s8301_s20, %s8294_s21 }
  0x80   : > { %p8298_p5 = pneg %p8297_p3  ;;  %p8304_p0 = por %p8303_p11, %p8302_p2 }
  0x82   : > { %p8305_p13 = pnand %p8304_p0, %p8298_p5 }
  0x84   : > { %8308 = shalt.err (!%p8305_p13)
}
  0x85   : > { %s8394_s1 = smov 64   ;;  %s8395_s15 = smov 4  }
  0x86   : > { %7099 = dma.hbm_to_vmem [thread:$0]  (!%p9593_p7), %s8600_s23, 10240, %s8604_s22, %s221_s25, %s8394_s1, %s8394_s1, %s8395_s15  }
  0x87   : > { %p9595_p8 = scmp.ne.s32.totalorder %s9590_s11, 0 }
  0x88   : > { %p9596_p10 = scmp.eq.s32.totalorder (!%p9595_p8), %s8509_s5, 0 }
  0x89   : > { %243 = sbr.rel (%p9595_p8) target bundleno = 1317 (0x525), region = 36 }
  0x90   : > { %8354 = dma.done.wait (%p9596_p10), [#allocation3], 1024   ;;  %p9597_p1 = pmov %p9596_p10 }
  0x91   : > { %s249_s9 = sand.u32 1, %s8509_s5   ;;  %s8638_s6 = sand.u32 1, %s8375_s16  }
  0x92   : > { %8356 = vsyncadd (%p9597_p1), [#allocation3], 4294966272  ;;  %s7071_s17 = smul.u32 5120, %s8638_s6  ;;  %s250_s26 = scalar_lea.sflag [#allocation6], %s249_s9 }
  0x93   : > { %p9598_p7 = scmp.ne.s32.totalorder %s9585_s10, 0 }
  0x94   : > { %s8641_s24 = scalar_lea.vmem [#allocation5], %s7071_s17 }
  0x95   : > { %8358 = dma.done.wait (%p9598_p7), %s250_s26, 82080  }
  0x96   : > { %8360 = vsyncadd (%p9598_p7), %s250_s26, 4294885216  ;;  %s7072_s11 = smul.u32 10, %s8638_s6  ;;  %s268_s22 = scalar_lea.sflag [#allocation9], %s8638_s6 }
  0x97   : > { %s7073_s23 = smul.u32 640, %s8638_s6 }
  0x98   : > { %s8649_s19 = scalar_lea.vmem [#allocation7], %s7072_s11 }
  0x99   : > { %s8652_s25 = scalar_lea.vmem [#allocation8], %s7073_s23 }
  0x9a   : > { %8362 = dma.done.wait (%p9598_p7), %s268_s22, 10240  }
  0x9b   : > { %8364 = vsyncadd (%p9598_p7), %s268_s22, 4294957056  ;;  %v7150_v0 = vld [vmem:[%s8641_s24 + $0x4] ss:$40 sps:$4 sm:$0xff]   ;;  %v7154_v2 = vld [vmem:[%s8641_s24] ss:$40 sps:$4 sm:$0xff]   ;;  %s6140_s10 = sshll.u32 %s8638_s6, 4 }
  0x9c   : > { %v7152_v1 = vld [vmem:[%s8641_s24 + $0x504] ss:$40 sps:$4 sm:$0xff]   ;;  %4252 = vmatprep.subr.bf16.mxu1 %v7150_v0  ;;  %v7155_v3 = vld [vmem:[%s8641_s24 + $0x500] ss:$40 sps:$4 sm:$0xff]   ;;  %v7156_v4 = vld [vmem:[%s8641_s24 + $0x54] ss:$40 sps:$4 sm:$0xff]  }
  0x9d   : > { %4295 = vmatprep.subr.bf16.mxu0 %v7152_v1  ;;  %4253 = vmatpush1.bf16.msra.mxu1 %v7154_v2  ;;  %v7158_v5 = vld [vmem:[%s8641_s24 + $0x554] ss:$40 sps:$4 sm:$0xff]   ;;  %v7160_v6 = vld [vmem:[%s8641_s24 + $0x50] ss:$40 sps:$4 sm:$0xff]   ;;  %v7162_v8 = vld [vmem:[%s8641_s24 + $0xa4] ss:$40 sps:$4 sm:$0xff]  }
  0x9e   : > { %4296 = vmatpush1.bf16.msra.mxu0 %v7155_v3  ;;  %4254 = vmatprep.subr.bf16.mxu1 %v7156_v4  ;;  %v7161_v7 = vld [vmem:[%s8641_s24 + $0x550] ss:$40 sps:$4 sm:$0xff]   ;;  %v7164_v9 = vld [vmem:[%s8641_s24 + $0x5a4] ss:$40 sps:$4 sm:$0xff]   ;;  %v7166_v10 = vld [vmem:[%s8641_s24 + $0xa0] ss:$40 sps:$4 sm:$0xff]  }
  0x9f   : > { %4297 = vmatprep.subr.bf16.mxu0 %v7158_v5  ;;  %v7167_v11 = vld [vmem:[%s8641_s24 + $0x5a0] ss:$40 sps:$4 sm:$0xff]   ;;  %v7168_v12 = vld [vmem:[%s8641_s24 + $0xf4] ss:$40 sps:$4 sm:$0xff]   ;;  %v7172_v14 = vld [vmem:[%s8641_s24 + $0xf0] ss:$40 sps:$4 sm:$0xff]  }
  0xa0   : > { %v7170_v13 = vld [vmem:[%s8641_s24 + $0x5f4] ss:$40 sps:$4 sm:$0xff]   ;;  %v7173_v15 = vld [vmem:[%s8641_s24 + $0x5f0] ss:$40 sps:$4 sm:$0xff]   ;;  %v7174_v16 = vld [vmem:[%s8641_s24 + $0x144] ss:$40 sps:$4 sm:$0xff]  }
  0xa1   : > { %4255 = vmatpush1.bf16.msra.mxu1 %v7160_v6  ;;  %v7176_v17 = vld [vmem:[%s8641_s24 + $0x644] ss:$40 sps:$4 sm:$0xff]   ;;  %v7178_v18 = vld [vmem:[%s8641_s24 + $0x140] ss:$40 sps:$4 sm:$0xff]   ;;  %v7180_v20 = vld [vmem:[%s8641_s24 + $0x194] ss:$40 sps:$4 sm:$0xff]  }
  0xa2   : > { %4298 = vmatpush1.bf16.msra.mxu0 %v7161_v7  ;;  %4256 = vmatprep.subr.bf16.mxu1 %v7162_v8  ;;  %v7179_v19 = vld [vmem:[%s8641_s24 + $0x640] ss:$40 sps:$4 sm:$0xff]   ;;  %v7182_v21 = vld [vmem:[%s8641_s24 + $0x694] ss:$40 sps:$4 sm:$0xff]   ;;  %v7184_v22 = vld [vmem:[%s8641_s24 + $0x190] ss:$40 sps:$4 sm:$0xff]  }
  0xa3   : > { %4299 = vmatprep.subr.bf16.mxu0 %v7164_v9  ;;  %v7185_v23 = vld [vmem:[%s8641_s24 + $0x690] ss:$40 sps:$4 sm:$0xff]   ;;  %v7186_v24 = vld [vmem:[%s8641_s24 + $0x1e4] ss:$40 sps:$4 sm:$0xff]   ;;  %v7190_v26 = vld [vmem:[%s8641_s24 + $0x1e0] ss:$40 sps:$4 sm:$0xff]  }
  0xa4   : > { %v7188_v25 = vld [vmem:[%s8641_s24 + $0x6e4] ss:$40 sps:$4 sm:$0xff]   ;;  %v7191_v27 = vld [vmem:[%s8641_s24 + $0x6e0] ss:$40 sps:$4 sm:$0xff]   ;;  %v7192_v28 = vld [vmem:[%s8641_s24 + $0x234] ss:$40 sps:$4 sm:$0xff]  }
  0xa5   : > { %4257 = vmatpush1.bf16.msra.mxu1 %v7166_v10  ;;  %v7194_v29 = vld [vmem:[%s8641_s24 + $0x734] ss:$40 sps:$4 sm:$0xff]   ;;  %v7196_v30 = vld [vmem:[%s8641_s24 + $0x230] ss:$40 sps:$4 sm:$0xff]   ;;  %v7198_v32 = vld [vmem:[%s8641_s24 + $0x284] ss:$40 sps:$4 sm:$0xff]  }
  0xa6   : > { %4300 = vmatpush1.bf16.msra.mxu0 %v7167_v11  ;;  %4258 = vmatprep.subr.bf16.mxu1 %v7168_v12  ;;  %v7197_v31 = vld [vmem:[%s8641_s24 + $0x730] ss:$40 sps:$4 sm:$0xff]   ;;  %v7200_v33 = vld [vmem:[%s8641_s24 + $0x784] ss:$40 sps:$4 sm:$0xff]   ;;  %v7202_v34 = vld [vmem:[%s8641_s24 + $0x280] ss:$40 sps:$4 sm:$0xff]  }
  0xa7   : > { %4301 = vmatprep.subr.bf16.mxu0 %v7170_v13  ;;  %v7203_v35 = vld [vmem:[%s8641_s24 + $0x780] ss:$40 sps:$4 sm:$0xff]   ;;  %v7204_v36 = vld [vmem:[%s8641_s24 + $0x2d4] ss:$40 sps:$4 sm:$0xff]   ;;  %v7208_v38 = vld [vmem:[%s8641_s24 + $0x2d0] ss:$40 sps:$4 sm:$0xff]  }
  0xa8   : > { %v7206_v37 = vld [vmem:[%s8641_s24 + $0x7d4] ss:$40 sps:$4 sm:$0xff]   ;;  %v7209_v39 = vld [vmem:[%s8641_s24 + $0x7d0] ss:$40 sps:$4 sm:$0xff]   ;;  %v7210_v40 = vld [vmem:[%s8641_s24 + $0x324] ss:$40 sps:$4 sm:$0xff]  }
  0xa9   : > { %4259 = vmatpush1.bf16.msra.mxu1 %v7172_v14  ;;  %v7212_v41 = vld [vmem:[%s8641_s24 + $0x824] ss:$40 sps:$4 sm:$0xff]   ;;  %v7214_v42 = vld [vmem:[%s8641_s24 + $0x320] ss:$40 sps:$4 sm:$0xff]   ;;  %v7216_v44 = vld [vmem:[%s8641_s24 + $0x374] ss:$40 sps:$4 sm:$0xff]  }
  0xaa   : > { %4302 = vmatpush1.bf16.msra.mxu0 %v7173_v15  ;;  %4260 = vmatprep.subr.bf16.mxu1 %v7174_v16  ;;  %v7215_v43 = vld [vmem:[%s8641_s24 + $0x820] ss:$40 sps:$4 sm:$0xff]   ;;  %v7218_v45 = vld [vmem:[%s8641_s24 + $0x874] ss:$40 sps:$4 sm:$0xff]   ;;  %v7220_v46 = vld [vmem:[%s8641_s24 + $0x370] ss:$40 sps:$4 sm:$0xff]  }
  0xab   : > { %4303 = vmatprep.subr.bf16.mxu0 %v7176_v17  ;;  %v7221_v47 = vld [vmem:[%s8641_s24 + $0x870] ss:$40 sps:$4 sm:$0xff]   ;;  %v310_v48 = vld [vmem:[#allocation2] sm:$0xff]  ;;  %v311_v50 = vld [vmem:[#allocation2 + $0x8] sm:$0xff]  ;;  %s305_s8 = scalar_lea.vmem [#allocation10], %s6140_s10  ;;  %s6877_s28 = sshll.u32 %s8509_s5, 8 }
  0xac   : > { %v314_v49 = vld [vmem:[#allocation2 + $0x20] sm:$0xff]  ;;  %v315_v51 = vld [vmem:[#allocation2 + $0x28] sm:$0xff]  ;;  %v7228_v58 = vld [vmem:[%s8641_s24 + $0x414] ss:$40 sps:$4 sm:$0xff]   ;;  %s6003_s7 = sshll.u32 %s305_s8, 4  ;;  %s9514_s12 = scalar_lea.hbm %s9562_s4, %s6877_s28  ;;  %s9509_s7 = int_to_ptr.vmem [resolvable:$true] %s6003_s7 }
  0xad   : > { %4261 = vmatpush1.bf16.msra.mxu1 %v7178_v18  ;;  %v7222_v52 = vld [vmem:[%s8641_s24 + $0x3c4] ss:$40 sps:$4 sm:$0xff]   ;;  %v8707_v53 = vcombine.high %v310_v48, %v314_v49  ;;  %v8709_v54 = vcombine.high %v311_v50, %v315_v51  ;;  %v7226_v56 = vld [vmem:[%s8641_s24 + $0x3c0] ss:$40 sps:$4 sm:$0xff]   ;;  %v7230_v59 = vld [vmem:[%s8641_s24 + $0x914] ss:$40 sps:$4 sm:$0xff]   ;;  %v8732_v10 = vcombine.low %v310_v48, %v314_v49  ;;  %v8734_v11 = vcombine.low %v311_v50, %v315_v51 }
  0xae   : > { %4304 = vmatpush1.bf16.msra.mxu0 %v7179_v19  ;;  %4262 = vmatprep.subr.bf16.mxu1 %v7180_v20  ;;  %v7224_v55 = vld [vmem:[%s8641_s24 + $0x8c4] ss:$40 sps:$4 sm:$0xff]   ;;  %v7227_v57 = vld [vmem:[%s8641_s24 + $0x8c0] ss:$40 sps:$4 sm:$0xff]   ;;  %v7232_v60 = vld [vmem:[%s8641_s24 + $0x410] ss:$40 sps:$4 sm:$0xff]  }
  0xaf   : > { %4305 = vmatprep.subr.bf16.mxu0 %v7182_v21  ;;  %4284 = vmatprep.mubr.bf16.mxu1 %v8707_v53  ;;  %v7233_v61 = vld [vmem:[%s8641_s24 + $0x910] ss:$40 sps:$4 sm:$0xff]   ;;  %v7234_v62 = vld [vmem:[%s8641_s24 + $0x464] ss:$40 sps:$4 sm:$0xff]   ;;  %v7238_v0 = vld [vmem:[%s8641_s24 + $0x460] ss:$40 sps:$4 sm:$0xff]  }
  0xb0   : > { %4327 = vmatprep.mubr.bf16.mxu0 %v8709_v54  ;;  %v7236_v63 = vld [vmem:[%s8641_s24 + $0x964] ss:$40 sps:$4 sm:$0xff]   ;;  %v7239_v1 = vld [vmem:[%s8641_s24 + $0x960] ss:$40 sps:$4 sm:$0xff]   ;;  %v7240_v2 = vld [vmem:[%s8641_s24 + $0x4b4] ss:$40 sps:$4 sm:$0xff]  }
  0xb1   : > { %4263 = vmatpush1.bf16.msra.mxu1 %v7184_v22  ;;  %v7242_v3 = vld [vmem:[%s8641_s24 + $0x9b4] ss:$40 sps:$4 sm:$0xff]   ;;  %v7244_v4 = vld [vmem:[%s8641_s24 + $0x4b0] ss:$40 sps:$4 sm:$0xff]   ;;  %v7248_v6 = vld [vmem:[%s8641_s24 + $0xa04] ss:$40 sps:$4 sm:$0xff]  }
  0xb2   : > { %4306 = vmatpush1.bf16.msra.mxu0 %v7185_v23  ;;  %4264 = vmatprep.subr.bf16.mxu1 %v7186_v24  ;;  %v7245_v5 = vld [vmem:[%s8641_s24 + $0x9b0] ss:$40 sps:$4 sm:$0xff]   ;;  %v7251_v7 = vld [vmem:[%s8641_s24 + $0xc] ss:$40 sps:$4 sm:$0xff]   ;;  %v7246_v8 = vld [vmem:[%s8641_s24 + $0xa00] ss:$40 sps:$4 sm:$0xff]  }
  0xb3   : > { %4307 = vmatprep.subr.bf16.mxu0 %v7188_v25  ;;  %v7249_v9 = vld [vmem:[%s8641_s24 + $0x8] ss:$40 sps:$4 sm:$0xff]   ;;  %v7254_v12 = vld [vmem:[%s8641_s24 + $0xa54] ss:$40 sps:$4 sm:$0xff]   ;;  %v7255_v15 = vld [vmem:[%s8641_s24 + $0x58] ss:$40 sps:$4 sm:$0xff]  }
  0xb4   : > { %v7257_v13 = vld [vmem:[%s8641_s24 + $0x5c] ss:$40 sps:$4 sm:$0xff]   ;;  %v7252_v14 = vld [vmem:[%s8641_s24 + $0xa50] ss:$40 sps:$4 sm:$0xff]   ;;  %v7263_v17 = vld [vmem:[%s8641_s24 + $0xac] ss:$40 sps:$4 sm:$0xff]  }
  0xb5   : > { %4265 = vmatpush1.bf16.msra.mxu1 %v7190_v26  ;;  %v7260_v16 = vld [vmem:[%s8641_s24 + $0xaa4] ss:$40 sps:$4 sm:$0xff]   ;;  %v7258_v18 = vld [vmem:[%s8641_s24 + $0xaa0] ss:$40 sps:$4 sm:$0xff]   ;;  %v7266_v20 = vld [vmem:[%s8641_s24 + $0xaf4] ss:$40 sps:$4 sm:$0xff]  }
  0xb6   : > { %4308 = vmatpush1.bf16.msra.mxu0 %v7191_v27  ;;  %4266 = vmatprep.subr.bf16.mxu1 %v7192_v28  ;;  %v7261_v19 = vld [vmem:[%s8641_s24 + $0xa8] ss:$40 sps:$4 sm:$0xff]   ;;  %v7269_v21 = vld [vmem:[%s8641_s24 + $0xfc] ss:$40 sps:$4 sm:$0xff]   ;;  %v7267_v23 = vld [vmem:[%s8641_s24 + $0xf8] ss:$40 sps:$4 sm:$0xff]  }
  0xb7   : > { %4309 = vmatprep.subr.bf16.mxu0 %v7194_v29  ;;  %v7264_v22 = vld [vmem:[%s8641_s24 + $0xaf0] ss:$40 sps:$4 sm:$0xff]   ;;  %v7272_v24 = vld [vmem:[%s8641_s24 + $0xb44] ss:$40 sps:$4 sm:$0xff]   ;;  %v7270_v26 = vld [vmem:[%s8641_s24 + $0xb40] ss:$40 sps:$4 sm:$0xff]  }
  0xb8   : > { %v7275_v25 = vld [vmem:[%s8641_s24 + $0x14c] ss:$40 sps:$4 sm:$0xff]   ;;  %v7273_v27 = vld [vmem:[%s8641_s24 + $0x148] ss:$40 sps:$4 sm:$0xff]   ;;  %v7281_v29 = vld [vmem:[%s8641_s24 + $0x19c] ss:$40 sps:$4 sm:$0xff]  }
  0xb9   : > { %4267 = vmatpush1.bf16.msra.mxu1 %v7196_v30  ;;  %v7278_v28 = vld [vmem:[%s8641_s24 + $0xb94] ss:$40 sps:$4 sm:$0xff]   ;;  %v7276_v30 = vld [vmem:[%s8641_s24 + $0xb90] ss:$40 sps:$4 sm:$0xff]   ;;  %v7308_v51 = vld [vmem:[%s8641_s24 + $0xd24] ss:$40 sps:$4 sm:$0xff]  }
  0xba   : > { %4310 = vmatpush1.bf16.msra.mxu0 %v7197_v31  ;;  %4268 = vmatprep.subr.bf16.mxu1 %v7198_v32  ;;  %v7279_v31 = vld [vmem:[%s8641_s24 + $0x198] ss:$40 sps:$4 sm:$0xff]   ;;  %v7284_v32 = vld [vmem:[%s8641_s24 + $0xbe4] ss:$40 sps:$4 sm:$0xff]   ;;  %s5990_s21 = scalar_lea.sflag [#allocation4], %s8638_s6  ;;  %s8309_s13 = scalar_lea.vmem %s9509_s7, 256 }
  0xbb   : > { %4311 = vmatprep.subr.bf16.mxu0 %v7200_v33  ;;  %v7287_v33 = vld [vmem:[%s8641_s24 + $0x1ec] ss:$40 sps:$4 sm:$0xff]   ;;  %v7305_v48 = vld [vmem:[%s8641_s24 + $0x2dc] ss:$40 sps:$4 sm:$0xff]   ;;  %v7300_v49 = vld [vmem:[%s8641_s24 + $0xcd0] ss:$40 sps:$4 sm:$0xff]   ;;  %p8310_p4 = scmp.ne.s32.totalorder %s9509_s7, %s8309_s13 }
  0xbc   : > { %v7303_v50 = vld [vmem:[%s8641_s24 + $0x2d8] ss:$40 sps:$4 sm:$0xff]   ;;  %p9599_p9 = scmp.ne.s32.totalorder %s9587_s30, 0  ;;  %s8396_s5 = smov [#allocation10]  }
  0xbd   : > { %4269 = vmatpush1.bf16.msra.mxu1 %v7202_v34  ;;  %v8761_v34 = vld [vmem:[#allocation2 + $0x10] sm:$0xff]  ;;  %s8313_s14 = sshll.u32 %s8396_s5, 4  ;;  %s8314_s14 = int_to_ptr.vmem [resolvable:$false] %s8313_s14 }
  0xbe   : > { %4312 = vmatpush1.bf16.msra.mxu0 %v7203_v35  ;;  %4270 = vmatprep.subr.bf16.mxu1 %v7204_v36  ;;  %v8763_v35 = vld [vmem:[#allocation2 + $0x30] sm:$0xff]  ;;  %v7282_v36 = vld [vmem:[%s8641_s24 + $0xbe0] ss:$40 sps:$4 sm:$0xff]   ;;  %p8311_p12 = pnand %p8310_p4, %p9599_p9  ;;  %s8315_s20 = scalar_lea.vmem %s8314_s14, 512 }
  0xbf   : > { %4313 = vmatprep.subr.bf16.mxu0 %v7206_v37  ;;  %v7285_v37 = vld [vmem:[%s8641_s24 + $0x1e8] ss:$40 sps:$4 sm:$0xff]   ;;  %p8316_p3 = scmp.lt.s32.totalorder %s9509_s7, %s8314_s14  ;;  %p8317_p5 = scmp.lt.s32.totalorder %s8315_s20, %s8309_s13 }
  0xc0   : > { %p8312_p6 = pneg %p8311_p12 }
  0xc1   : > { %4271 = vmatpush1.bf16.msra.mxu1 %v7208_v38  ;;  %v8769_v38 = vcombine.high %v8761_v34, %v8763_v35  ;;  %p8318_p2 = por %p8317_p5, %p8316_p3 }
  0xc2   : > { %4314 = vmatpush1.bf16.msra.mxu0 %v7209_v39  ;;  %4272 = vmatprep.subr.bf16.mxu1 %v7210_v40  ;;  %v7290_v39 = vld [vmem:[%s8641_s24 + $0xc34] ss:$40 sps:$4 sm:$0xff]  }
  0xc3   : > { %4315 = vmatprep.subr.bf16.mxu0 %v7212_v41  ;;  %v7293_v40 = vld [vmem:[%s8641_s24 + $0x23c] ss:$40 sps:$4 sm:$0xff]   ;;  %v7288_v41 = vld [vmem:[%s8641_s24 + $0xc30] ss:$40 sps:$4 sm:$0xff]   ;;  %p8319_p11 = pnand %p8318_p2, %p8312_p6 }
  0xc5   : > { %4273 = vmatpush1.bf16.msra.mxu1 %v7214_v42  ;;  %v7291_v42 = vld [vmem:[%s8641_s24 + $0x238] ss:$40 sps:$4 sm:$0xff]  }
  0xc6   : > { %4316 = vmatpush1.bf16.msra.mxu0 %v7215_v43  ;;  %4274 = vmatprep.subr.bf16.mxu1 %v7216_v44  ;;  %v7296_v43 = vld [vmem:[%s8641_s24 + $0xc84] ss:$40 sps:$4 sm:$0xff]  }
  0xc7   : > { %4317 = vmatprep.subr.bf16.mxu0 %v7218_v45  ;;  %v7299_v44 = vld [vmem:[%s8641_s24 + $0x28c] ss:$40 sps:$4 sm:$0xff]   ;;  %v7294_v45 = vld [vmem:[%s8641_s24 + $0xc80] ss:$40 sps:$4 sm:$0xff]  }
  0xc9   : > { %4275 = vmatpush1.bf16.msra.mxu1 %v7220_v46  ;;  %v7297_v46 = vld [vmem:[%s8641_s24 + $0x288] ss:$40 sps:$4 sm:$0xff]  }
  0xca   : > { %4318 = vmatpush1.bf16.msra.mxu0 %v7221_v47  ;;  %4276 = vmatprep.subr.bf16.mxu1 %v7222_v52  ;;  %v7302_v47 = vld [vmem:[%s8641_s24 + $0xcd4] ss:$40 sps:$4 sm:$0xff]  }
  0xcb   : > { %4319 = vmatprep.subr.bf16.mxu0 %v7224_v55  ;;  %v7311_v52 = vld [vmem:[%s8641_s24 + $0x32c] ss:$40 sps:$4 sm:$0xff]   ;;  %v7306_v55 = vld [vmem:[%s8641_s24 + $0xd20] ss:$40 sps:$4 sm:$0xff]  }
  0xcd   : > { %4277 = vmatpush1.bf16.msra.mxu1 %v7226_v56  ;;  %v7309_v56 = vld [vmem:[%s8641_s24 + $0x328] ss:$40 sps:$4 sm:$0xff]  }
  0xce   : > { %4320 = vmatpush1.bf16.msra.mxu0 %v7227_v57  ;;  %4278 = vmatprep.subr.bf16.mxu1 %v7228_v58  ;;  %v7314_v57 = vld [vmem:[%s8641_s24 + $0xd74] ss:$40 sps:$4 sm:$0xff]  }
  0xcf   : > { %4321 = vmatprep.subr.bf16.mxu0 %v7230_v59  ;;  %v7317_v58 = vld [vmem:[%s8641_s24 + $0x37c] ss:$40 sps:$4 sm:$0xff]   ;;  %v7312_v59 = vld [vmem:[%s8641_s24 + $0xd70] ss:$40 sps:$4 sm:$0xff]  }
  0xd1   : > { %4279 = vmatpush1.bf16.msra.mxu1 %v7232_v60  ;;  %v7315_v60 = vld [vmem:[%s8641_s24 + $0x378] ss:$40 sps:$4 sm:$0xff]  }
  0xd2   : > { %4322 = vmatpush1.bf16.msra.mxu0 %v7233_v61  ;;  %4280 = vmatprep.subr.bf16.mxu1 %v7234_v62  ;;  %v7320_v61 = vld [vmem:[%s8641_s24 + $0xdc4] ss:$40 sps:$4 sm:$0xff]  }
  0xd3   : > { %4323 = vmatprep.subr.bf16.mxu0 %v7236_v63  ;;  %v7323_v62 = vld [vmem:[%s8641_s24 + $0x3cc] ss:$40 sps:$4 sm:$0xff]   ;;  %v7318_v63 = vld [vmem:[%s8641_s24 + $0xdc0] ss:$40 sps:$4 sm:$0xff]  }
  0xd5   : > { %4281 = vmatpush1.bf16.msra.mxu1 %v7238_v0  ;;  %v7321_v0 = vld [vmem:[%s8641_s24 + $0x3c8] ss:$40 sps:$4 sm:$0xff]  }
  0xd6   : > { %4324 = vmatpush1.bf16.msra.mxu0 %v7239_v1  ;;  %4282 = vmatprep.subr.bf16.mxu1 %v7240_v2  ;;  %v7326_v1 = vld [vmem:[%s8641_s24 + $0xe14] ss:$40 sps:$4 sm:$0xff]  }
  0xd7   : > { %4325 = vmatprep.subr.bf16.mxu0 %v7242_v3  ;;  %v7329_v2 = vld [vmem:[%s8641_s24 + $0x41c] ss:$40 sps:$4 sm:$0xff]   ;;  %v7324_v3 = vld [vmem:[%s8641_s24 + $0xe10] ss:$40 sps:$4 sm:$0xff]  }
  0xd9   : > { %4283 = vmatpush1.bf16.msra.mxu1 %v7244_v4  ;;  %v7327_v4 = vld [vmem:[%s8641_s24 + $0x418] ss:$40 sps:$4 sm:$0xff]  }
  0xda   : > { %4326 = vmatpush1.bf16.msra.mxu0 %v7245_v5  ;;  %4424 = vmatprep.subr.bf16.mxu1 %v7251_v7  ;;  %v7332_v5 = vld [vmem:[%s8641_s24 + $0xe64] ss:$40 sps:$4 sm:$0xff]   ;;  %v7330_v7 = vld [vmem:[%s8641_s24 + $0xe60] ss:$40 sps:$4 sm:$0xff]  }
  0xdb   : > { %4338 = vmatprep.subr.bf16.mxu0 %v7248_v6  ;;  %v7335_v6 = vld [vmem:[%s8641_s24 + $0x46c] ss:$40 sps:$4 sm:$0xff]  }
  0xdc   : > { %4285 = vmatmul.mubr.bf16.vlgmr.msra.gmra.mrb[0].mxu1 %v8732_v10 }
  0xdd   : > { %4328 = vmatmul.mubr.bf16.vlgmr.msra.gmra.mrb[0].mxu0 %v8734_v11  ;;  %4425 = vmatpush1.bf16.msra.mxu1 %v7249_v9  ;;  %v7338_v9 = vld [vmem:[%s8641_s24 + $0xeb4] ss:$40 sps:$4 sm:$0xff]  }
  0xde   : > { %4339 = vmatpush1.bf16.msra.mxu0 %v7246_v8  ;;  %4426 = vmatprep.subr.bf16.mxu1 %v7257_v13  ;;  %v7333_v8 = vld [vmem:[%s8641_s24 + $0x468] ss:$40 sps:$4 sm:$0xff]  }
  0xdf   : > { %4340 = vmatprep.subr.bf16.mxu0 %v7254_v12  ;;  %4456 = vmatprep.mubr.bf16.mxu1 %v8707_v53  ;;  %v7341_v12 = vld [vmem:[%s8641_s24 + $0x4bc] ss:$40 sps:$4 sm:$0xff]   ;;  %v7336_v13 = vld [vmem:[%s8641_s24 + $0xeb0] ss:$40 sps:$4 sm:$0xff]  }
  0xe0   : > { %4370 = vmatprep.mubr.bf16.mxu0 %v8769_v38 }
  0xe1   : > { %4427 = vmatpush1.bf16.msra.mxu1 %v7255_v15  ;;  %v7344_v15 = vld [vmem:[%s8641_s24 + $0xf04] ss:$40 sps:$4 sm:$0xff]  }
  0xe2   : > { %4341 = vmatpush1.bf16.msra.mxu0 %v7252_v14  ;;  %4428 = vmatprep.subr.bf16.mxu1 %v7263_v17  ;;  %v7339_v14 = vld [vmem:[%s8641_s24 + $0x4b8] ss:$40 sps:$4 sm:$0xff]   ;;  %v8812_v17 = vcombine.low %v8761_v34, %v8763_v35  ;;  %v7368_v35 = vld [vmem:[%s8641_s24 + $0x1044] ss:$40 sps:$4 sm:$0xff]  }
  0xe3   : > { %4342 = vmatprep.subr.bf16.mxu0 %v7260_v16  ;;  %v7347_v16 = vld [vmem:[%s8641_s24 + $0x50c] ss:$40 sps:$4 sm:$0xff]   ;;  %v7363_v34 = vld [vmem:[%s8641_s24 + $0x5f8] ss:$40 sps:$4 sm:$0xff]  }
  0xe5   : > { %4429 = vmatpush1.bf16.msra.mxu1 %v7261_v19  ;;  %v7345_v19 = vld [vmem:[%s8641_s24 + $0x508] ss:$40 sps:$4 sm:$0xff]  }
  0xe6   : > { %4343 = vmatpush1.bf16.msra.mxu0 %v7258_v18  ;;  %4430 = vmatprep.subr.bf16.mxu1 %v7269_v21  ;;  %v7342_v18 = vld [vmem:[%s8641_s24 + $0xf00] ss:$40 sps:$4 sm:$0xff]   ;;  %v7353_v21 = vld [vmem:[%s8641_s24 + $0x55c] ss:$40 sps:$4 sm:$0xff]  }
  0xe7   : > { %4344 = vmatprep.subr.bf16.mxu0 %v7266_v20  ;;  %v7350_v20 = vld [vmem:[%s8641_s24 + $0xf54] ss:$40 sps:$4 sm:$0xff]  }
  0xe9   : > { %4431 = vmatpush1.bf16.msra.mxu1 %v7267_v23  ;;  %v8820_v23 = vld [vmem:[#allocation2 + $0x38] sm:$0xff] }
  0xea   : > { %4345 = vmatpush1.bf16.msra.mxu0 %v7264_v22  ;;  %4432 = vmatprep.subr.bf16.mxu1 %v7275_v25  ;;  %v8818_v22 = vld [vmem:[#allocation2 + $0x18] sm:$0xff] }
  0xeb   : > { %4346 = vmatprep.subr.bf16.mxu0 %v7272_v24  ;;  %v7348_v24 = vld [vmem:[%s8641_s24 + $0xf50] ss:$40 sps:$4 sm:$0xff]  }
  0xec   : > { %v7351_v25 = vld [vmem:[%s8641_s24 + $0x558] ss:$40 sps:$4 sm:$0xff]  }
  0xed   : > { %4433 = vmatpush1.bf16.msra.mxu1 %v7273_v27  ;;  %v7356_v27 = vld [vmem:[%s8641_s24 + $0xfa4] ss:$40 sps:$4 sm:$0xff]  }
  0xee   : > { %4347 = vmatpush1.bf16.msra.mxu0 %v7270_v26  ;;  %4434 = vmatprep.subr.bf16.mxu1 %v7281_v29  ;;  %v8828_v26 = vcombine.high %v8818_v22, %v8820_v23  ;;  %v7354_v29 = vld [vmem:[%s8641_s24 + $0xfa0] ss:$40 sps:$4 sm:$0xff]  }
  0xef   : > { %4348 = vmatprep.subr.bf16.mxu0 %v7278_v28  ;;  %v7359_v28 = vld [vmem:[%s8641_s24 + $0x5ac] ss:$40 sps:$4 sm:$0xff]  }
  0xf1   : > { %4435 = vmatpush1.bf16.msra.mxu1 %v7279_v31  ;;  %v7362_v31 = vld [vmem:[%s8641_s24 + $0xff4] ss:$40 sps:$4 sm:$0xff]  }
  0xf2   : > { %4349 = vmatpush1.bf16.msra.mxu0 %v7276_v30  ;;  %4436 = vmatprep.subr.bf16.mxu1 %v7287_v33  ;;  %v7357_v30 = vld [vmem:[%s8641_s24 + $0x5a8] ss:$40 sps:$4 sm:$0xff]  }
  0xf3   : > { %4350 = vmatprep.subr.bf16.mxu0 %v7284_v32  ;;  %v7365_v32 = vld [vmem:[%s8641_s24 + $0x5fc] ss:$40 sps:$4 sm:$0xff]   ;;  %v7360_v33 = vld [vmem:[%s8641_s24 + $0xff0] ss:$40 sps:$4 sm:$0xff]  }
  0xf5   : > { %4437 = vmatpush1.bf16.msra.mxu1 %v7285_v37  ;;  %v7366_v37 = vld [vmem:[%s8641_s24 + $0x1040] ss:$40 sps:$4 sm:$0xff]  }
  0xf6   : > { %4351 = vmatpush1.bf16.msra.mxu0 %v7282_v36  ;;  %4438 = vmatprep.subr.bf16.mxu1 %v7293_v40  ;;  %v7371_v36 = vld [vmem:[%s8641_s24 + $0x64c] ss:$40 sps:$4 sm:$0xff]  }
  0xf7   : > { %4352 = vmatprep.subr.bf16.mxu0 %v7290_v39  ;;  %v7369_v39 = vld [vmem:[%s8641_s24 + $0x648] ss:$40 sps:$4 sm:$0xff]   ;;  %v7374_v40 = vld [vmem:[%s8641_s24 + $0x1094] ss:$40 sps:$4 sm:$0xff]  }
  0xf9   : > { %4439 = vmatpush1.bf16.msra.mxu1 %v7291_v42  ;;  %v7372_v42 = vld [vmem:[%s8641_s24 + $0x1090] ss:$40 sps:$4 sm:$0xff]  }
  0xfa   : > { %4353 = vmatpush1.bf16.msra.mxu0 %v7288_v41  ;;  %4440 = vmatprep.subr.bf16.mxu1 %v7299_v44  ;;  %v7377_v41 = vld [vmem:[%s8641_s24 + $0x69c] ss:$40 sps:$4 sm:$0xff]  }
  0xfb   : > { %4354 = vmatprep.subr.bf16.mxu0 %v7296_v43  ;;  %v7375_v43 = vld [vmem:[%s8641_s24 + $0x698] ss:$40 sps:$4 sm:$0xff]   ;;  %v7380_v44 = vld [vmem:[%s8641_s24 + $0x10e4] ss:$40 sps:$4 sm:$0xff]  }
  0xfd   : > { %4441 = vmatpush1.bf16.msra.mxu1 %v7297_v46  ;;  %v7378_v46 = vld [vmem:[%s8641_s24 + $0x10e0] ss:$40 sps:$4 sm:$0xff]  }
  0xfe   : > { %4355 = vmatpush1.bf16.msra.mxu0 %v7294_v45  ;;  %4442 = vmatprep.subr.bf16.mxu1 %v7305_v48  ;;  %v7383_v45 = vld [vmem:[%s8641_s24 + $0x6ec] ss:$40 sps:$4 sm:$0xff]  }
  0xff   : > { %4356 = vmatprep.subr.bf16.mxu0 %v7302_v47  ;;  %v7381_v47 = vld [vmem:[%s8641_s24 + $0x6e8] ss:$40 sps:$4 sm:$0xff]   ;;  %v7386_v48 = vld [vmem:[%s8641_s24 + $0x1134] ss:$40 sps:$4 sm:$0xff]  }
 0x101   : > { %4443 = vmatpush1.bf16.msra.mxu1 %v7303_v50  ;;  %v7384_v50 = vld [vmem:[%s8641_s24 + $0x1130] ss:$40 sps:$4 sm:$0xff]  }
 0x102   : > { %4357 = vmatpush1.bf16.msra.mxu0 %v7300_v49  ;;  %4444 = vmatprep.subr.bf16.mxu1 %v7311_v52  ;;  %v7389_v49 = vld [vmem:[%s8641_s24 + $0x73c] ss:$40 sps:$4 sm:$0xff]  }
 0x103   : > { %4358 = vmatprep.subr.bf16.mxu0 %v7308_v51  ;;  %v7387_v51 = vld [vmem:[%s8641_s24 + $0x738] ss:$40 sps:$4 sm:$0xff]   ;;  %v7392_v52 = vld [vmem:[%s8641_s24 + $0x1184] ss:$40 sps:$4 sm:$0xff]  }
 0x105   : > { %4445 = vmatpush1.bf16.msra.mxu1 %v7309_v56  ;;  %v7390_v56 = vld [vmem:[%s8641_s24 + $0x1180] ss:$40 sps:$4 sm:$0xff]  }
 0x106   : > { %4359 = vmatpush1.bf16.msra.mxu0 %v7306_v55  ;;  %4446 = vmatprep.subr.bf16.mxu1 %v7317_v58  ;;  %v7395_v55 = vld [vmem:[%s8641_s24 + $0x78c] ss:$40 sps:$4 sm:$0xff]  }
 0x107   : > { %4360 = vmatprep.subr.bf16.mxu0 %v7314_v57  ;;  %v7393_v57 = vld [vmem:[%s8641_s24 + $0x788] ss:$40 sps:$4 sm:$0xff]   ;;  %v7398_v58 = vld [vmem:[%s8641_s24 + $0x11d4] ss:$40 sps:$4 sm:$0xff]  }
 0x109   : > { %4447 = vmatpush1.bf16.msra.mxu1 %v7315_v60  ;;  %v7396_v60 = vld [vmem:[%s8641_s24 + $0x11d0] ss:$40 sps:$4 sm:$0xff]  }
 0x10a   : > { %4361 = vmatpush1.bf16.msra.mxu0 %v7312_v59  ;;  %4448 = vmatprep.subr.bf16.mxu1 %v7323_v62  ;;  %v7401_v59 = vld [vmem:[%s8641_s24 + $0x7dc] ss:$40 sps:$4 sm:$0xff]  }
 0x10b   : > { %4362 = vmatprep.subr.bf16.mxu0 %v7320_v61  ;;  %v7399_v61 = vld [vmem:[%s8641_s24 + $0x7d8] ss:$40 sps:$4 sm:$0xff]   ;;  %v7404_v62 = vld [vmem:[%s8641_s24 + $0x1224] ss:$40 sps:$4 sm:$0xff]  }
 0x10d   : > { %4449 = vmatpush1.bf16.msra.mxu1 %v7321_v0  ;;  %v7402_v0 = vld [vmem:[%s8641_s24 + $0x1220] ss:$40 sps:$4 sm:$0xff]  }
 0x10e   : > { %4363 = vmatpush1.bf16.msra.mxu0 %v7318_v63  ;;  %4450 = vmatprep.subr.bf16.mxu1 %v7329_v2  ;;  %v7407_v63 = vld [vmem:[%s8641_s24 + $0x82c] ss:$40 sps:$4 sm:$0xff]  }
 0x10f   : > { %4364 = vmatprep.subr.bf16.mxu0 %v7326_v1  ;;  %v7405_v1 = vld [vmem:[%s8641_s24 + $0x828] ss:$40 sps:$4 sm:$0xff]   ;;  %v7410_v2 = vld [vmem:[%s8641_s24 + $0x1274] ss:$40 sps:$4 sm:$0xff]  }
 0x111   : > { %4451 = vmatpush1.bf16.msra.mxu1 %v7327_v4  ;;  %v7408_v4 = vld [vmem:[%s8641_s24 + $0x1270] ss:$40 sps:$4 sm:$0xff]  }
 0x112   : > { %4365 = vmatpush1.bf16.msra.mxu0 %v7324_v3  ;;  %4452 = vmatprep.subr.bf16.mxu1 %v7335_v6  ;;  %v7413_v3 = vld [vmem:[%s8641_s24 + $0x87c] ss:$40 sps:$4 sm:$0xff]  }
 0x113   : > { %4366 = vmatprep.subr.bf16.mxu0 %v7332_v5  ;;  %v7411_v5 = vld [vmem:[%s8641_s24 + $0x878] ss:$40 sps:$4 sm:$0xff]   ;;  %v7416_v6 = vld [vmem:[%s8641_s24 + $0x12c4] ss:$40 sps:$4 sm:$0xff]  }
 0x115   : > { %4453 = vmatpush1.bf16.msra.mxu1 %v7333_v8  ;;  %v7414_v8 = vld [vmem:[%s8641_s24 + $0x12c0] ss:$40 sps:$4 sm:$0xff]  }
 0x116   : > { %4367 = vmatpush1.bf16.msra.mxu0 %v7330_v7  ;;  %4454 = vmatprep.subr.bf16.mxu1 %v7341_v12  ;;  %v7419_v7 = vld [vmem:[%s8641_s24 + $0x8cc] ss:$40 sps:$4 sm:$0xff]  }
 0x117   : > { %4368 = vmatprep.subr.bf16.mxu0 %v7338_v9  ;;  %v7417_v9 = vld [vmem:[%s8641_s24 + $0x8c8] ss:$40 sps:$4 sm:$0xff]   ;;  %v7422_v12 = vld [vmem:[%s8641_s24 + $0x1314] ss:$40 sps:$4 sm:$0xff]  }
 0x119   : > { %4455 = vmatpush1.bf16.msra.mxu1 %v7339_v14  ;;  %v7420_v14 = vld [vmem:[%s8641_s24 + $0x1310] ss:$40 sps:$4 sm:$0xff]  }
 0x11a   : > { %4369 = vmatpush1.bf16.msra.mxu0 %v7336_v13  ;;  %4467 = vmatprep.subr.bf16.mxu1 %v7347_v16  ;;  %v7425_v13 = vld [vmem:[%s8641_s24 + $0x91c] ss:$40 sps:$4 sm:$0xff]  }
 0x11b   : > { %4381 = vmatprep.subr.bf16.mxu0 %v7344_v15  ;;  %v7423_v15 = vld [vmem:[%s8641_s24 + $0x918] ss:$40 sps:$4 sm:$0xff]   ;;  %v7428_v16 = vld [vmem:[%s8641_s24 + $0x1364] ss:$40 sps:$4 sm:$0xff]  }
 0x11c   : > { %4457 = vmatmul.mubr.bf16.vlgmr.msra.gmra.mrb[4].mxu1 %v8732_v10 }
 0x11d   : > { %4371 = vmatmul.mubr.bf16.vlgmr.msra.gmra.mrb[0].mxu0 %v8812_v17  ;;  %4468 = vmatpush1.bf16.msra.mxu1 %v7345_v19  ;;  %v7426_v19 = vld [vmem:[%s8641_s24 + $0x1360] ss:$40 sps:$4 sm:$0xff]  }
 0x11e   : > { %4382 = vmatpush1.bf16.msra.mxu0 %v7342_v18  ;;  %4469 = vmatprep.subr.bf16.mxu1 %v7353_v21  ;;  %v7431_v18 = vld [vmem:[%s8641_s24 + $0x96c] ss:$40 sps:$4 sm:$0xff]  }
 0x11f   : > { %4383 = vmatprep.subr.bf16.mxu0 %v7350_v20  ;;  %4413 = vmatprep.mubr.bf16.mxu0 %v8828_v26  ;;  %v7429_v20 = vld [vmem:[%s8641_s24 + $0x968] ss:$40 sps:$4 sm:$0xff]   ;;  %v7434_v21 = vld [vmem:[%s8641_s24 + $0x13b4] ss:$40 sps:$4 sm:$0xff]  }
 0x120   : > { %4499 = vmatprep.mubr.bf16.mxu1 %v8709_v54 }
 0x121   : > { %4470 = vmatpush1.bf16.msra.mxu1 %v7351_v25  ;;  %v7432_v25 = vld [vmem:[%s8641_s24 + $0x13b0] ss:$40 sps:$4 sm:$0xff]  }
 0x122   : > { %4384 = vmatpush1.bf16.msra.mxu0 %v7348_v24  ;;  %4471 = vmatprep.subr.bf16.mxu1 %v7359_v28  ;;  %v7437_v24 = vld [vmem:[%s8641_s24 + $0x9bc] ss:$40 sps:$4 sm:$0xff]   ;;  %v7440_v28 = vld [vmem:[%s8641_s24 + $0xa0c] ss:$40 sps:$4 sm:$0xff]  }
 0x123   : > { %4385 = vmatprep.subr.bf16.mxu0 %v7356_v27  ;;  %v7435_v27 = vld [vmem:[%s8641_s24 + $0x9b8] ss:$40 sps:$4 sm:$0xff]  }
 0x125   : > { %4472 = vmatpush1.bf16.msra.mxu1 %v7357_v30  ;;  %v8892_v30 = vcombine.low %v8818_v22, %v8820_v23  ;;  %v7452_v22 = vld [vmem:[%s8641_s24 + $0xaac] ss:$40 sps:$4 sm:$0xff]  }
 0x126   : > { %4386 = vmatpush1.bf16.msra.mxu0 %v7354_v29  ;;  %4473 = vmatprep.subr.bf16.mxu1 %v7365_v32  ;;  %v7443_v29 = vld [vmem:[%s8641_s24 + $0x14] ss:$40 sps:$4 sm:$0xff]   ;;  %v7441_v32 = vld [vmem:[%s8641_s24 + $0x10] ss:$40 sps:$4 sm:$0xff]  }
 0x127   : > { %4387 = vmatprep.subr.bf16.mxu0 %v7362_v31  ;;  %v7438_v31 = vld [vmem:[%s8641_s24 + $0xa08] ss:$40 sps:$4 sm:$0xff]   ;;  %v7455_v23 = vld [vmem:[%s8641_s24 + $0xb4] ss:$40 sps:$4 sm:$0xff]  }
 0x129   : > { %4474 = vmatpush1.bf16.msra.mxu1 %v7363_v34  ;;  %v7449_v34 = vld [vmem:[%s8641_s24 + $0x64] ss:$40 sps:$4 sm:$0xff]  }
 0x12a   : > { %4388 = vmatpush1.bf16.msra.mxu0 %v7360_v33  ;;  %4475 = vmatprep.subr.bf16.mxu1 %v7371_v36  ;;  %v7446_v33 = vld [vmem:[%s8641_s24 + $0xa5c] ss:$40 sps:$4 sm:$0xff]   ;;  %v7447_v36 = vld [vmem:[%s8641_s24 + $0x60] ss:$40 sps:$4 sm:$0xff]  }
 0x12b   : > { %4389 = vmatprep.subr.bf16.mxu0 %v7368_v35  ;;  %v7444_v35 = vld [vmem:[%s8641_s24 + $0xa58] ss:$40 sps:$4 sm:$0xff]  }
 0x12d   : > { %4476 = vmatpush1.bf16.msra.mxu1 %v7369_v39  ;;  %v7453_v39 = vld [vmem:[%s8641_s24 + $0xb0] ss:$40 sps:$4 sm:$0xff]  }
 0x12e   : > { %4390 = vmatpush1.bf16.msra.mxu0 %v7366_v37  ;;  %4477 = vmatprep.subr.bf16.mxu1 %v7377_v41  ;;  %v7450_v37 = vld [vmem:[%s8641_s24 + $0xaa8] ss:$40 sps:$4 sm:$0xff]   ;;  %v7461_v41 = vld [vmem:[%s8641_s24 + $0x104] ss:$40 sps:$4 sm:$0xff]  }
 0x12f   : > { %4391 = vmatprep.subr.bf16.mxu0 %v7374_v40  ;;  %v7458_v40 = vld [vmem:[%s8641_s24 + $0xafc] ss:$40 sps:$4 sm:$0xff]  }
 0x131   : > { %4478 = vmatpush1.bf16.msra.mxu1 %v7375_v43  ;;  %v7459_v43 = vld [vmem:[%s8641_s24 + $0x100] ss:$40 sps:$4 sm:$0xff]  }
 0x132   : > { %4392 = vmatpush1.bf16.msra.mxu0 %v7372_v42  ;;  %4479 = vmatprep.subr.bf16.mxu1 %v7383_v45  ;;  %v7456_v42 = vld [vmem:[%s8641_s24 + $0xaf8] ss:$40 sps:$4 sm:$0xff]   ;;  %v7467_v45 = vld [vmem:[%s8641_s24 + $0x154] ss:$40 sps:$4 sm:$0xff]  }
 0x133   : > { %4393 = vmatprep.subr.bf16.mxu0 %v7380_v44  ;;  %v7464_v44 = vld [vmem:[%s8641_s24 + $0xb4c] ss:$40 sps:$4 sm:$0xff]  }
 0x135   : > { %4480 = vmatpush1.bf16.msra.mxu1 %v7381_v47  ;;  %v7465_v47 = vld [vmem:[%s8641_s24 + $0x150] ss:$40 sps:$4 sm:$0xff]  }
 0x136   : > { %4394 = vmatpush1.bf16.msra.mxu0 %v7378_v46  ;;  %4481 = vmatprep.subr.bf16.mxu1 %v7389_v49  ;;  %v7462_v46 = vld [vmem:[%s8641_s24 + $0xb48] ss:$40 sps:$4 sm:$0xff]   ;;  %v7473_v49 = vld [vmem:[%s8641_s24 + $0x1a4] ss:$40 sps:$4 sm:$0xff]  }
 0x137   : > { %4395 = vmatprep.subr.bf16.mxu0 %v7386_v48  ;;  %v7470_v48 = vld [vmem:[%s8641_s24 + $0xb9c] ss:$40 sps:$4 sm:$0xff]  }
 0x139   : > { %4482 = vmatpush1.bf16.msra.mxu1 %v7387_v51  ;;  %v7471_v51 = vld [vmem:[%s8641_s24 + $0x1a0] ss:$40 sps:$4 sm:$0xff]  }
 0x13a   : > { %4396 = vmatpush1.bf16.msra.mxu0 %v7384_v50  ;;  %4483 = vmatprep.subr.bf16.mxu1 %v7395_v55  ;;  %v7468_v50 = vld [vmem:[%s8641_s24 + $0xb98] ss:$40 sps:$4 sm:$0xff]   ;;  %v7479_v55 = vld [vmem:[%s8641_s24 + $0x1f4] ss:$40 sps:$4 sm:$0xff]  }
 0x13b   : > { %4397 = vmatprep.subr.bf16.mxu0 %v7392_v52  ;;  %v7476_v52 = vld [vmem:[%s8641_s24 + $0xbec] ss:$40 sps:$4 sm:$0xff]  }
 0x13d   : > { %4484 = vmatpush1.bf16.msra.mxu1 %v7393_v57  ;;  %v7477_v57 = vld [vmem:[%s8641_s24 + $0x1f0] ss:$40 sps:$4 sm:$0xff]  }
 0x13e   : > { %4398 = vmatpush1.bf16.msra.mxu0 %v7390_v56  ;;  %4485 = vmatprep.subr.bf16.mxu1 %v7401_v59  ;;  %v7474_v56 = vld [vmem:[%s8641_s24 + $0xbe8] ss:$40 sps:$4 sm:$0xff]   ;;  %v7485_v59 = vld [vmem:[%s8641_s24 + $0x244] ss:$40 sps:$4 sm:$0xff]  }
 0x13f   : > { %4399 = vmatprep.subr.bf16.mxu0 %v7398_v58  ;;  %v7482_v58 = vld [vmem:[%s8641_s24 + $0xc3c] ss:$40 sps:$4 sm:$0xff]  }
 0x141   : > { %4486 = vmatpush1.bf16.msra.mxu1 %v7399_v61  ;;  %v7483_v61 = vld [vmem:[%s8641_s24 + $0x240] ss:$40 sps:$4 sm:$0xff]  }
 0x142   : > { %4400 = vmatpush1.bf16.msra.mxu0 %v7396_v60  ;;  %4487 = vmatprep.subr.bf16.mxu1 %v7407_v63  ;;  %v7480_v60 = vld [vmem:[%s8641_s24 + $0xc38] ss:$40 sps:$4 sm:$0xff]   ;;  %v7491_v63 = vld [vmem:[%s8641_s24 + $0x294] ss:$40 sps:$4 sm:$0xff]  }
 0x143   : > { %4401 = vmatprep.subr.bf16.mxu0 %v7404_v62  ;;  %v7488_v62 = vld [vmem:[%s8641_s24 + $0xc8c] ss:$40 sps:$4 sm:$0xff]  }
 0x145   : > { %4488 = vmatpush1.bf16.msra.mxu1 %v7405_v1  ;;  %v7489_v1 = vld [vmem:[%s8641_s24 + $0x290] ss:$40 sps:$4 sm:$0xff]  }
 0x146   : > { %4402 = vmatpush1.bf16.msra.mxu0 %v7402_v0  ;;  %4489 = vmatprep.subr.bf16.mxu1 %v7413_v3  ;;  %v7486_v0 = vld [vmem:[%s8641_s24 + $0xc88] ss:$40 sps:$4 sm:$0xff]   ;;  %v7497_v3 = vld [vmem:[%s8641_s24 + $0x2e4] ss:$40 sps:$4 sm:$0xff]  }
 0x147   : > { %4403 = vmatprep.subr.bf16.mxu0 %v7410_v2  ;;  %v7494_v2 = vld [vmem:[%s8641_s24 + $0xcdc] ss:$40 sps:$4 sm:$0xff]  }
 0x149   : > { %4490 = vmatpush1.bf16.msra.mxu1 %v7411_v5  ;;  %v7495_v5 = vld [vmem:[%s8641_s24 + $0x2e0] ss:$40 sps:$4 sm:$0xff]  }
 0x14a   : > { %4404 = vmatpush1.bf16.msra.mxu0 %v7408_v4  ;;  %4491 = vmatprep.subr.bf16.mxu1 %v7419_v7  ;;  %v7492_v4 = vld [vmem:[%s8641_s24 + $0xcd8] ss:$40 sps:$4 sm:$0xff]   ;;  %v7503_v7 = vld [vmem:[%s8641_s24 + $0x334] ss:$40 sps:$4 sm:$0xff]  }
 0x14b   : > { %4405 = vmatprep.subr.bf16.mxu0 %v7416_v6  ;;  %v7500_v6 = vld [vmem:[%s8641_s24 + $0xd2c] ss:$40 sps:$4 sm:$0xff]  }
 0x14d   : > { %4492 = vmatpush1.bf16.msra.mxu1 %v7417_v9  ;;  %v7501_v9 = vld [vmem:[%s8641_s24 + $0x330] ss:$40 sps:$4 sm:$0xff]  }
 0x14e   : > { %4406 = vmatpush1.bf16.msra.mxu0 %v7414_v8  ;;  %4493 = vmatprep.subr.bf16.mxu1 %v7425_v13  ;;  %v7498_v8 = vld [vmem:[%s8641_s24 + $0xd28] ss:$40 sps:$4 sm:$0xff]   ;;  %v7509_v13 = vld [vmem:[%s8641_s24 + $0x384] ss:$40 sps:$4 sm:$0xff]  }
 0x14f   : > { %4407 = vmatprep.subr.bf16.mxu0 %v7422_v12  ;;  %v7506_v12 = vld [vmem:[%s8641_s24 + $0xd7c] ss:$40 sps:$4 sm:$0xff]  }
 0x151   : > { %4494 = vmatpush1.bf16.msra.mxu1 %v7423_v15  ;;  %v7507_v15 = vld [vmem:[%s8641_s24 + $0x380] ss:$40 sps:$4 sm:$0xff]  }
 0x152   : > { %4408 = vmatpush1.bf16.msra.mxu0 %v7420_v14  ;;  %4495 = vmatprep.subr.bf16.mxu1 %v7431_v18  ;;  %v7504_v14 = vld [vmem:[%s8641_s24 + $0xd78] ss:$40 sps:$4 sm:$0xff]   ;;  %v7515_v18 = vld [vmem:[%s8641_s24 + $0x3d4] ss:$40 sps:$4 sm:$0xff]  }
 0x153   : > { %4409 = vmatprep.subr.bf16.mxu0 %v7428_v16  ;;  %v7512_v16 = vld [vmem:[%s8641_s24 + $0xdcc] ss:$40 sps:$4 sm:$0xff]  }
 0x155   : > { %4496 = vmatpush1.bf16.msra.mxu1 %v7429_v20  ;;  %v7513_v20 = vld [vmem:[%s8641_s24 + $0x3d0] ss:$40 sps:$4 sm:$0xff]  }
 0x156   : > { %4410 = vmatpush1.bf16.msra.mxu0 %v7426_v19  ;;  %4497 = vmatprep.subr.bf16.mxu1 %v7437_v24  ;;  %v7510_v19 = vld [vmem:[%s8641_s24 + $0xdc8] ss:$40 sps:$4 sm:$0xff]   ;;  %v7521_v24 = vld [vmem:[%s8641_s24 + $0x424] ss:$40 sps:$4 sm:$0xff]  }
 0x157   : > { %4411 = vmatprep.subr.bf16.mxu0 %v7434_v21  ;;  %v7518_v21 = vld [vmem:[%s8641_s24 + $0xe1c] ss:$40 sps:$4 sm:$0xff]  }
 0x159   : > { %4498 = vmatpush1.bf16.msra.mxu1 %v7435_v27  ;;  %v7519_v27 = vld [vmem:[%s8641_s24 + $0x420] ss:$40 sps:$4 sm:$0xff]  }
 0x15a   : > { %4412 = vmatpush1.bf16.msra.mxu0 %v7432_v25  ;;  %4510 = vmatprep.subr.bf16.mxu1 %v7440_v28  ;;  %v7516_v25 = vld [vmem:[%s8641_s24 + $0xe18] ss:$40 sps:$4 sm:$0xff]   ;;  %v7524_v28 = vld [vmem:[%s8641_s24 + $0xe6c] ss:$40 sps:$4 sm:$0xff]  }
 0x15b   : > { %4596 = vmatprep.subr.bf16.mxu0 %v7443_v29  ;;  %v7527_v29 = vld [vmem:[%s8641_s24 + $0x474] ss:$40 sps:$4 sm:$0xff]  }
 0x15c   : > { %4500 = vmatmul.mubr.bf16.vlgmr.msra.gmra.mrb[4].mxu1 %v8734_v11 }
 0x15d   : > { %4414 = vmatmul.mubr.bf16.vlgmr.msra.gmra.mrb[0].mxu0 %v8892_v30  ;;  %4511 = vmatpush1.bf16.msra.mxu1 %v7438_v31  ;;  %v7522_v31 = vld [vmem:[%s8641_s24 + $0xe68] ss:$40 sps:$4 sm:$0xff]  }
 0x15e   : > { %4597 = vmatpush1.bf16.msra.mxu0 %v7441_v32  ;;  %4512 = vmatprep.subr.bf16.mxu1 %v7446_v33  ;;  %v7525_v32 = vld [vmem:[%s8641_s24 + $0x470] ss:$40 sps:$4 sm:$0xff]   ;;  %v7530_v33 = vld [vmem:[%s8641_s24 + $0xebc] ss:$40 sps:$4 sm:$0xff]  }
 0x15f   : > { %4598 = vmatprep.subr.bf16.mxu0 %v7449_v34  ;;  %4542 = vmatprep.mubr.bf16.mxu1 %v8769_v38  ;;  %v7533_v34 = vld [vmem:[%s8641_s24 + $0x4c4] ss:$40 sps:$4 sm:$0xff]  }
 0x160   : > { %4628 = vmatprep.mubr.bf16.mxu0 %v8707_v53 }
 0x161   : > { %4513 = vmatpush1.bf16.msra.mxu1 %v7444_v35  ;;  %v7528_v35 = vld [vmem:[%s8641_s24 + $0xeb8] ss:$40 sps:$4 sm:$0xff]  }
 0x162   : > { %4599 = vmatpush1.bf16.msra.mxu0 %v7447_v36  ;;  %4514 = vmatprep.subr.bf16.mxu1 %v7452_v22  ;;  %v7531_v36 = vld [vmem:[%s8641_s24 + $0x4c0] ss:$40 sps:$4 sm:$0xff]   ;;  %v7536_v22 = vld [vmem:[%s8641_s24 + $0xf0c] ss:$40 sps:$4 sm:$0xff]  }
 0x163   : > { %4600 = vmatprep.subr.bf16.mxu0 %v7455_v23  ;;  %v7539_v23 = vld [vmem:[%s8641_s24 + $0x514] ss:$40 sps:$4 sm:$0xff]  }
 0x165   : > { %4515 = vmatpush1.bf16.msra.mxu1 %v7450_v37  ;;  %v7534_v37 = vld [vmem:[%s8641_s24 + $0xf08] ss:$40 sps:$4 sm:$0xff]  }
 0x166   : > { %4601 = vmatpush1.bf16.msra.mxu0 %v7453_v39  ;;  %4516 = vmatprep.subr.bf16.mxu1 %v7458_v40  ;;  %v7537_v39 = vld [vmem:[%s8641_s24 + $0x510] ss:$40 sps:$4 sm:$0xff]   ;;  %v7542_v40 = vld [vmem:[%s8641_s24 + $0xf5c] ss:$40 sps:$4 sm:$0xff]  }
 0x167   : > { %4602 = vmatprep.subr.bf16.mxu0 %v7461_v41  ;;  %v7545_v41 = vld [vmem:[%s8641_s24 + $0x564] ss:$40 sps:$4 sm:$0xff]  }
 0x169   : > { %4517 = vmatpush1.bf16.msra.mxu1 %v7456_v42  ;;  %v7540_v42 = vld [vmem:[%s8641_s24 + $0xf58] ss:$40 sps:$4 sm:$0xff]  }
 0x16a   : > { %4603 = vmatpush1.bf16.msra.mxu0 %v7459_v43  ;;  %4518 = vmatprep.subr.bf16.mxu1 %v7464_v44  ;;  %v7543_v43 = vld [vmem:[%s8641_s24 + $0x560] ss:$40 sps:$4 sm:$0xff]   ;;  %v7548_v44 = vld [vmem:[%s8641_s24 + $0xfac] ss:$40 sps:$4 sm:$0xff]  }
 0x16b   : > { %4604 = vmatprep.subr.bf16.mxu0 %v7467_v45  ;;  %v7551_v45 = vld [vmem:[%s8641_s24 + $0x5b4] ss:$40 sps:$4 sm:$0xff]  }
 0x16d   : > { %4519 = vmatpush1.bf16.msra.mxu1 %v7462_v46  ;;  %v7546_v46 = vld [vmem:[%s8641_s24 + $0xfa8] ss:$40 sps:$4 sm:$0xff]  }
 0x16e   : > { %4605 = vmatpush1.bf16.msra.mxu0 %v7465_v47  ;;  %4520 = vmatprep.subr.bf16.mxu1 %v7470_v48  ;;  %v7549_v47 = vld [vmem:[%s8641_s24 + $0x5b0] ss:$40 sps:$4 sm:$0xff]   ;;  %v7554_v48 = vld [vmem:[%s8641_s24 + $0xffc] ss:$40 sps:$4 sm:$0xff]  }
 0x16f   : > { %4606 = vmatprep.subr.bf16.mxu0 %v7473_v49  ;;  %v7557_v49 = vld [vmem:[%s8641_s24 + $0x604] ss:$40 sps:$4 sm:$0xff]  }
 0x171   : > { %4521 = vmatpush1.bf16.msra.mxu1 %v7468_v50  ;;  %v7552_v50 = vld [vmem:[%s8641_s24 + $0xff8] ss:$40 sps:$4 sm:$0xff]  }
 0x172   : > { %4607 = vmatpush1.bf16.msra.mxu0 %v7471_v51  ;;  %4522 = vmatprep.subr.bf16.mxu1 %v7476_v52  ;;  %v7555_v51 = vld [vmem:[%s8641_s24 + $0x600] ss:$40 sps:$4 sm:$0xff]   ;;  %v7560_v52 = vld [vmem:[%s8641_s24 + $0x104c] ss:$40 sps:$4 sm:$0xff]  }
 0x173   : > { %4608 = vmatprep.subr.bf16.mxu0 %v7479_v55  ;;  %v7563_v55 = vld [vmem:[%s8641_s24 + $0x654] ss:$40 sps:$4 sm:$0xff]  }
 0x175   : > { %4523 = vmatpush1.bf16.msra.mxu1 %v7474_v56  ;;  %v7558_v56 = vld [vmem:[%s8641_s24 + $0x1048] ss:$40 sps:$4 sm:$0xff]  }
 0x176   : > { %4609 = vmatpush1.bf16.msra.mxu0 %v7477_v57  ;;  %4524 = vmatprep.subr.bf16.mxu1 %v7482_v58  ;;  %v7561_v57 = vld [vmem:[%s8641_s24 + $0x650] ss:$40 sps:$4 sm:$0xff]   ;;  %v7566_v58 = vld [vmem:[%s8641_s24 + $0x109c] ss:$40 sps:$4 sm:$0xff]  }
 0x177   : > { %4610 = vmatprep.subr.bf16.mxu0 %v7485_v59  ;;  %v7569_v59 = vld [vmem:[%s8641_s24 + $0x6a4] ss:$40 sps:$4 sm:$0xff]  }
 0x179   : > { %4525 = vmatpush1.bf16.msra.mxu1 %v7480_v60  ;;  %v7564_v60 = vld [vmem:[%s8641_s24 + $0x1098] ss:$40 sps:$4 sm:$0xff]  }
 0x17a   : > { %4611 = vmatpush1.bf16.msra.mxu0 %v7483_v61  ;;  %4526 = vmatprep.subr.bf16.mxu1 %v7488_v62  ;;  %v7567_v61 = vld [vmem:[%s8641_s24 + $0x6a0] ss:$40 sps:$4 sm:$0xff]   ;;  %v7572_v62 = vld [vmem:[%s8641_s24 + $0x10ec] ss:$40 sps:$4 sm:$0xff]  }
 0x17b   : > { %4612 = vmatprep.subr.bf16.mxu0 %v7491_v63  ;;  %v7575_v63 = vld [vmem:[%s8641_s24 + $0x6f4] ss:$40 sps:$4 sm:$0xff]  }
 0x17d   : > { %4527 = vmatpush1.bf16.msra.mxu1 %v7486_v0  ;;  %v7570_v0 = vld [vmem:[%s8641_s24 + $0x10e8] ss:$40 sps:$4 sm:$0xff]  }
 0x17e   : > { %4613 = vmatpush1.bf16.msra.mxu0 %v7489_v1  ;;  %4528 = vmatprep.subr.bf16.mxu1 %v7494_v2  ;;  %v7573_v1 = vld [vmem:[%s8641_s24 + $0x6f0] ss:$40 sps:$4 sm:$0xff]  }
 0x17f   : > { %4614 = vmatprep.subr.bf16.mxu0 %v7497_v3 }
 0x181   : > { %4529 = vmatpush1.bf16.msra.mxu1 %v7492_v4 }
 0x182   : > { %4615 = vmatpush1.bf16.msra.mxu0 %v7495_v5  ;;  %4530 = vmatprep.subr.bf16.mxu1 %v7500_v6  ;;  %v7578_v5 = vld [vmem:[%s8641_s24 + $0x113c] ss:$40 sps:$4 sm:$0xff]  }
 0x183   : > { %4616 = vmatprep.subr.bf16.mxu0 %v7503_v7  ;;  %v7581_v6 = vld [vmem:[%s8641_s24 + $0x744] ss:$40 sps:$4 sm:$0xff]  }
 0x185   : > { %4531 = vmatpush1.bf16.msra.mxu1 %v7498_v8  ;;  %v7576_v8 = vld [vmem:[%s8641_s24 + $0x1138] ss:$40 sps:$4 sm:$0xff]  }
 0x186   : > { %4617 = vmatpush1.bf16.msra.mxu0 %v7501_v9  ;;  %4532 = vmatprep.subr.bf16.mxu1 %v7506_v12  ;;  %v7579_v9 = vld [vmem:[%s8641_s24 + $0x740] ss:$40 sps:$4 sm:$0xff]   ;;  %v7584_v12 = vld [vmem:[%s8641_s24 + $0x118c] ss:$40 sps:$4 sm:$0xff]  }
 0x187   : > { %4618 = vmatprep.subr.bf16.mxu0 %v7509_v13  ;;  %v7587_v13 = vld [vmem:[%s8641_s24 + $0x794] ss:$40 sps:$4 sm:$0xff]  }
 0x189   : > { %4533 = vmatpush1.bf16.msra.mxu1 %v7504_v14  ;;  %v7582_v14 = vld [vmem:[%s8641_s24 + $0x1188] ss:$40 sps:$4 sm:$0xff]  }
 0x18a   : > { %4619 = vmatpush1.bf16.msra.mxu0 %v7507_v15  ;;  %4534 = vmatprep.subr.bf16.mxu1 %v7512_v16  ;;  %v7585_v15 = vld [vmem:[%s8641_s24 + $0x790] ss:$40 sps:$4 sm:$0xff]   ;;  %v7590_v16 = vld [vmem:[%s8641_s24 + $0x11dc] ss:$40 sps:$4 sm:$0xff]  }
 0x18b   : > { %4620 = vmatprep.subr.bf16.mxu0 %v7515_v18  ;;  %v7593_v18 = vld [vmem:[%s8641_s24 + $0x7e4] ss:$40 sps:$4 sm:$0xff]  }
 0x18d   : > { %4535 = vmatpush1.bf16.msra.mxu1 %v7510_v19  ;;  %v7588_v19 = vld [vmem:[%s8641_s24 + $0x11d8] ss:$40 sps:$4 sm:$0xff]  }
 0x18e   : > { %4621 = vmatpush1.bf16.msra.mxu0 %v7513_v20  ;;  %4536 = vmatprep.subr.bf16.mxu1 %v7518_v21  ;;  %v7591_v20 = vld [vmem:[%s8641_s24 + $0x7e0] ss:$40 sps:$4 sm:$0xff]   ;;  %v7596_v21 = vld [vmem:[%s8641_s24 + $0x122c] ss:$40 sps:$4 sm:$0xff]  }
 0x18f   : > { %4622 = vmatprep.subr.bf16.mxu0 %v7521_v24  ;;  %v7599_v24 = vld [vmem:[%s8641_s24 + $0x834] ss:$40 sps:$4 sm:$0xff]  }
 0x191   : > { %4537 = vmatpush1.bf16.msra.mxu1 %v7516_v25  ;;  %v7594_v25 = vld [vmem:[%s8641_s24 + $0x1228] ss:$40 sps:$4 sm:$0xff]  }
 0x192   : > { %4623 = vmatpush1.bf16.msra.mxu0 %v7519_v27  ;;  %4538 = vmatprep.subr.bf16.mxu1 %v7524_v28  ;;  %v7597_v27 = vld [vmem:[%s8641_s24 + $0x830] ss:$40 sps:$4 sm:$0xff]   ;;  %v7602_v28 = vld [vmem:[%s8641_s24 + $0x127c] ss:$40 sps:$4 sm:$0xff]  }
 0x193   : > { %4624 = vmatprep.subr.bf16.mxu0 %v7527_v29  ;;  %v7605_v29 = vld [vmem:[%s8641_s24 + $0x884] ss:$40 sps:$4 sm:$0xff]  }
 0x195   : > { %4539 = vmatpush1.bf16.msra.mxu1 %v7522_v31  ;;  %v7600_v31 = vld [vmem:[%s8641_s24 + $0x1278] ss:$40 sps:$4 sm:$0xff]  }
 0x196   : > { %4625 = vmatpush1.bf16.msra.mxu0 %v7525_v32  ;;  %4540 = vmatprep.subr.bf16.mxu1 %v7530_v33  ;;  %v7603_v32 = vld [vmem:[%s8641_s24 + $0x880] ss:$40 sps:$4 sm:$0xff]   ;;  %v7608_v33 = vld [vmem:[%s8641_s24 + $0x12cc] ss:$40 sps:$4 sm:$0xff]  }
 0x197   : > { %4626 = vmatprep.subr.bf16.mxu0 %v7533_v34  ;;  %v7611_v34 = vld [vmem:[%s8641_s24 + $0x8d4] ss:$40 sps:$4 sm:$0xff]  }
 0x199   : > { %4541 = vmatpush1.bf16.msra.mxu1 %v7528_v35  ;;  %v7606_v35 = vld [vmem:[%s8641_s24 + $0x12c8] ss:$40 sps:$4 sm:$0xff]  }
 0x19a   : > { %4627 = vmatpush1.bf16.msra.mxu0 %v7531_v36  ;;  %4553 = vmatprep.subr.bf16.mxu1 %v7536_v22  ;;  %v7609_v36 = vld [vmem:[%s8641_s24 + $0x8d0] ss:$40 sps:$4 sm:$0xff]   ;;  %v7614_v22 = vld [vmem:[%s8641_s24 + $0x131c] ss:$40 sps:$4 sm:$0xff]  }
 0x19b   : > { %4639 = vmatprep.subr.bf16.mxu0 %v7539_v23  ;;  %v7617_v23 = vld [vmem:[%s8641_s24 + $0x924] ss:$40 sps:$4 sm:$0xff]  }
 0x19c   : > { %4543 = vmatmul.mubr.bf16.vlgmr.msra.gmra.mrb[4].mxu1 %v8812_v17 }
 0x19d   : > { %4629 = vmatmul.mubr.bf16.vlgmr.msra.gmra.mrb[4].mxu0 %v8732_v10  ;;  %4554 = vmatpush1.bf16.msra.mxu1 %v7534_v37  ;;  %v7612_v37 = vld [vmem:[%s8641_s24 + $0x1318] ss:$40 sps:$4 sm:$0xff]  }
 0x19e   : > { %4640 = vmatpush1.bf16.msra.mxu0 %v7537_v39  ;;  %4555 = vmatprep.subr.bf16.mxu1 %v7542_v40  ;;  %v7615_v39 = vld [vmem:[%s8641_s24 + $0x920] ss:$40 sps:$4 sm:$0xff]   ;;  %v7620_v40 = vld [vmem:[%s8641_s24 + $0x136c] ss:$40 sps:$4 sm:$0xff]  }
 0x19f   : > { %4641 = vmatprep.subr.bf16.mxu0 %v7545_v41  ;;  %4585 = vmatprep.mubr.bf16.mxu1 %v8828_v26  ;;  %v7623_v41 = vld [vmem:[%s8641_s24 + $0x974] ss:$40 sps:$4 sm:$0xff]  }
 0x1a0   : > { %4671 = vmatprep.mubr.bf16.mxu0 %v8709_v54 }
 0x1a1   : > { %4556 = vmatpush1.bf16.msra.mxu1 %v7540_v42  ;;  %v7618_v42 = vld [vmem:[%s8641_s24 + $0x1368] ss:$40 sps:$4 sm:$0xff]  }
 0x1a2   : > { %4642 = vmatpush1.bf16.msra.mxu0 %v7543_v43  ;;  %4557 = vmatprep.subr.bf16.mxu1 %v7548_v44  ;;  %v7621_v43 = vld [vmem:[%s8641_s24 + $0x970] ss:$40 sps:$4 sm:$0xff]   ;;  %v7626_v44 = vld [vmem:[%s8641_s24 + $0x13bc] ss:$40 sps:$4 sm:$0xff]  }
 0x1a3   : > { %4643 = vmatprep.subr.bf16.mxu0 %v7551_v45  ;;  %v7629_v45 = vld [vmem:[%s8641_s24 + $0x9c4] ss:$40 sps:$4 sm:$0xff]  }
 0x1a5   : > { %4558 = vmatpush1.bf16.msra.mxu1 %v7546_v46  ;;  %v7624_v46 = vld [vmem:[%s8641_s24 + $0x13b8] ss:$40 sps:$4 sm:$0xff]  }
 0x1a6   : > { %4644 = vmatpush1.bf16.msra.mxu0 %v7549_v47  ;;  %4559 = vmatprep.subr.bf16.mxu1 %v7554_v48  ;;  %v7627_v47 = vld [vmem:[%s8641_s24 + $0x9c0] ss:$40 sps:$4 sm:$0xff]   ;;  %v7632_v48 = vld [vmem:[%s8641_s24 + $0xa14] ss:$40 sps:$4 sm:$0xff]  }
 0x1a7   : > { %4645 = vmatprep.subr.bf16.mxu0 %v7557_v49  ;;  %v7635_v49 = vld [vmem:[%s8641_s24 + $0x1c] ss:$40 sps:$4 sm:$0xff]  }
 0x1a9   : > { %4560 = vmatpush1.bf16.msra.mxu1 %v7552_v50  ;;  %v7630_v50 = vld [vmem:[%s8641_s24 + $0xa10] ss:$40 sps:$4 sm:$0xff]  }
 0x1aa   : > { %4646 = vmatpush1.bf16.msra.mxu0 %v7555_v51  ;;  %4561 = vmatprep.subr.bf16.mxu1 %v7560_v52  ;;  %v7633_v51 = vld [vmem:[%s8641_s24 + $0x18] ss:$40 sps:$4 sm:$0xff]   ;;  %v7638_v52 = vld [vmem:[%s8641_s24 + $0xa64] ss:$40 sps:$4 sm:$0xff]  }
 0x1ab   : > { %4647 = vmatprep.subr.bf16.mxu0 %v7563_v55  ;;  %v7641_v55 = vld [vmem:[%s8641_s24 + $0x6c] ss:$40 sps:$4 sm:$0xff]  }
 0x1ad   : > { %4562 = vmatpush1.bf16.msra.mxu1 %v7558_v56  ;;  %v7636_v56 = vld [vmem:[%s8641_s24 + $0xa60] ss:$40 sps:$4 sm:$0xff]  }
 0x1ae   : > { %4648 = vmatpush1.bf16.msra.mxu0 %v7561_v57  ;;  %4563 = vmatprep.subr.bf16.mxu1 %v7566_v58  ;;  %v7639_v57 = vld [vmem:[%s8641_s24 + $0x68] ss:$40 sps:$4 sm:$0xff]   ;;  %v7644_v58 = vld [vmem:[%s8641_s24 + $0xab4] ss:$40 sps:$4 sm:$0xff]  }
 0x1af   : > { %4649 = vmatprep.subr.bf16.mxu0 %v7569_v59  ;;  %v8992_v2 = vpop.f32.mrb[0].mxu1  ;;  %v7647_v59 = vld [vmem:[%s8641_s24 + $0xbc] ss:$40 sps:$4 sm:$0xff]  }
 0x1b0   : > { %v8994_v3 = vpop.f32.mrb[1].mxu1 }
 0x1b1   : > { %4564 = vmatpush1.bf16.msra.mxu1 %v7564_v60  ;;  %v8996_v4 = vpop.f32.mrb[2].mxu1  ;;  %v7642_v60 = vld [vmem:[%s8641_s24 + $0xab0] ss:$40 sps:$4 sm:$0xff]  }
 0x1b2   : > { %4650 = vmatpush1.bf16.msra.mxu0 %v7567_v61  ;;  %4565 = vmatprep.subr.bf16.mxu1 %v7572_v62  ;;  %v9000_v7 = vpop.f32.mrb[3].mxu1  ;;  %v7645_v61 = vld [vmem:[%s8641_s24 + $0xb8] ss:$40 sps:$4 sm:$0xff]   ;;  %v7650_v62 = vld [vmem:[%s8641_s24 + $0xb04] ss:$40 sps:$4 sm:$0xff]  }
 0x1b3   : > { %4651 = vmatprep.subr.bf16.mxu0 %v7575_v63  ;;  %v7653_v63 = vld [vmem:[%s8641_s24 + $0x10c] ss:$40 sps:$4 sm:$0xff]  }
 0x1b5   : > { %4566 = vmatpush1.bf16.msra.mxu1 %v7570_v0  ;;  %v7648_v0 = vld [vmem:[%s8641_s24 + $0xb00] ss:$40 sps:$4 sm:$0xff]  }
 0x1b6   : > { %4652 = vmatpush1.bf16.msra.mxu0 %v7573_v1  ;;  %4567 = vmatprep.subr.bf16.mxu1 %v7578_v5  ;;  %v7651_v1 = vld [vmem:[%s8641_s24 + $0x108] ss:$40 sps:$4 sm:$0xff]   ;;  %v7656_v5 = vld [vmem:[%s8641_s24 + $0xb54] ss:$40 sps:$4 sm:$0xff]  }
 0x1b7   : > { %4653 = vmatprep.subr.bf16.mxu0 %v7581_v6  ;;  %v7659_v6 = vld [vmem:[%s8641_s24 + $0x15c] ss:$40 sps:$4 sm:$0xff]  }
 0x1b9   : > { %4568 = vmatpush1.bf16.msra.mxu1 %v7576_v8  ;;  %v7654_v8 = vld [vmem:[%s8641_s24 + $0xb50] ss:$40 sps:$4 sm:$0xff]  }
 0x1ba   : > { %4654 = vmatpush1.bf16.msra.mxu0 %v7579_v9  ;;  %4569 = vmatprep.subr.bf16.mxu1 %v7584_v12  ;;  %v7657_v9 = vld [vmem:[%s8641_s24 + $0x158] ss:$40 sps:$4 sm:$0xff]   ;;  %v7662_v12 = vld [vmem:[%s8641_s24 + $0xba4] ss:$40 sps:$4 sm:$0xff]  }
 0x1bb   : > { %4655 = vmatprep.subr.bf16.mxu0 %v7587_v13  ;;  %v7665_v13 = vld [vmem:[%s8641_s24 + $0x1ac] ss:$40 sps:$4 sm:$0xff]  }
 0x1bd   : > { %4570 = vmatpush1.bf16.msra.mxu1 %v7582_v14  ;;  %v7660_v14 = vld [vmem:[%s8641_s24 + $0xba0] ss:$40 sps:$4 sm:$0xff]  }
 0x1be   : > { %4656 = vmatpush1.bf16.msra.mxu0 %v7585_v15  ;;  %4571 = vmatprep.subr.bf16.mxu1 %v7590_v16  ;;  %v7663_v15 = vld [vmem:[%s8641_s24 + $0x1a8] ss:$40 sps:$4 sm:$0xff]   ;;  %v7668_v16 = vld [vmem:[%s8641_s24 + $0xbf4] ss:$40 sps:$4 sm:$0xff]  }
 0x1bf   : > { %4657 = vmatprep.subr.bf16.mxu0 %v7593_v18  ;;  %v7671_v18 = vld [vmem:[%s8641_s24 + $0x1fc] ss:$40 sps:$4 sm:$0xff]  }
 0x1c1   : > { %4572 = vmatpush1.bf16.msra.mxu1 %v7588_v19  ;;  %v7666_v19 = vld [vmem:[%s8641_s24 + $0xbf0] ss:$40 sps:$4 sm:$0xff]  }
 0x1c2   : > { %4658 = vmatpush1.bf16.msra.mxu0 %v7591_v20  ;;  %4573 = vmatprep.subr.bf16.mxu1 %v7596_v21  ;;  %v7669_v20 = vld [vmem:[%s8641_s24 + $0x1f8] ss:$40 sps:$4 sm:$0xff]   ;;  %v7674_v21 = vld [vmem:[%s8641_s24 + $0xc44] ss:$40 sps:$4 sm:$0xff]  }
 0x1c3   : > { %4659 = vmatprep.subr.bf16.mxu0 %v7599_v24  ;;  %v7677_v24 = vld [vmem:[%s8641_s24 + $0x24c] ss:$40 sps:$4 sm:$0xff]  }
 0x1c5   : > { %4574 = vmatpush1.bf16.msra.mxu1 %v7594_v25  ;;  %v7672_v25 = vld [vmem:[%s8641_s24 + $0xc40] ss:$40 sps:$4 sm:$0xff]  }
 0x1c6   : > { %4660 = vmatpush1.bf16.msra.mxu0 %v7597_v27  ;;  %4575 = vmatprep.subr.bf16.mxu1 %v7602_v28  ;;  %v7675_v27 = vld [vmem:[%s8641_s24 + $0x248] ss:$40 sps:$4 sm:$0xff]   ;;  %v7680_v28 = vld [vmem:[%s8641_s24 + $0xc94] ss:$40 sps:$4 sm:$0xff]  }
 0x1c7   : > { %4661 = vmatprep.subr.bf16.mxu0 %v7605_v29  ;;  %v7683_v29 = vld [vmem:[%s8641_s24 + $0x29c] ss:$40 sps:$4 sm:$0xff]  }
 0x1c9   : > { %4576 = vmatpush1.bf16.msra.mxu1 %v7600_v31  ;;  %v7678_v31 = vld [vmem:[%s8641_s24 + $0xc90] ss:$40 sps:$4 sm:$0xff]  }
 0x1ca   : > { %4662 = vmatpush1.bf16.msra.mxu0 %v7603_v32  ;;  %4577 = vmatprep.subr.bf16.mxu1 %v7608_v33  ;;  %v7681_v32 = vld [vmem:[%s8641_s24 + $0x298] ss:$40 sps:$4 sm:$0xff]   ;;  %v7686_v33 = vld [vmem:[%s8641_s24 + $0xce4] ss:$40 sps:$4 sm:$0xff]  }
 0x1cb   : > { %4663 = vmatprep.subr.bf16.mxu0 %v7611_v34  ;;  %v7689_v34 = vld [vmem:[%s8641_s24 + $0x2ec] ss:$40 sps:$4 sm:$0xff]  }
 0x1cd   : > { %4578 = vmatpush1.bf16.msra.mxu1 %v7606_v35  ;;  %v7684_v35 = vld [vmem:[%s8641_s24 + $0xce0] ss:$40 sps:$4 sm:$0xff]  }
 0x1ce   : > { %4664 = vmatpush1.bf16.msra.mxu0 %v7609_v36  ;;  %4579 = vmatprep.subr.bf16.mxu1 %v7614_v22  ;;  %v7687_v36 = vld [vmem:[%s8641_s24 + $0x2e8] ss:$40 sps:$4 sm:$0xff]   ;;  %v7692_v22 = vld [vmem:[%s8641_s24 + $0xd34] ss:$40 sps:$4 sm:$0xff]  }
 0x1cf   : > { %4665 = vmatprep.subr.bf16.mxu0 %v7617_v23  ;;  %v7695_v23 = vld [vmem:[%s8641_s24 + $0x33c] ss:$40 sps:$4 sm:$0xff]  }
 0x1d1   : > { %4580 = vmatpush1.bf16.msra.mxu1 %v7612_v37  ;;  %v7690_v37 = vld [vmem:[%s8641_s24 + $0xd30] ss:$40 sps:$4 sm:$0xff]  }
 0x1d2   : > { %4666 = vmatpush1.bf16.msra.mxu0 %v7615_v39  ;;  %4581 = vmatprep.subr.bf16.mxu1 %v7620_v40  ;;  %v7693_v39 = vld [vmem:[%s8641_s24 + $0x338] ss:$40 sps:$4 sm:$0xff]   ;;  %v7698_v40 = vld [vmem:[%s8641_s24 + $0xd84] ss:$40 sps:$4 sm:$0xff]  }
 0x1d3   : > { %4667 = vmatprep.subr.bf16.mxu0 %v7623_v41  ;;  %v7701_v41 = vld [vmem:[%s8641_s24 + $0x38c] ss:$40 sps:$4 sm:$0xff]  }
 0x1d5   : > { %4582 = vmatpush1.bf16.msra.mxu1 %v7618_v42  ;;  %v7696_v42 = vld [vmem:[%s8641_s24 + $0xd80] ss:$40 sps:$4 sm:$0xff]  }
 0x1d6   : > { %4668 = vmatpush1.bf16.msra.mxu0 %v7621_v43  ;;  %4583 = vmatprep.subr.bf16.mxu1 %v7626_v44  ;;  %v7699_v43 = vld [vmem:[%s8641_s24 + $0x388] ss:$40 sps:$4 sm:$0xff]   ;;  %v7704_v44 = vld [vmem:[%s8641_s24 + $0xdd4] ss:$40 sps:$4 sm:$0xff]  }
 0x1d7   : > { %4669 = vmatprep.subr.bf16.mxu0 %v7629_v45  ;;  %v7707_v45 = vld [vmem:[%s8641_s24 + $0x3dc] ss:$40 sps:$4 sm:$0xff]  }
 0x1d9   : > { %4584 = vmatpush1.bf16.msra.mxu1 %v7624_v46  ;;  %v7702_v46 = vld [vmem:[%s8641_s24 + $0xdd0] ss:$40 sps:$4 sm:$0xff]  }
 0x1da   : > { %4670 = vmatpush1.bf16.msra.mxu0 %v7627_v47  ;;  %4768 = vmatprep.subr.bf16.mxu1 %v7635_v49  ;;  %v7705_v47 = vld [vmem:[%s8641_s24 + $0x3d8] ss:$40 sps:$4 sm:$0xff]   ;;  %v7713_v49 = vld [vmem:[%s8641_s24 + $0x42c] ss:$40 sps:$4 sm:$0xff]  }
 0x1db   : > { %4682 = vmatprep.subr.bf16.mxu0 %v7632_v48  ;;  %v7710_v48 = vld [vmem:[%s8641_s24 + $0xe24] ss:$40 sps:$4 sm:$0xff]  }
 0x1dc   : > { %4586 = vmatmul.mubr.bf16.vlgmr.msra.gmra.mrb[4].mxu1 %v8892_v30 }
 0x1dd   : > { %4672 = vmatmul.mubr.bf16.vlgmr.msra.gmra.mrb[4].mxu0 %v8734_v11  ;;  %4769 = vmatpush1.bf16.msra.mxu1 %v7633_v51  ;;  %v7711_v51 = vld [vmem:[%s8641_s24 + $0x428] ss:$40 sps:$4 sm:$0xff]  }
 0x1de   : > { %4683 = vmatpush1.bf16.msra.mxu0 %v7630_v50  ;;  %4770 = vmatprep.subr.bf16.mxu1 %v7641_v55  ;;  %v7708_v50 = vld [vmem:[%s8641_s24 + $0xe20] ss:$40 sps:$4 sm:$0xff]   ;;  %v7719_v55 = vld [vmem:[%s8641_s24 + $0x47c] ss:$40 sps:$4 sm:$0xff]  }
 0x1df   : > { %4684 = vmatprep.subr.bf16.mxu0 %v7638_v52  ;;  %4714 = vmatprep.mubr.bf16.mxu0 %v8769_v38  ;;  %v7716_v52 = vld [vmem:[%s8641_s24 + $0xe74] ss:$40 sps:$4 sm:$0xff]  }
 0x1e0   : > { %4800 = vmatprep.mubr.bf16.mxu1 %v8707_v53 }
 0x1e1   : > { %4771 = vmatpush1.bf16.msra.mxu1 %v7639_v57  ;;  %v7717_v57 = vld [vmem:[%s8641_s24 + $0x478] ss:$40 sps:$4 sm:$0xff]  }
 0x1e2   : > { %4685 = vmatpush1.bf16.msra.mxu0 %v7636_v56  ;;  %4772 = vmatprep.subr.bf16.mxu1 %v7647_v59  ;;  %v7714_v56 = vld [vmem:[%s8641_s24 + $0xe70] ss:$40 sps:$4 sm:$0xff]   ;;  %v7725_v59 = vld [vmem:[%s8641_s24 + $0x4cc] ss:$40 sps:$4 sm:$0xff]  }
 0x1e3   : > { %4686 = vmatprep.subr.bf16.mxu0 %v7644_v58  ;;  %v7722_v58 = vld [vmem:[%s8641_s24 + $0xec4] ss:$40 sps:$4 sm:$0xff]  }
 0x1e5   : > { %4773 = vmatpush1.bf16.msra.mxu1 %v7645_v61  ;;  %v7723_v61 = vld [vmem:[%s8641_s24 + $0x4c8] ss:$40 sps:$4 sm:$0xff]  }
 0x1e6   : > { %4687 = vmatpush1.bf16.msra.mxu0 %v7642_v60  ;;  %4774 = vmatprep.subr.bf16.mxu1 %v7653_v63  ;;  %v7720_v60 = vld [vmem:[%s8641_s24 + $0xec0] ss:$40 sps:$4 sm:$0xff]   ;;  %v7731_v63 = vld [vmem:[%s8641_s24 + $0x51c] ss:$40 sps:$4 sm:$0xff]  }
 0x1e7   : > { %4688 = vmatprep.subr.bf16.mxu0 %v7650_v62  ;;  %v7728_v62 = vld [vmem:[%s8641_s24 + $0xf14] ss:$40 sps:$4 sm:$0xff]  }
 0x1e9   : > { %4775 = vmatpush1.bf16.msra.mxu1 %v7651_v1  ;;  %v7729_v1 = vld [vmem:[%s8641_s24 + $0x518] ss:$40 sps:$4 sm:$0xff]  }
 0x1ea   : > { %4689 = vmatpush1.bf16.msra.mxu0 %v7648_v0  ;;  %4776 = vmatprep.subr.bf16.mxu1 %v7659_v6  ;;  %v7726_v0 = vld [vmem:[%s8641_s24 + $0xf10] ss:$40 sps:$4 sm:$0xff]   ;;  %v7737_v6 = vld [vmem:[%s8641_s24 + $0x56c] ss:$40 sps:$4 sm:$0xff]  }
 0x1eb   : > { %4690 = vmatprep.subr.bf16.mxu0 %v7656_v5  ;;  %v7734_v5 = vld [vmem:[%s8641_s24 + $0xf64] ss:$40 sps:$4 sm:$0xff]  }
 0x1ed   : > { %4777 = vmatpush1.bf16.msra.mxu1 %v7657_v9  ;;  %v7732_v9 = vld [vmem:[%s8641_s24 + $0xf60] ss:$40 sps:$4 sm:$0xff]  }
 0x1ee   : > { %4691 = vmatpush1.bf16.msra.mxu0 %v7654_v8  ;;  %4778 = vmatprep.subr.bf16.mxu1 %v7665_v13  ;;  %v962_v8 = vlaneseq  ;;  %v7740_v13 = vld [vmem:[%s8641_s24 + $0xfb4] ss:$40 sps:$4 sm:$0xff]  }
 0x1ef   : > { %4692 = vmatprep.subr.bf16.mxu0 %v7662_v12  ;;  %v7735_v12 = vld [vmem:[%s8641_s24 + $0x568] ss:$40 sps:$4 sm:$0xff]  }
 0x1f1   : > { %4779 = vmatpush1.bf16.msra.mxu1 %v7663_v15  ;;  %v9116_v15 = vshrl.u32 %v962_v8, 7  ;;  %v7785_v8 = vld [vmem:[%s8641_s24 + $0x7ec] ss:$40 sps:$4 sm:$0xff]  }
 0x1f2   : > { %4693 = vmatpush1.bf16.msra.mxu0 %v7660_v14  ;;  %4780 = vmatprep.subr.bf16.mxu1 %v7671_v18  ;;  %v7743_v14 = vld [vmem:[%s8641_s24 + $0x5bc] ss:$40 sps:$4 sm:$0xff]   ;;  %v7741_v18 = vld [vmem:[%s8641_s24 + $0x5b8] ss:$40 sps:$4 sm:$0xff]  }
 0x1f3   : > { %4694 = vmatprep.subr.bf16.mxu0 %v7668_v16  ;;  %v7738_v16 = vld [vmem:[%s8641_s24 + $0xfb0] ss:$40 sps:$4 sm:$0xff]  }
 0x1f5   : > { %4781 = vmatpush1.bf16.msra.mxu1 %v7669_v20  ;;  %v7749_v20 = vld [vmem:[%s8641_s24 + $0x60c] ss:$40 sps:$4 sm:$0xff]  }
 0x1f6   : > { %4695 = vmatpush1.bf16.msra.mxu0 %v7666_v19  ;;  %4782 = vmatprep.subr.bf16.mxu1 %v7677_v24  ;;  %v7746_v19 = vld [vmem:[%s8641_s24 + $0x1004] ss:$40 sps:$4 sm:$0xff]  }
 0x1f7   : > { %4696 = vmatprep.subr.bf16.mxu0 %v7674_v21  ;;  %v964_v21 = vsub.s32 0, %v9116_v15  ;;  %v9126_v24 = vld [vmem:[%s8649_s19] sm:$0xff] }
 0x1f9   : > { %4783 = vmatpush1.bf16.msra.mxu1 %v7675_v27  ;;  %v7744_v27 = vld [vmem:[%s8641_s24 + $0x1000] ss:$40 sps:$4 sm:$0xff]  }
 0x1fa   : > { %4697 = vmatpush1.bf16.msra.mxu0 %v7672_v25  ;;  %4784 = vmatprep.subr.bf16.mxu1 %v7683_v29  ;;  %v968_v25 = vsub.s32 1, %v9116_v15  ;;  %v7752_v29 = vld [vmem:[%s8641_s24 + $0x1054] ss:$40 sps:$4 sm:$0xff]  }
 0x1fb   : > { %4698 = vmatprep.subr.bf16.mxu0 %v7680_v28  ;;  %v7747_v28 = vld [vmem:[%s8641_s24 + $0x608] ss:$40 sps:$4 sm:$0xff]  }
 0x1fd   : > { %4785 = vmatpush1.bf16.msra.mxu1 %v7681_v32  ;;  %v7750_v32 = vld [vmem:[%s8641_s24 + $0x1050] ss:$40 sps:$4 sm:$0xff]  }
 0x1fe   : > { %4699 = vmatpush1.bf16.msra.mxu0 %v7678_v31  ;;  %4786 = vmatprep.subr.bf16.mxu1 %v7689_v34  ;;  %v7755_v31 = vld [vmem:[%s8641_s24 + $0x65c] ss:$40 sps:$4 sm:$0xff]   ;;  %v965_v34 = vrot.slane %v9126_v24, %v964_v21 }
 0x1ff   : > { %4700 = vmatprep.subr.bf16.mxu0 %v7686_v33  ;;  %v7753_v33 = vld [vmem:[%s8641_s24 + $0x658] ss:$40 sps:$4 sm:$0xff]  }
 0x201   : > { %4787 = vmatpush1.bf16.msra.mxu1 %v7687_v36  ;;  %v7761_v36 = vld [vmem:[%s8641_s24 + $0x6ac] ss:$40 sps:$4 sm:$0xff]  }
 0x202   : > { %4701 = vmatpush1.bf16.msra.mxu0 %v7684_v35  ;;  %4788 = vmatprep.subr.bf16.mxu1 %v7695_v23  ;;  %v7758_v35 = vld [vmem:[%s8641_s24 + $0x10a4] ss:$40 sps:$4 sm:$0xff]   ;;  %v7756_v23 = vld [vmem:[%s8641_s24 + $0x10a0] ss:$40 sps:$4 sm:$0xff]  }
 0x203   : > { %4702 = vmatprep.subr.bf16.mxu0 %v7692_v22  ;;  %v969_v22 = vrot.slane %v9126_v24, %v968_v25 }
 0x205   : > { %4789 = vmatpush1.bf16.msra.mxu1 %v7693_v39  ;;  %v4287_v39 = vadd.f32 %v8992_v2, %v965_v34 }
 0x206   : > { %4703 = vmatpush1.bf16.msra.mxu0 %v7690_v37  ;;  %4790 = vmatprep.subr.bf16.mxu1 %v7701_v41  ;;  %v7759_v37 = vld [vmem:[%s8641_s24 + $0x6a8] ss:$40 sps:$4 sm:$0xff]   ;;  %v7767_v41 = vld [vmem:[%s8641_s24 + $0x6fc] ss:$40 sps:$4 sm:$0xff]  }
 0x207   : > { %4704 = vmatprep.subr.bf16.mxu0 %v7698_v40  ;;  %v7764_v40 = vld [vmem:[%s8641_s24 + $0x10f4] ss:$40 sps:$4 sm:$0xff]  }
 0x209   : > { %4791 = vmatpush1.bf16.msra.mxu1 %v7699_v43 }
 0x20a   : > { %4705 = vmatpush1.bf16.msra.mxu0 %v7696_v42  ;;  %4792 = vmatprep.subr.bf16.mxu1 %v7707_v45  ;;  %v4289_v42 = vadd.f32 %v8994_v3, %v969_v22  ;;  %v7765_v45 = vld [vmem:[%s8641_s24 + $0x6f8] ss:$40 sps:$4 sm:$0xff]   ;;  %v7770_v3 = vld [vmem:[%s8641_s24 + $0x1144] ss:$40 sps:$4 sm:$0xff]  }
 0x20b   : > { %4706 = vmatprep.subr.bf16.mxu0 %v7704_v44  ;;  %v7762_v44 = vld [vmem:[%s8641_s24 + $0x10f0] ss:$40 sps:$4 sm:$0xff]  }
 0x20d   : > { %4793 = vmatpush1.bf16.msra.mxu1 %v7705_v47 }
 0x20e   : > { %4707 = vmatpush1.bf16.msra.mxu0 %v7702_v46  ;;  %4794 = vmatprep.subr.bf16.mxu1 %v7713_v49  ;;  %v4291_v46 = vadd.f32 %v8996_v4, %v965_v34  ;;  %v4293_v49 = vadd.f32 %v9000_v7, %v969_v22  ;;  %v7806_v34 = vld [vmem:[%s8641_s24 + $0x1324] ss:$40 sps:$4 sm:$0xff]   ;;  %v7807_v22 = vld [vmem:[%s8641_s24 + $0x928] ss:$40 sps:$4 sm:$0xff]  }
 0x20f   : > { %4708 = vmatprep.subr.bf16.mxu0 %v7710_v48 }
 0x211   : > { %4795 = vmatpush1.bf16.msra.mxu1 %v7711_v51 }
 0x212   : > { %4709 = vmatpush1.bf16.msra.mxu0 %v7708_v50  ;;  %4796 = vmatprep.subr.bf16.mxu1 %v7719_v55  ;;  %v7773_v55 = vld [vmem:[%s8641_s24 + $0x74c] ss:$40 sps:$4 sm:$0xff]  }
 0x213   : > { %4710 = vmatprep.subr.bf16.mxu0 %v7716_v52 }
 0x215   : > { %4797 = vmatpush1.bf16.msra.mxu1 %v7717_v57 }
 0x216   : > { %4711 = vmatpush1.bf16.msra.mxu0 %v7714_v56  ;;  %4798 = vmatprep.subr.bf16.mxu1 %v7725_v59  ;;  %v7771_v59 = vld [vmem:[%s8641_s24 + $0x748] ss:$40 sps:$4 sm:$0xff]  }
 0x217   : > { %4712 = vmatprep.subr.bf16.mxu0 %v7722_v58  ;;  %v7768_v58 = vld [vmem:[%s8641_s24 + $0x1140] ss:$40 sps:$4 sm:$0xff]  }
 0x219   : > { %4799 = vmatpush1.bf16.msra.mxu1 %v7723_v61 }
 0x21a   : > { %4713 = vmatpush1.bf16.msra.mxu0 %v7720_v60  ;;  %4811 = vmatprep.subr.bf16.mxu1 %v7731_v63  ;;  %v7779_v63 = vld [vmem:[%s8641_s24 + $0x79c] ss:$40 sps:$4 sm:$0xff]  }
 0x21b   : > { %4725 = vmatprep.subr.bf16.mxu0 %v7728_v62  ;;  %v7776_v62 = vld [vmem:[%s8641_s24 + $0x1194] ss:$40 sps:$4 sm:$0xff]  }
 0x21c   : > { %4801 = vmatmul.mubr.bf16.vlgmr.msra.gmra.mrb[8].mxu1 %v8732_v10 }
 0x21d   : > { %4715 = vmatmul.mubr.bf16.vlgmr.msra.gmra.mrb[4].mxu0 %v8812_v17  ;;  %4812 = vmatpush1.bf16.msra.mxu1 %v7729_v1  ;;  %v7774_v1 = vld [vmem:[%s8641_s24 + $0x1190] ss:$40 sps:$4 sm:$0xff]  }
 0x21e   : > { %4726 = vmatpush1.bf16.msra.mxu0 %v7726_v0  ;;  %4813 = vmatprep.subr.bf16.mxu1 %v7737_v6  ;;  %v7782_v6 = vld [vmem:[%s8641_s24 + $0x11e4] ss:$40 sps:$4 sm:$0xff]  }
 0x21f   : > { %4727 = vmatprep.subr.bf16.mxu0 %v7734_v5  ;;  %4757 = vmatprep.mubr.bf16.mxu0 %v8828_v26  ;;  %v7777_v5 = vld [vmem:[%s8641_s24 + $0x798] ss:$40 sps:$4 sm:$0xff]  }
 0x220   : > { %4843 = vmatprep.mubr.bf16.mxu1 %v8709_v54 }
 0x221   : > { %4814 = vmatpush1.bf16.msra.mxu1 %v7735_v12  ;;  %v7783_v12 = vld [vmem:[%s8641_s24 + $0x7e8] ss:$40 sps:$4 sm:$0xff]  }
 0x222   : > { %4728 = vmatpush1.bf16.msra.mxu0 %v7732_v9  ;;  %4815 = vmatprep.subr.bf16.mxu1 %v7743_v14  ;;  %v7780_v9 = vld [vmem:[%s8641_s24 + $0x11e0] ss:$40 sps:$4 sm:$0xff]   ;;  %v7791_v14 = vld [vmem:[%s8641_s24 + $0x83c] ss:$40 sps:$4 sm:$0xff]  }
 0x223   : > { %4729 = vmatprep.subr.bf16.mxu0 %v7740_v13  ;;  %v7788_v13 = vld [vmem:[%s8641_s24 + $0x1234] ss:$40 sps:$4 sm:$0xff]  }
 0x225   : > { %4816 = vmatpush1.bf16.msra.mxu1 %v7741_v18  ;;  %v7789_v18 = vld [vmem:[%s8641_s24 + $0x838] ss:$40 sps:$4 sm:$0xff]  }
 0x226   : > { %4730 = vmatpush1.bf16.msra.mxu0 %v7738_v16  ;;  %4817 = vmatprep.subr.bf16.mxu1 %v7749_v20  ;;  %v7786_v16 = vld [vmem:[%s8641_s24 + $0x1230] ss:$40 sps:$4 sm:$0xff]   ;;  %v7797_v20 = vld [vmem:[%s8641_s24 + $0x88c] ss:$40 sps:$4 sm:$0xff]  }
 0x227   : > { %4731 = vmatprep.subr.bf16.mxu0 %v7746_v19  ;;  %v7794_v19 = vld [vmem:[%s8641_s24 + $0x1284] ss:$40 sps:$4 sm:$0xff]  }
 0x229   : > { %4818 = vmatpush1.bf16.msra.mxu1 %v7747_v28  ;;  %v7795_v28 = vld [vmem:[%s8641_s24 + $0x888] ss:$40 sps:$4 sm:$0xff]  }
 0x22a   : > { %4732 = vmatpush1.bf16.msra.mxu0 %v7744_v27  ;;  %4819 = vmatprep.subr.bf16.mxu1 %v7755_v31  ;;  %v7792_v27 = vld [vmem:[%s8641_s24 + $0x1280] ss:$40 sps:$4 sm:$0xff]   ;;  %v7803_v31 = vld [vmem:[%s8641_s24 + $0x8dc] ss:$40 sps:$4 sm:$0xff]  }
 0x22b   : > { %4733 = vmatprep.subr.bf16.mxu0 %v7752_v29  ;;  %v7800_v29 = vld [vmem:[%s8641_s24 + $0x12d4] ss:$40 sps:$4 sm:$0xff]  }
 0x22d   : > { %4820 = vmatpush1.bf16.msra.mxu1 %v7753_v33  ;;  %v7801_v33 = vld [vmem:[%s8641_s24 + $0x8d8] ss:$40 sps:$4 sm:$0xff]  }
 0x22e   : > { %4734 = vmatpush1.bf16.msra.mxu0 %v7750_v32  ;;  %4821 = vmatprep.subr.bf16.mxu1 %v7761_v36  ;;  %v7798_v32 = vld [vmem:[%s8641_s24 + $0x12d0] ss:$40 sps:$4 sm:$0xff]   ;;  %v7804_v36 = vld [vmem:[%s8641_s24 + $0x1320] ss:$40 sps:$4 sm:$0xff]  }
 0x22f   : > { %4735 = vmatprep.subr.bf16.mxu0 %v7758_v35  ;;  %v7809_v35 = vld [vmem:[%s8641_s24 + $0x92c] ss:$40 sps:$4 sm:$0xff]  }
 0x230   : > { %v4415_v43 = vpop.f32.mrb[0].mxu0 }
 0x231   : > { %v6989_v47 = vadd.f32 %v4415_v43, %v4287_v39  ;;  %v4417_v48 = vpop.f32.mrb[1].mxu0  ;;  %4822 = vmatpush1.bf16.msra.mxu1 %v7759_v37  ;;  %v7815_v37 = vld [vmem:[%s8641_s24 + $0x97c] ss:$40 sps:$4 sm:$0xff]   ;;  %v7810_v39 = vld [vmem:[%s8641_s24 + $0x1370] ss:$40 sps:$4 sm:$0xff]  }
 0x232   : > { %v6991_v2 = vadd.f32 %v4417_v48, %v4289_v42  ;;  %v4419_v50 = vpop.f32.mrb[2].mxu0  ;;  %4736 = vmatpush1.bf16.msra.mxu0 %v7756_v23  ;;  %4823 = vmatprep.subr.bf16.mxu1 %v7767_v41  ;;  %v7812_v23 = vld [vmem:[%s8641_s24 + $0x1374] ss:$40 sps:$4 sm:$0xff]   ;;  %v7818_v41 = vld [vmem:[%s8641_s24 + $0x13c4] ss:$40 sps:$4 sm:$0xff]  }
 0x233   : > { %v6993_v51 = vadd.f32 %v4419_v50, %v4291_v46  ;;  %v4421_v52 = vpop.f32.mrb[3].mxu0  ;;  %4737 = vmatprep.subr.bf16.mxu0 %v7764_v40  ;;  %v5112_v56 = vmax.f32 %v6989_v47, 0.0  ;;  %v7813_v40 = vld [vmem:[%s8641_s24 + $0x978] ss:$40 sps:$4 sm:$0xff]   ;;  %v7821_v42 = vld [vmem:[%s8641_s24 + $0x9cc] ss:$40 sps:$4 sm:$0xff]  }
 0x234   : > { %v5113_v4 = vmax.f32 %v6991_v2, 0.0  ;;  %v6995_v57 = vadd.f32 %v4421_v52, %v4293_v49  ;;  %v7816_v43 = vld [vmem:[%s8641_s24 + $0x13c0] ss:$40 sps:$4 sm:$0xff]   ;;  %v7827_v46 = vld [vmem:[%s8641_s24 + $0x24] ss:$40 sps:$4 sm:$0xff]  }
 0x235   : > { %v5122_v7 = vmax.f32 %v6993_v51, 0.0  ;;  %4824 = vmatpush1.bf16.msra.mxu1 %v7765_v45  ;;  %v7824_v45 = vld [vmem:[%s8641_s24 + $0xa1c] ss:$40 sps:$4 sm:$0xff]   ;;  %v7822_v47 = vld [vmem:[%s8641_s24 + $0xa18] ss:$40 sps:$4 sm:$0xff]  }
 0x236   : > { %v5123_v60 = vmax.f32 %v6995_v57, 0.0  ;;  %4738 = vmatpush1.bf16.msra.mxu0 %v7762_v44  ;;  %4825 = vmatprep.subr.bf16.mxu1 %v7773_v55  ;;  %v7819_v44 = vld [vmem:[%s8641_s24 + $0x9c8] ss:$40 sps:$4 sm:$0xff]   ;;  %v7830_v49 = vld [vmem:[%s8641_s24 + $0xa6c] ss:$40 sps:$4 sm:$0xff]  }
 0x237   : > { %v9157_v61 = vpack.c.bf16 %v5122_v7, %v5112_v56  ;;  %4739 = vmatprep.subr.bf16.mxu0 %v7770_v3  ;;  %v7825_v48 = vld [vmem:[%s8641_s24 + $0x20] ss:$40 sps:$4 sm:$0xff]   ;;  %v7833_v2 = vld [vmem:[%s8641_s24 + $0x74] ss:$40 sps:$4 sm:$0xff]   ;;  %v7831_v51 = vld [vmem:[%s8641_s24 + $0x70] ss:$40 sps:$4 sm:$0xff]  }
 0x238   : > { %v9161_v0 = vpack.c.bf16 %v5123_v60, %v5113_v4  ;;  %v7828_v50 = vld [vmem:[%s8641_s24 + $0xa68] ss:$40 sps:$4 sm:$0xff]   ;;  %v7836_v52 = vld [vmem:[%s8641_s24 + $0xabc] ss:$40 sps:$4 sm:$0xff]   ;;  %v7834_v55 = vld [vmem:[%s8641_s24 + $0xab8] ss:$40 sps:$4 sm:$0xff]  }
 0x239   : > { %4826 = vmatpush1.bf16.msra.mxu1 %v7771_v59  ;;  %v7839_v3 = vld [vmem:[%s8641_s24 + $0xc4] ss:$40 sps:$4 sm:$0xff]   ;;  %v7837_v56 = vld [vmem:[%s8641_s24 + $0xc0] ss:$40 sps:$4 sm:$0xff]   ;;  %v7845_v57 = vld [vmem:[%s8641_s24 + $0x114] ss:$40 sps:$4 sm:$0xff]  }
 0x23a   : > { %4740 = vmatpush1.bf16.msra.mxu0 %v7768_v58  ;;  %4827 = vmatprep.subr.bf16.mxu1 %v7779_v63  ;;  %v7842_v4 = vld [vmem:[%s8641_s24 + $0xb0c] ss:$40 sps:$4 sm:$0xff]   ;;  %v7840_v58 = vld [vmem:[%s8641_s24 + $0xb08] ss:$40 sps:$4 sm:$0xff]   ;;  %v7846_v60 = vld [vmem:[%s8641_s24 + $0xb58] ss:$40 sps:$4 sm:$0xff]  }
 0x23b   : > { %4741 = vmatprep.subr.bf16.mxu0 %v7776_v62  ;;  %v7843_v59 = vld [vmem:[%s8641_s24 + $0x110] ss:$40 sps:$4 sm:$0xff]   ;;  %v7851_v7 = vld [vmem:[%s8641_s24 + $0x164] ss:$40 sps:$4 sm:$0xff]   ;;  %v7849_v62 = vld [vmem:[%s8641_s24 + $0x160] ss:$40 sps:$4 sm:$0xff]  }
 0x23c   : > { %v7854_v63 = vld [vmem:[%s8641_s24 + $0xbac] ss:$40 sps:$4 sm:$0xff]  }
 0x23d   : > { %4828 = vmatpush1.bf16.msra.mxu1 %v7777_v5  ;;  %v7852_v5 = vld [vmem:[%s8641_s24 + $0xba8] ss:$40 sps:$4 sm:$0xff]  }
 0x23e   : > { %4742 = vmatpush1.bf16.msra.mxu0 %v7774_v1  ;;  %4829 = vmatprep.subr.bf16.mxu1 %v7785_v8  ;;  %v7857_v1 = vld [vmem:[%s8641_s24 + $0x1b4] ss:$40 sps:$4 sm:$0xff]  }
 0x23f   : > { %4743 = vmatprep.subr.bf16.mxu0 %v7782_v6  ;;  %v7855_v6 = vld [vmem:[%s8641_s24 + $0x1b0] ss:$40 sps:$4 sm:$0xff]   ;;  %v7860_v8 = vld [vmem:[%s8641_s24 + $0xbfc] ss:$40 sps:$4 sm:$0xff]  }
 0x241   : > { %4830 = vmatpush1.bf16.msra.mxu1 %v7783_v12  ;;  %v7858_v12 = vld [vmem:[%s8641_s24 + $0xbf8] ss:$40 sps:$4 sm:$0xff]  }
 0x242   : > { %4744 = vmatpush1.bf16.msra.mxu0 %v7780_v9  ;;  %4831 = vmatprep.subr.bf16.mxu1 %v7791_v14  ;;  %v7863_v9 = vld [vmem:[%s8641_s24 + $0x204] ss:$40 sps:$4 sm:$0xff]  }
 0x243   : > { %4745 = vmatprep.subr.bf16.mxu0 %v7788_v13  ;;  %v7861_v13 = vld [vmem:[%s8641_s24 + $0x200] ss:$40 sps:$4 sm:$0xff]   ;;  %v7866_v14 = vld [vmem:[%s8641_s24 + $0xc4c] ss:$40 sps:$4 sm:$0xff]  }
 0x245   : > { %4832 = vmatpush1.bf16.msra.mxu1 %v7789_v18  ;;  %v7864_v18 = vld [vmem:[%s8641_s24 + $0xc48] ss:$40 sps:$4 sm:$0xff]  }
 0x246   : > { %4746 = vmatpush1.bf16.msra.mxu0 %v7786_v16  ;;  %4833 = vmatprep.subr.bf16.mxu1 %v7797_v20  ;;  %v7869_v16 = vld [vmem:[%s8641_s24 + $0x254] ss:$40 sps:$4 sm:$0xff]  }
 0x247   : > { %4747 = vmatprep.subr.bf16.mxu0 %v7794_v19  ;;  %v7867_v19 = vld [vmem:[%s8641_s24 + $0x250] ss:$40 sps:$4 sm:$0xff]   ;;  %v7872_v20 = vld [vmem:[%s8641_s24 + $0xc9c] ss:$40 sps:$4 sm:$0xff]  }
 0x249   : > { %4834 = vmatpush1.bf16.msra.mxu1 %v7795_v28  ;;  %v7870_v28 = vld [vmem:[%s8641_s24 + $0xc98] ss:$40 sps:$4 sm:$0xff]  }
 0x24a   : > { %4748 = vmatpush1.bf16.msra.mxu0 %v7792_v27  ;;  %4835 = vmatprep.subr.bf16.mxu1 %v7803_v31  ;;  %v7875_v27 = vld [vmem:[%s8641_s24 + $0x2a4] ss:$40 sps:$4 sm:$0xff]  }
 0x24b   : > { %4749 = vmatprep.subr.bf16.mxu0 %v7800_v29  ;;  %v7873_v29 = vld [vmem:[%s8641_s24 + $0x2a0] ss:$40 sps:$4 sm:$0xff]   ;;  %v7878_v31 = vld [vmem:[%s8641_s24 + $0xcec] ss:$40 sps:$4 sm:$0xff]  }
 0x24d   : > { %4836 = vmatpush1.bf16.msra.mxu1 %v7801_v33  ;;  %v7876_v33 = vld [vmem:[%s8641_s24 + $0xce8] ss:$40 sps:$4 sm:$0xff]  }
 0x24e   : > { %4750 = vmatpush1.bf16.msra.mxu0 %v7798_v32  ;;  %4837 = vmatprep.subr.bf16.mxu1 %v7809_v35  ;;  %v7881_v32 = vld [vmem:[%s8641_s24 + $0x2f4] ss:$40 sps:$4 sm:$0xff]  }
 0x24f   : > { %4751 = vmatprep.subr.bf16.mxu0 %v7806_v34  ;;  %v7879_v34 = vld [vmem:[%s8641_s24 + $0x2f0] ss:$40 sps:$4 sm:$0xff]   ;;  %v7884_v35 = vld [vmem:[%s8641_s24 + $0xd3c] ss:$40 sps:$4 sm:$0xff]  }
 0x251   : > { %4838 = vmatpush1.bf16.msra.mxu1 %v7807_v22  ;;  %v7882_v22 = vld [vmem:[%s8641_s24 + $0xd38] ss:$40 sps:$4 sm:$0xff]  }
 0x252   : > { %4752 = vmatpush1.bf16.msra.mxu0 %v7804_v36  ;;  %4839 = vmatprep.subr.bf16.mxu1 %v7815_v37  ;;  %v7887_v36 = vld [vmem:[%s8641_s24 + $0x344] ss:$40 sps:$4 sm:$0xff]  }
 0x253   : > { %4753 = vmatprep.subr.bf16.mxu0 %v7812_v23  ;;  %v7885_v23 = vld [vmem:[%s8641_s24 + $0x340] ss:$40 sps:$4 sm:$0xff]   ;;  %v7890_v37 = vld [vmem:[%s8641_s24 + $0xd8c] ss:$40 sps:$4 sm:$0xff]  }
 0x255   : > { %4840 = vmatpush1.bf16.msra.mxu1 %v7813_v40  ;;  %v7888_v40 = vld [vmem:[%s8641_s24 + $0xd88] ss:$40 sps:$4 sm:$0xff]  }
 0x256   : > { %4754 = vmatpush1.bf16.msra.mxu0 %v7810_v39  ;;  %4841 = vmatprep.subr.bf16.mxu1 %v7821_v42  ;;  %v7893_v39 = vld [vmem:[%s8641_s24 + $0x394] ss:$40 sps:$4 sm:$0xff]  }
 0x257   : > { %4755 = vmatprep.subr.bf16.mxu0 %v7818_v41  ;;  %v7891_v41 = vld [vmem:[%s8641_s24 + $0x390] ss:$40 sps:$4 sm:$0xff]   ;;  %v7896_v42 = vld [vmem:[%s8641_s24 + $0xddc] ss:$40 sps:$4 sm:$0xff]  }
 0x259   : > { %4842 = vmatpush1.bf16.msra.mxu1 %v7819_v44  ;;  %v7894_v44 = vld [vmem:[%s8641_s24 + $0xdd8] ss:$40 sps:$4 sm:$0xff]  }
 0x25a   : > { %4756 = vmatpush1.bf16.msra.mxu0 %v7816_v43  ;;  %4854 = vmatprep.subr.bf16.mxu1 %v7824_v45  ;;  %v7899_v43 = vld [vmem:[%s8641_s24 + $0x3e4] ss:$40 sps:$4 sm:$0xff]   ;;  %v7897_v45 = vld [vmem:[%s8641_s24 + $0x3e0] ss:$40 sps:$4 sm:$0xff]  }
 0x25b   : > { %4940 = vmatprep.subr.bf16.mxu0 %v7827_v46  ;;  %v7902_v46 = vld [vmem:[%s8641_s24 + $0xe2c] ss:$40 sps:$4 sm:$0xff]  }
 0x25c   : > { %4844 = vmatmul.mubr.bf16.vlgmr.msra.gmra.mrb[8].mxu1 %v8734_v11 }
 0x25d   : > { %4758 = vmatmul.mubr.bf16.vlgmr.msra.gmra.mrb[4].mxu0 %v8892_v30  ;;  %4855 = vmatpush1.bf16.msra.mxu1 %v7822_v47  ;;  %v7905_v47 = vld [vmem:[%s8641_s24 + $0x434] ss:$40 sps:$4 sm:$0xff]  }
 0x25e   : > { %4941 = vmatpush1.bf16.msra.mxu0 %v7825_v48  ;;  %4856 = vmatprep.subr.bf16.mxu1 %v7830_v49  ;;  %v7900_v48 = vld [vmem:[%s8641_s24 + $0xe28] ss:$40 sps:$4 sm:$0xff]  }
 0x25f   : > { %4942 = vmatprep.subr.bf16.mxu0 %v7833_v2  ;;  %4886 = vmatprep.mubr.bf16.mxu1 %v8769_v38  ;;  %v7903_v49 = vld [vmem:[%s8641_s24 + $0x430] ss:$40 sps:$4 sm:$0xff]   ;;  %v7908_v2 = vld [vmem:[%s8641_s24 + $0xe7c] ss:$40 sps:$4 sm:$0xff]  }
 0x260   : > { %4972 = vmatprep.mubr.bf16.mxu0 %v8707_v53  ;;  %v7848_v53 = vld [vmem:[%s8641_s24 + $0xb5c] ss:$40 sps:$4 sm:$0xff]  }
 0x261   : > { %4857 = vmatpush1.bf16.msra.mxu1 %v7828_v50  ;;  %v7911_v50 = vld [vmem:[%s8641_s24 + $0x484] ss:$40 sps:$4 sm:$0xff]  }
 0x262   : > { %4943 = vmatpush1.bf16.msra.mxu0 %v7831_v51  ;;  %4858 = vmatprep.subr.bf16.mxu1 %v7836_v52  ;;  %v7906_v51 = vld [vmem:[%s8641_s24 + $0xe78] ss:$40 sps:$4 sm:$0xff]  }
 0x263   : > { %4944 = vmatprep.subr.bf16.mxu0 %v7839_v3  ;;  %v7909_v52 = vld [vmem:[%s8641_s24 + $0x480] ss:$40 sps:$4 sm:$0xff]   ;;  %v7914_v3 = vld [vmem:[%s8641_s24 + $0xecc] ss:$40 sps:$4 sm:$0xff]  }
 0x265   : > { %4859 = vmatpush1.bf16.msra.mxu1 %v7834_v55  ;;  %v7917_v55 = vld [vmem:[%s8641_s24 + $0x4d4] ss:$40 sps:$4 sm:$0xff]  }
 0x266   : > { %4945 = vmatpush1.bf16.msra.mxu0 %v7837_v56  ;;  %4860 = vmatprep.subr.bf16.mxu1 %v7842_v4  ;;  %v7912_v56 = vld [vmem:[%s8641_s24 + $0xec8] ss:$40 sps:$4 sm:$0xff]  }
 0x267   : > { %4946 = vmatprep.subr.bf16.mxu0 %v7845_v57  ;;  %v7915_v4 = vld [vmem:[%s8641_s24 + $0x4d0] ss:$40 sps:$4 sm:$0xff]   ;;  %v7920_v57 = vld [vmem:[%s8641_s24 + $0xf1c] ss:$40 sps:$4 sm:$0xff]  }
 0x269   : > { %4861 = vmatpush1.bf16.msra.mxu1 %v7840_v58  ;;  %v7923_v58 = vld [vmem:[%s8641_s24 + $0x524] ss:$40 sps:$4 sm:$0xff]  }
 0x26a   : > { %4947 = vmatpush1.bf16.msra.mxu0 %v7843_v59  ;;  %4862 = vmatprep.subr.bf16.mxu1 %v7848_v53  ;;  %v7918_v59 = vld [vmem:[%s8641_s24 + $0xf18] ss:$40 sps:$4 sm:$0xff]  }
 0x26b   : > { %4948 = vmatprep.subr.bf16.mxu0 %v7851_v7  ;;  %v7921_v53 = vld [vmem:[%s8641_s24 + $0x520] ss:$40 sps:$4 sm:$0xff]   ;;  %v7926_v7 = vld [vmem:[%s8641_s24 + $0xf6c] ss:$40 sps:$4 sm:$0xff]  }
 0x26d   : > { %4863 = vmatpush1.bf16.msra.mxu1 %v7846_v60  ;;  %v7929_v60 = vld [vmem:[%s8641_s24 + $0x574] ss:$40 sps:$4 sm:$0xff]  }
 0x26e   : > { %4949 = vmatpush1.bf16.msra.mxu0 %v7849_v62  ;;  %4864 = vmatprep.subr.bf16.mxu1 %v7854_v63  ;;  %v7924_v62 = vld [vmem:[%s8641_s24 + $0xf68] ss:$40 sps:$4 sm:$0xff]  }
 0x26f   : > { %4950 = vmatprep.subr.bf16.mxu0 %v7857_v1  ;;  %v7927_v63 = vld [vmem:[%s8641_s24 + $0x570] ss:$40 sps:$4 sm:$0xff]   ;;  %v7932_v1 = vld [vmem:[%s8641_s24 + $0xfbc] ss:$40 sps:$4 sm:$0xff]  }
 0x271   : > { %4865 = vmatpush1.bf16.msra.mxu1 %v7852_v5  ;;  %v7935_v5 = vld [vmem:[%s8641_s24 + $0x5c4] ss:$40 sps:$4 sm:$0xff]  }
 0x272   : > { %4951 = vmatpush1.bf16.msra.mxu0 %v7855_v6  ;;  %4866 = vmatprep.subr.bf16.mxu1 %v7860_v8  ;;  %v7933_v6 = vld [vmem:[%s8641_s24 + $0x5c0] ss:$40 sps:$4 sm:$0xff]   ;;  %v7938_v8 = vld [vmem:[%s8641_s24 + $0x100c] ss:$40 sps:$4 sm:$0xff]  }
 0x273   : > { %4952 = vmatprep.subr.bf16.mxu0 %v7863_v9  ;;  %v7941_v9 = vld [vmem:[%s8641_s24 + $0x614] ss:$40 sps:$4 sm:$0xff]  }
 0x275   : > { %4867 = vmatpush1.bf16.msra.mxu1 %v7858_v12  ;;  %v7936_v12 = vld [vmem:[%s8641_s24 + $0x1008] ss:$40 sps:$4 sm:$0xff]  }
 0x276   : > { %4953 = vmatpush1.bf16.msra.mxu0 %v7861_v13  ;;  %4868 = vmatprep.subr.bf16.mxu1 %v7866_v14  ;;  %v7939_v13 = vld [vmem:[%s8641_s24 + $0x610] ss:$40 sps:$4 sm:$0xff]   ;;  %v7947_v14 = vld [vmem:[%s8641_s24 + $0x664] ss:$40 sps:$4 sm:$0xff]  }
 0x277   : > { %4954 = vmatprep.subr.bf16.mxu0 %v7869_v16  ;;  %v972_v16 = vsub.s32 2, %v9116_v15 }
 0x279   : > { %4869 = vmatpush1.bf16.msra.mxu1 %v7864_v18  ;;  %v7942_v18 = vld [vmem:[%s8641_s24 + $0x1058] ss:$40 sps:$4 sm:$0xff]  }
 0x27a   : > { %4955 = vmatpush1.bf16.msra.mxu0 %v7867_v19  ;;  %4870 = vmatprep.subr.bf16.mxu1 %v7872_v20  ;;  %v7945_v19 = vld [vmem:[%s8641_s24 + $0x660] ss:$40 sps:$4 sm:$0xff]   ;;  %v976_v20 = vsub.s32 3, %v9116_v15 }
 0x27b   : > { %4956 = vmatprep.subr.bf16.mxu0 %v7875_v27  ;;  %v7950_v27 = vld [vmem:[%s8641_s24 + $0x10ac] ss:$40 sps:$4 sm:$0xff]  }
 0x27d   : > { %4871 = vmatpush1.bf16.msra.mxu1 %v7870_v28  ;;  %v7953_v28 = vld [vmem:[%s8641_s24 + $0x6b4] ss:$40 sps:$4 sm:$0xff]  }
 0x27e   : > { %4957 = vmatpush1.bf16.msra.mxu0 %v7873_v29  ;;  %4872 = vmatprep.subr.bf16.mxu1 %v7878_v31  ;;  %v973_v29 = vrot.slane %v9126_v24, %v972_v16  ;;  %v977_v31 = vrot.slane %v9126_v24, %v976_v20  ;;  %v7996_v16 = vld [vmem:[%s8641_s24 + $0x1328] ss:$40 sps:$4 sm:$0xff]   ;;  %v8007_v20 = vld [vmem:[%s8641_s24 + $0x984] ss:$40 sps:$4 sm:$0xff]  }
 0x27f   : > { %4958 = vmatprep.subr.bf16.mxu0 %v7881_v32  ;;  %v7948_v32 = vld [vmem:[%s8641_s24 + $0x10a8] ss:$40 sps:$4 sm:$0xff]  }
 0x281   : > { %4873 = vmatpush1.bf16.msra.mxu1 %v7876_v33  ;;  %v7951_v33 = vld [vmem:[%s8641_s24 + $0x6b0] ss:$40 sps:$4 sm:$0xff]  }
 0x282   : > { %4959 = vmatpush1.bf16.msra.mxu0 %v7879_v34  ;;  %4874 = vmatprep.subr.bf16.mxu1 %v7884_v35  ;;  %v7956_v34 = vld [vmem:[%s8641_s24 + $0x10fc] ss:$40 sps:$4 sm:$0xff]  }
 0x283   : > { %4960 = vmatprep.subr.bf16.mxu0 %v7887_v36  ;;  %v7959_v35 = vld [vmem:[%s8641_s24 + $0x704] ss:$40 sps:$4 sm:$0xff]  }
 0x285   : > { %4875 = vmatpush1.bf16.msra.mxu1 %v7882_v22 }
 0x286   : > { %4961 = vmatpush1.bf16.msra.mxu0 %v7885_v23  ;;  %4876 = vmatprep.subr.bf16.mxu1 %v7890_v37 }
 0x287   : > { %4962 = vmatprep.subr.bf16.mxu0 %v7893_v39 }
 0x289   : > { %4877 = vmatpush1.bf16.msra.mxu1 %v7888_v40  ;;  %v7954_v40 = vld [vmem:[%s8641_s24 + $0x10f8] ss:$40 sps:$4 sm:$0xff]  }
 0x28a   : > { %4963 = vmatpush1.bf16.msra.mxu0 %v7891_v41  ;;  %4878 = vmatprep.subr.bf16.mxu1 %v7896_v42  ;;  %v7957_v41 = vld [vmem:[%s8641_s24 + $0x700] ss:$40 sps:$4 sm:$0xff]  }
 0x28b   : > { %4964 = vmatprep.subr.bf16.mxu0 %v7899_v43  ;;  %v7962_v43 = vld [vmem:[%s8641_s24 + $0x114c] ss:$40 sps:$4 sm:$0xff]  }
 0x28d   : > { %4879 = vmatpush1.bf16.msra.mxu1 %v7894_v44  ;;  %v7965_v44 = vld [vmem:[%s8641_s24 + $0x754] ss:$40 sps:$4 sm:$0xff]  }
 0x28e   : > { %4965 = vmatpush1.bf16.msra.mxu0 %v7897_v45  ;;  %4880 = vmatprep.subr.bf16.mxu1 %v7902_v46 }
 0x28f   : > { %4966 = vmatprep.subr.bf16.mxu0 %v7905_v47 }
 0x291   : > { %4881 = vmatpush1.bf16.msra.mxu1 %v7900_v48 }
 0x292   : > { %4967 = vmatpush1.bf16.msra.mxu0 %v7903_v49  ;;  %4882 = vmatprep.subr.bf16.mxu1 %v7908_v2  ;;  %v7960_v2 = vld [vmem:[%s8641_s24 + $0x1148] ss:$40 sps:$4 sm:$0xff]  }
 0x293   : > { %4968 = vmatprep.subr.bf16.mxu0 %v7911_v50  ;;  %v7963_v50 = vld [vmem:[%s8641_s24 + $0x750] ss:$40 sps:$4 sm:$0xff]  }
 0x295   : > { %4883 = vmatpush1.bf16.msra.mxu1 %v7906_v51 }
 0x296   : > { %4969 = vmatpush1.bf16.msra.mxu0 %v7909_v52  ;;  %4884 = vmatprep.subr.bf16.mxu1 %v7914_v3  ;;  %v7968_v52 = vld [vmem:[%s8641_s24 + $0x119c] ss:$40 sps:$4 sm:$0xff]  }
 0x297   : > { %4970 = vmatprep.subr.bf16.mxu0 %v7917_v55  ;;  %v7971_v3 = vld [vmem:[%s8641_s24 + $0x7a4] ss:$40 sps:$4 sm:$0xff]  }
 0x299   : > { %4885 = vmatpush1.bf16.msra.mxu1 %v7912_v56  ;;  %v7966_v56 = vld [vmem:[%s8641_s24 + $0x1198] ss:$40 sps:$4 sm:$0xff]  }
 0x29a   : > { %4971 = vmatpush1.bf16.msra.mxu0 %v7915_v4  ;;  %4897 = vmatprep.subr.bf16.mxu1 %v7920_v57  ;;  %v7969_v4 = vld [vmem:[%s8641_s24 + $0x7a0] ss:$40 sps:$4 sm:$0xff]   ;;  %v7974_v57 = vld [vmem:[%s8641_s24 + $0x11ec] ss:$40 sps:$4 sm:$0xff]  }
 0x29b   : > { %4983 = vmatprep.subr.bf16.mxu0 %v7923_v58  ;;  %v7977_v58 = vld [vmem:[%s8641_s24 + $0x7f4] ss:$40 sps:$4 sm:$0xff]  }
 0x29c   : > { %4887 = vmatmul.mubr.bf16.vlgmr.msra.gmra.mrb[8].mxu1 %v8812_v17 }
 0x29d   : > { %4973 = vmatmul.mubr.bf16.vlgmr.msra.gmra.mrb[8].mxu0 %v8732_v10  ;;  %4898 = vmatpush1.bf16.msra.mxu1 %v7918_v59  ;;  %v7930_v10 = vld [vmem:[%s8641_s24 + $0xfb8] ss:$40 sps:$4 sm:$0xff]   ;;  %v7972_v59 = vld [vmem:[%s8641_s24 + $0x11e8] ss:$40 sps:$4 sm:$0xff]  }
 0x29e   : > { %4984 = vmatpush1.bf16.msra.mxu0 %v7921_v53  ;;  %4899 = vmatprep.subr.bf16.mxu1 %v7926_v7  ;;  %v7975_v53 = vld [vmem:[%s8641_s24 + $0x7f0] ss:$40 sps:$4 sm:$0xff]   ;;  %v7980_v7 = vld [vmem:[%s8641_s24 + $0x123c] ss:$40 sps:$4 sm:$0xff]  }
 0x29f   : > { %4985 = vmatprep.subr.bf16.mxu0 %v7929_v60  ;;  %4929 = vmatprep.mubr.bf16.mxu1 %v8828_v26  ;;  %v7983_v60 = vld [vmem:[%s8641_s24 + $0x844] ss:$40 sps:$4 sm:$0xff]  }
 0x2a0   : > { %5015 = vmatprep.mubr.bf16.mxu0 %v8709_v54  ;;  %v7944_v54 = vld [vmem:[%s8641_s24 + $0x105c] ss:$40 sps:$4 sm:$0xff]  }
 0x2a1   : > { %4900 = vmatpush1.bf16.msra.mxu1 %v7924_v62  ;;  %v7978_v62 = vld [vmem:[%s8641_s24 + $0x1238] ss:$40 sps:$4 sm:$0xff]  }
 0x2a2   : > { %4986 = vmatpush1.bf16.msra.mxu0 %v7927_v63  ;;  %4901 = vmatprep.subr.bf16.mxu1 %v7932_v1  ;;  %v7981_v63 = vld [vmem:[%s8641_s24 + $0x840] ss:$40 sps:$4 sm:$0xff]   ;;  %v7986_v1 = vld [vmem:[%s8641_s24 + $0x128c] ss:$40 sps:$4 sm:$0xff]  }
 0x2a3   : > { %4987 = vmatprep.subr.bf16.mxu0 %v7935_v5  ;;  %v7989_v5 = vld [vmem:[%s8641_s24 + $0x894] ss:$40 sps:$4 sm:$0xff]  }
 0x2a5   : > { %4902 = vmatpush1.bf16.msra.mxu1 %v7930_v10  ;;  %v7984_v10 = vld [vmem:[%s8641_s24 + $0x1288] ss:$40 sps:$4 sm:$0xff]  }
 0x2a6   : > { %4988 = vmatpush1.bf16.msra.mxu0 %v7933_v6  ;;  %4903 = vmatprep.subr.bf16.mxu1 %v7938_v8  ;;  %v7987_v6 = vld [vmem:[%s8641_s24 + $0x890] ss:$40 sps:$4 sm:$0xff]   ;;  %v7992_v8 = vld [vmem:[%s8641_s24 + $0x12dc] ss:$40 sps:$4 sm:$0xff]  }
 0x2a7   : > { %4989 = vmatprep.subr.bf16.mxu0 %v7941_v9  ;;  %v7995_v9 = vld [vmem:[%s8641_s24 + $0x8e4] ss:$40 sps:$4 sm:$0xff]  }
 0x2a9   : > { %4904 = vmatpush1.bf16.msra.mxu1 %v7936_v12  ;;  %v7990_v12 = vld [vmem:[%s8641_s24 + $0x12d8] ss:$40 sps:$4 sm:$0xff]  }
 0x2aa   : > { %4990 = vmatpush1.bf16.msra.mxu0 %v7939_v13  ;;  %4905 = vmatprep.subr.bf16.mxu1 %v7944_v54  ;;  %v7993_v13 = vld [vmem:[%s8641_s24 + $0x8e0] ss:$40 sps:$4 sm:$0xff]   ;;  %v7998_v54 = vld [vmem:[%s8641_s24 + $0x132c] ss:$40 sps:$4 sm:$0xff]  }
 0x2ab   : > { %4991 = vmatprep.subr.bf16.mxu0 %v7947_v14  ;;  %v8001_v14 = vld [vmem:[%s8641_s24 + $0x934] ss:$40 sps:$4 sm:$0xff]  }
 0x2ad   : > { %4906 = vmatpush1.bf16.msra.mxu1 %v7942_v18  ;;  %v7999_v18 = vld [vmem:[%s8641_s24 + $0x930] ss:$40 sps:$4 sm:$0xff]  }
 0x2ae   : > { %4992 = vmatpush1.bf16.msra.mxu0 %v7945_v19  ;;  %4907 = vmatprep.subr.bf16.mxu1 %v7950_v27  ;;  %v8004_v19 = vld [vmem:[%s8641_s24 + $0x137c] ss:$40 sps:$4 sm:$0xff]   ;;  %v8002_v27 = vld [vmem:[%s8641_s24 + $0x1378] ss:$40 sps:$4 sm:$0xff]  }
 0x2af   : > { %4993 = vmatprep.subr.bf16.mxu0 %v7953_v28  ;;  %v4587_v36 = vpop.f32.mrb[4].mxu1  ;;  %v8005_v28 = vld [vmem:[%s8641_s24 + $0x980] ss:$40 sps:$4 sm:$0xff]  }
 0x2b0   : > { %v6996_v22 = vadd.f32 %v4587_v36, %v973_v29  ;;  %v4589_v23 = vpop.f32.mrb[5].mxu1  ;;  %v8014_v36 = vld [vmem:[%s8641_s24 + $0xa20] ss:$40 sps:$4 sm:$0xff]  }
 0x2b1   : > { %v6997_v37 = vadd.f32 %v4589_v23, %v977_v31  ;;  %v4591_v39 = vpop.f32.mrb[6].mxu1  ;;  %4908 = vmatpush1.bf16.msra.mxu1 %v7948_v32  ;;  %v8008_v32 = vld [vmem:[%s8641_s24 + $0x13c8] ss:$40 sps:$4 sm:$0xff]   ;;  %v8021_v23 = vld [vmem:[%s8641_s24 + $0xa74] ss:$40 sps:$4 sm:$0xff]  }
 0x2b2   : > { %4994 = vmatpush1.bf16.msra.mxu0 %v7951_v33  ;;  %v6998_v24 = vadd.f32 %v4591_v39, %v973_v29  ;;  %v4593_v42 = vpop.f32.mrb[7].mxu1  ;;  %4909 = vmatprep.subr.bf16.mxu1 %v7956_v34  ;;  %v5114_v46 = vmax.f32 %v6996_v22, 0.0  ;;  %v8010_v29 = vld [vmem:[%s8641_s24 + $0x13cc] ss:$40 sps:$4 sm:$0xff]   ;;  %v8011_v33 = vld [vmem:[%s8641_s24 + $0x9d0] ss:$40 sps:$4 sm:$0xff]  }
 0x2b3   : > { %4995 = vmatprep.subr.bf16.mxu0 %v7959_v35  ;;  %v6999_v45 = vadd.f32 %v4593_v42, %v977_v31  ;;  %v5115_v48 = vmax.f32 %v6997_v37, 0.0  ;;  %v8013_v31 = vld [vmem:[%s8641_s24 + $0x9d4] ss:$40 sps:$4 sm:$0xff]   ;;  %v8016_v34 = vld [vmem:[%s8641_s24 + $0xa24] ss:$40 sps:$4 sm:$0xff]  }
 0x2b4   : > { %v5124_v47 = vmax.f32 %v6998_v24, 0.0  ;;  %v8017_v35 = vld [vmem:[%s8652_s25 + $0x40] sm:$0xff]   ;;  %v8022_v37 = vld [vmem:[%s8652_s25 + $0x48] sm:$0xff]   ;;  %v8027_v24 = vld [vmem:[%s8652_s25 + $0x50] sm:$0xff]  }
 0x2b5   : > { %v5125_v49 = vmax.f32 %v6999_v45, 0.0  ;;  %4910 = vmatpush1.bf16.msra.mxu1 %v7954_v40  ;;  %v8018_v22 = vld [vmem:[%s8652_s25] sm:$0xff]   ;;  %v8023_v40 = vld [vmem:[%s8652_s25 + $0x8] sm:$0xff]   ;;  %v8028_v42 = vld [vmem:[%s8652_s25 + $0x10] sm:$0xff]  }
 0x2b6   : > { %4996 = vmatpush1.bf16.msra.mxu0 %v7957_v41  ;;  %v9301_v51 = vpack.c.bf16 %v5124_v47, %v5114_v46  ;;  %4911 = vmatprep.subr.bf16.mxu1 %v7962_v43  ;;  %v8019_v39 = vld [vmem:[%s8641_s24 + $0xa70] ss:$40 sps:$4 sm:$0xff]   ;;  %v8026_v41 = vld [vmem:[%s8641_s24 + $0xac4] ss:$40 sps:$4 sm:$0xff]   ;;  %v8031_v43 = vld [vmem:[%s8641_s24 + $0xb14] ss:$40 sps:$4 sm:$0xff]  }
 0x2b7   : > { %4997 = vmatprep.subr.bf16.mxu0 %v7965_v44  ;;  %v9305_v55 = vpack.c.bf16 %v5125_v49, %v5115_v48  ;;  %v8029_v44 = vld [vmem:[%s8641_s24 + $0xb10] ss:$40 sps:$4 sm:$0xff]   ;;  %v8034_v47 = vld [vmem:[%s8641_s24 + $0xb60] ss:$40 sps:$4 sm:$0xff]   ;;  %v8041_v49 = vld [vmem:[%s8641_s24 + $0xbb4] ss:$40 sps:$4 sm:$0xff]  }
 0x2b8   : > { %v8033_v45 = vld [vmem:[%s8652_s25 + $0x18] sm:$0xff]   ;;  %v8037_v46 = vld [vmem:[%s8652_s25 + $0x60] sm:$0xff]  }
 0x2b9   : > { %4912 = vmatpush1.bf16.msra.mxu1 %v7960_v2  ;;  %v8038_v48 = vld [vmem:[%s8652_s25 + $0x20] sm:$0xff]   ;;  %v8042_v2 = vld [vmem:[%s8652_s25 + $0x68] sm:$0xff]  }
 0x2ba   : > { %4998 = vmatpush1.bf16.msra.mxu0 %v7963_v50  ;;  %4913 = vmatprep.subr.bf16.mxu1 %v7968_v52  ;;  %v8039_v50 = vld [vmem:[%s8641_s24 + $0xbb0] ss:$40 sps:$4 sm:$0xff]   ;;  %v8043_v52 = vld [vmem:[%s8652_s25 + $0x28] sm:$0xff]  }
 0x2bb   : > { %4999 = vmatprep.subr.bf16.mxu0 %v7971_v3  ;;  %v8046_v3 = vld [vmem:[%s8641_s24 + $0xc04] ss:$40 sps:$4 sm:$0xff]  }
 0x2bd   : > { %4914 = vmatpush1.bf16.msra.mxu1 %v7966_v56  ;;  %v8047_v56 = vld [vmem:[%s8652_s25 + $0x70] sm:$0xff]  }
 0x2be   : > { %5000 = vmatpush1.bf16.msra.mxu0 %v7969_v4  ;;  %4915 = vmatprep.subr.bf16.mxu1 %v7974_v57  ;;  %v8044_v4 = vld [vmem:[%s8641_s24 + $0xc00] ss:$40 sps:$4 sm:$0xff]  }
 0x2bf   : > { %5001 = vmatprep.subr.bf16.mxu0 %v7977_v58  ;;  %v8048_v57 = vld [vmem:[%s8652_s25 + $0x30] sm:$0xff]   ;;  %v8051_v58 = vld [vmem:[%s8641_s24 + $0xc54] ss:$40 sps:$4 sm:$0xff]  }
 0x2c1   : > { %4916 = vmatpush1.bf16.msra.mxu1 %v7972_v59  ;;  %v8052_v59 = vld [vmem:[%s8652_s25 + $0x78] sm:$0xff]  }
 0x2c2   : > { %5002 = vmatpush1.bf16.msra.mxu0 %v7975_v53  ;;  %4917 = vmatprep.subr.bf16.mxu1 %v7980_v7  ;;  %v8049_v53 = vld [vmem:[%s8641_s24 + $0xc50] ss:$40 sps:$4 sm:$0xff]  }
 0x2c3   : > { %5003 = vmatprep.subr.bf16.mxu0 %v7983_v60  ;;  %v8053_v7 = vld [vmem:[%s8652_s25 + $0x38] sm:$0xff]  }
 0x2c4   : > { %v8056_v60 = vld [vmem:[%s8641_s24 + $0xca4] ss:$40 sps:$4 sm:$0xff]  }
 0x2c5   : > { %4918 = vmatpush1.bf16.msra.mxu1 %v7978_v62  ;;  %v8057_v62 = vld [vmem:[%s8652_s25 + $0xc0] sm:$0xff]  }
 0x2c6   : > { %5004 = vmatpush1.bf16.msra.mxu0 %v7981_v63  ;;  %4919 = vmatprep.subr.bf16.mxu1 %v7986_v1  ;;  %v8054_v63 = vld [vmem:[%s8641_s24 + $0xca0] ss:$40 sps:$4 sm:$0xff]   ;;  %v8058_v1 = vld [vmem:[%s8652_s25 + $0x80] sm:$0xff]  }
 0x2c7   : > { %5005 = vmatprep.subr.bf16.mxu0 %v7989_v5  ;;  %v8061_v5 = vld [vmem:[%s8641_s24 + $0xcf4] ss:$40 sps:$4 sm:$0xff]  }
 0x2c9   : > { %4920 = vmatpush1.bf16.msra.mxu1 %v7984_v10  ;;  %v8062_v10 = vld [vmem:[%s8652_s25 + $0xc8] sm:$0xff]  }
 0x2ca   : > { %5006 = vmatpush1.bf16.msra.mxu0 %v7987_v6  ;;  %4921 = vmatprep.subr.bf16.mxu1 %v7992_v8  ;;  %v8059_v6 = vld [vmem:[%s8641_s24 + $0xcf0] ss:$40 sps:$4 sm:$0xff]   ;;  %v8063_v8 = vld [vmem:[%s8652_s25 + $0x88] sm:$0xff]  }
 0x2cb   : > { %5007 = vmatprep.subr.bf16.mxu0 %v7995_v9  ;;  %v8066_v9 = vld [vmem:[%s8641_s24 + $0xd44] ss:$40 sps:$4 sm:$0xff]  }
 0x2cd   : > { %4922 = vmatpush1.bf16.msra.mxu1 %v7990_v12  ;;  %v8067_v12 = vld [vmem:[%s8652_s25 + $0xd0] sm:$0xff]  }
 0x2ce   : > { %5008 = vmatpush1.bf16.msra.mxu0 %v7993_v13  ;;  %4923 = vmatprep.subr.bf16.mxu1 %v7998_v54  ;;  %v8064_v13 = vld [vmem:[%s8641_s24 + $0xd40] ss:$40 sps:$4 sm:$0xff]   ;;  %v8071_v54 = vld [vmem:[%s8641_s24 + $0xd94] ss:$40 sps:$4 sm:$0xff]  }
 0x2cf   : > { %5009 = vmatprep.subr.bf16.mxu0 %v8001_v14  ;;  %v8072_v14 = vld [vmem:[%s8652_s25 + $0xd8] sm:$0xff]  }
 0x2d1   : > { %4924 = vmatpush1.bf16.msra.mxu1 %v7996_v16  ;;  %v8073_v16 = vld [vmem:[%s8652_s25 + $0x98] sm:$0xff]  }
 0x2d2   : > { %5010 = vmatpush1.bf16.msra.mxu0 %v7999_v18  ;;  %4925 = vmatprep.subr.bf16.mxu1 %v8004_v19  ;;  %v8076_v18 = vld [vmem:[%s8641_s24 + $0xde4] ss:$40 sps:$4 sm:$0xff]   ;;  %v8077_v19 = vld [vmem:[%s8652_s25 + $0xe0] sm:$0xff]  }
 0x2d3   : > { %5011 = vmatprep.subr.bf16.mxu0 %v8007_v20  ;;  %v8074_v20 = vld [vmem:[%s8641_s24 + $0xde0] ss:$40 sps:$4 sm:$0xff]  }
 0x2d5   : > { %4926 = vmatpush1.bf16.msra.mxu1 %v8002_v27  ;;  %v8078_v27 = vld [vmem:[%s8652_s25 + $0xa0] sm:$0xff]  }
 0x2d6   : > { %5012 = vmatpush1.bf16.msra.mxu0 %v8005_v28  ;;  %4927 = vmatprep.subr.bf16.mxu1 %v8010_v29  ;;  %v8081_v28 = vld [vmem:[%s8641_s24 + $0xe34] ss:$40 sps:$4 sm:$0xff]  }
 0x2d7   : > { %5013 = vmatprep.subr.bf16.mxu0 %v8013_v31  ;;  %v8082_v29 = vld [vmem:[%s8652_s25 + $0xe8] sm:$0xff]   ;;  %v8079_v31 = vld [vmem:[%s8641_s24 + $0xe30] ss:$40 sps:$4 sm:$0xff]  }
 0x2d9   : > { %4928 = vmatpush1.bf16.msra.mxu1 %v8008_v32  ;;  %v8083_v32 = vld [vmem:[%s8652_s25 + $0xa8] sm:$0xff]  }
 0x2da   : > { %5014 = vmatpush1.bf16.msra.mxu0 %v8011_v33  ;;  %6878 = vmatprep.subr.bf16.mxu1 %v8017_v35  ;;  %v8086_v33 = vld [vmem:[%s8641_s24 + $0xe84] ss:$40 sps:$4 sm:$0xff]   ;;  %v8084_v35 = vld [vmem:[%s8641_s24 + $0xe80] ss:$40 sps:$4 sm:$0xff]  }
 0x2db   : > { %5026 = vmatprep.subr.bf16.mxu0 %v8016_v34  ;;  %v8087_v34 = vld [vmem:[%s8652_s25 + $0xf0] sm:$0xff]  }
 0x2dc   : > { %4930 = vmatmul.mubr.bf16.vlgmr.msra.gmra.mrb[8].mxu1 %v8892_v30 }
 0x2dd   : > { %5016 = vmatmul.mubr.bf16.vlgmr.msra.gmra.mrb[8].mxu0 %v8734_v11  ;;  %6879 = vmatpush3.bf16.msra.mxu1 %v8018_v22  ;;  %v8024_v11 = vld [vmem:[%s8641_s24 + $0xac0] ss:$40 sps:$4 sm:$0xff]   ;;  %v8091_v22 = vld [vmem:[%s8641_s24 + $0xed4] ss:$40 sps:$4 sm:$0xff]  }
 0x2de   : > { %5027 = vmatpush1.bf16.msra.mxu0 %v8014_v36  ;;  %5814 = vmatprep.mubr.bf16.mxu1 %v9161_v0  ;;  %v8032_v0 = vld [vmem:[%s8652_s25 + $0x58] sm:$0xff]   ;;  %v8088_v36 = vld [vmem:[%s8652_s25 + $0xb0] sm:$0xff]  }
 0x2df   : > { %5028 = vmatprep.subr.bf16.mxu0 %v8021_v23  ;;  %6880 = vmatprep.subr.bf16.mxu1 %v8022_v37  ;;  %v8092_v23 = vld [vmem:[%s8652_s25 + $0xf8] sm:$0xff]  }
 0x2e0   : > { %5058 = vmatprep.mubr.bf16.mxu0 %v8769_v38  ;;  %v8036_v38 = vld [vmem:[%s8641_s24 + $0xb64] ss:$40 sps:$4 sm:$0xff]   ;;  %v8089_v37 = vld [vmem:[%s8641_s24 + $0xed0] ss:$40 sps:$4 sm:$0xff]  }
 0x2e1   : > { %6881 = vmatpush3.bf16.msra.mxu1 %v8023_v40  ;;  %v8096_v40 = vld [vmem:[%s8641_s24 + $0xf24] ss:$40 sps:$4 sm:$0xff]  }
 0x2e2   : > { %5029 = vmatpush1.bf16.msra.mxu0 %v8019_v39  ;;  %6882 = vmatprep.subr.bf16.mxu1 %v8027_v24  ;;  %v8093_v39 = vld [vmem:[%s8652_s25 + $0xb8] sm:$0xff]   ;;  %v8094_v24 = vld [vmem:[%s8641_s24 + $0xf20] ss:$40 sps:$4 sm:$0xff]  }
 0x2e3   : > { %5030 = vmatprep.subr.bf16.mxu0 %v8026_v41  ;;  %v8097_v41 = vld [vmem:[%s8652_s25 + $0x140] sm:$0xff]  }
 0x2e5   : > { %6883 = vmatpush3.bf16.msra.mxu1 %v8028_v42  ;;  %v8101_v42 = vld [vmem:[%s8641_s24 + $0xf74] ss:$40 sps:$4 sm:$0xff]  }
 0x2e6   : > { %5031 = vmatpush1.bf16.msra.mxu0 %v8024_v11  ;;  %6884 = vmatprep.subr.bf16.mxu1 %v8032_v0  ;;  %v8098_v11 = vld [vmem:[%s8652_s25 + $0x100] sm:$0xff]  }
 0x2e7   : > { %5032 = vmatprep.subr.bf16.mxu0 %v8031_v43  ;;  %v8102_v43 = vld [vmem:[%s8652_s25 + $0x148] sm:$0xff]   ;;  %v8099_v0 = vld [vmem:[%s8641_s24 + $0xf70] ss:$40 sps:$4 sm:$0xff]  }
 0x2e9   : > { %6885 = vmatpush3.bf16.msra.mxu1 %v8033_v45  ;;  %v8106_v45 = vld [vmem:[%s8641_s24 + $0xfc4] ss:$40 sps:$4 sm:$0xff]  }
 0x2ea   : > { %5033 = vmatpush1.bf16.msra.mxu0 %v8029_v44  ;;  %6886 = vmatprep.subr.bf16.mxu1 %v8037_v46  ;;  %v8103_v44 = vld [vmem:[%s8652_s25 + $0x108] sm:$0xff]  }
 0x2eb   : > { %5034 = vmatprep.subr.bf16.mxu0 %v8036_v38  ;;  %v8107_v38 = vld [vmem:[%s8652_s25 + $0x150] sm:$0xff]   ;;  %v8111_v46 = vld [vmem:[%s8641_s24 + $0x1014] ss:$40 sps:$4 sm:$0xff]  }
 0x2ed   : > { %6887 = vmatpush3.bf16.msra.mxu1 %v8038_v48  ;;  %v8109_v48 = vld [vmem:[%s8641_s24 + $0x1010] ss:$40 sps:$4 sm:$0xff]  }
 0x2ee   : > { %5035 = vmatpush1.bf16.msra.mxu0 %v8034_v47  ;;  %6888 = vmatprep.subr.bf16.mxu1 %v8042_v2  ;;  %v8112_v47 = vld [vmem:[%s8652_s25 + $0x158] sm:$0xff]   ;;  %v8117_v2 = vld [vmem:[%s8652_s25 + $0x160] sm:$0xff]  }
 0x2ef   : > { %5036 = vmatprep.subr.bf16.mxu0 %v8041_v49  ;;  %v8113_v49 = vld [vmem:[%s8652_s25 + $0x118] sm:$0xff]  }
 0x2f1   : > { %6889 = vmatpush3.bf16.msra.mxu1 %v8043_v52  ;;  %v8114_v52 = vld [vmem:[%s8641_s24 + $0x1060] ss:$40 sps:$4 sm:$0xff]  }
 0x2f2   : > { %5037 = vmatpush1.bf16.msra.mxu0 %v8039_v50  ;;  %6890 = vmatprep.subr.bf16.mxu1 %v8047_v56  ;;  %v980_v50 = vsub.s32 4, %v9116_v15  ;;  %v984_v56 = vsub.s32 5, %v9116_v15 }
 0x2f3   : > { %5038 = vmatprep.subr.bf16.mxu0 %v8046_v3  ;;  %v8118_v3 = vld [vmem:[%s8652_s25 + $0x120] sm:$0xff]  }
 0x2f5   : > { %6891 = vmatpush3.bf16.msra.mxu1 %v8048_v57  ;;  %v8122_v57 = vld [vmem:[%s8652_s25 + $0x168] sm:$0xff]  }
 0x2f6   : > { %5039 = vmatpush1.bf16.msra.mxu0 %v8044_v4  ;;  %6892 = vmatprep.subr.bf16.mxu1 %v8052_v59  ;;  %v8121_v4 = vld [vmem:[%s8641_s24 + $0x10b4] ss:$40 sps:$4 sm:$0xff]  }
 0x2f7   : > { %5040 = vmatprep.subr.bf16.mxu0 %v8051_v58  ;;  %v9435_v58 = vld [vmem:[%s8649_s19] sm:$0xff] }
 0x2f8   : > { %v981_v59 = vrot.slane %v9435_v58, %v980_v50  ;;  %v8171_v50 = vld [vmem:[%s8652_s25 + $0x1b0] sm:$0xff]  }
 0x2f9   : > { %6893 = vmatpush3.bf16.msra.mxu1 %v8053_v7  ;;  %v8119_v7 = vld [vmem:[%s8641_s24 + $0x10b0] ss:$40 sps:$4 sm:$0xff]  }
 0x2fa   : > { %5041 = vmatpush1.bf16.msra.mxu0 %v8049_v53  ;;  %6900 = vmatprep.subr.bf16.mxu1 %v8057_v62  ;;  %v985_v53 = vrot.slane %v9435_v58, %v984_v56  ;;  %v8126_v62 = vld [vmem:[%s8641_s24 + $0x1104] ss:$40 sps:$4 sm:$0xff]   ;;  %v8155_v56 = vld [vmem:[%s8641_s24 + $0x13d0] ss:$40 sps:$4 sm:$0xff]  }
 0x2fb   : > { %5042 = vmatprep.subr.bf16.mxu0 %v8056_v60  ;;  %v8123_v60 = vld [vmem:[%s8652_s25 + $0x128] sm:$0xff]  }
 0x2fc   : > { %5815 = vmatmul.mubr.bf16.vlgmr.msra.gmra.mrb[12].mxu1 %v9157_v61  ;;  %v8068_v61 = vld [vmem:[%s8652_s25 + $0x90] sm:$0xff]  }
 0x2fd   : > { %6901 = vmatpush3.bf16.msra.mxu1 %v8058_v1  ;;  %5855 = vmatprep.mubr.bf16.mxu1 %v9305_v55  ;;  %v8069_v55 = vld [vmem:[%s8641_s24 + $0xd90] ss:$40 sps:$4 sm:$0xff]  }
 0x2fe   : > { %5043 = vmatpush1.bf16.msra.mxu0 %v8054_v63  ;;  %6902 = vmatprep.subr.bf16.mxu1 %v8062_v10  ;;  %v8127_v63 = vld [vmem:[%s8652_s25 + $0x170] sm:$0xff]  }
 0x2ff   : > { %5044 = vmatprep.subr.bf16.mxu0 %v8061_v5 }
 0x301   : > { %6903 = vmatpush3.bf16.msra.mxu1 %v8063_v8 }
 0x302   : > { %5045 = vmatpush1.bf16.msra.mxu0 %v8059_v6  ;;  %6904 = vmatprep.subr.bf16.mxu1 %v8067_v12  ;;  %v8128_v12 = vld [vmem:[%s8652_s25 + $0x130] sm:$0xff]  }
 0x303   : > { %5046 = vmatprep.subr.bf16.mxu0 %v8066_v9  ;;  %v8124_v9 = vld [vmem:[%s8641_s24 + $0x1100] ss:$40 sps:$4 sm:$0xff]  }
 0x305   : > { %6905 = vmatpush3.bf16.msra.mxu1 %v8068_v61 }
 0x306   : > { %5047 = vmatpush1.bf16.msra.mxu0 %v8064_v13  ;;  %6906 = vmatprep.subr.bf16.mxu1 %v8072_v14  ;;  %v8132_v14 = vld [vmem:[%s8652_s25 + $0x178] sm:$0xff]  }
 0x307   : > { %5048 = vmatprep.subr.bf16.mxu0 %v8071_v54  ;;  %v8131_v54 = vld [vmem:[%s8641_s24 + $0x1154] ss:$40 sps:$4 sm:$0xff]  }
 0x309   : > { %6907 = vmatpush3.bf16.msra.mxu1 %v8073_v16 }
 0x30a   : > { %5049 = vmatpush1.bf16.msra.mxu0 %v8069_v55  ;;  %6908 = vmatprep.subr.bf16.mxu1 %v8077_v19 }
 0x30b   : > { %5050 = vmatprep.subr.bf16.mxu0 %v8076_v18 }
 0x30d   : > { %6909 = vmatpush3.bf16.msra.mxu1 %v8078_v27  ;;  %v8129_v27 = vld [vmem:[%s8641_s24 + $0x1150] ss:$40 sps:$4 sm:$0xff]  }
 0x30e   : > { %5051 = vmatpush1.bf16.msra.mxu0 %v8074_v20  ;;  %6910 = vmatprep.subr.bf16.mxu1 %v8082_v29 }
 0x30f   : > { %5052 = vmatprep.subr.bf16.mxu0 %v8081_v28  ;;  %v8133_v28 = vld [vmem:[%s8652_s25 + $0x138] sm:$0xff]  }
 0x311   : > { %6911 = vmatpush3.bf16.msra.mxu1 %v8083_v32 }
 0x312   : > { %5053 = vmatpush1.bf16.msra.mxu0 %v8079_v31  ;;  %6912 = vmatprep.subr.bf16.mxu1 %v8087_v34  ;;  %v8136_v31 = vld [vmem:[%s8641_s24 + $0x11a4] ss:$40 sps:$4 sm:$0xff]   ;;  %v8134_v34 = vld [vmem:[%s8641_s24 + $0x11a0] ss:$40 sps:$4 sm:$0xff]  }
 0x313   : > { %5054 = vmatprep.subr.bf16.mxu0 %v8086_v33  ;;  %v8158_v33 = vld [vmem:[%s8652_s25 + $0x1c0] sm:$0xff]  }
 0x315   : > { %6913 = vmatpush3.bf16.msra.mxu1 %v8088_v36  ;;  %v8139_v36 = vld [vmem:[%s8641_s24 + $0x11f4] ss:$40 sps:$4 sm:$0xff]  }
 0x316   : > { %5055 = vmatpush1.bf16.msra.mxu0 %v8084_v35  ;;  %6914 = vmatprep.subr.bf16.mxu1 %v8092_v23  ;;  %v8159_v35 = vld [vmem:[%s8652_s25 + $0x180] sm:$0xff]  }
 0x317   : > { %5056 = vmatprep.subr.bf16.mxu0 %v8091_v22  ;;  %v8160_v22 = vld [vmem:[%s8652_s25 + $0x1c8] sm:$0xff]   ;;  %v8137_v23 = vld [vmem:[%s8641_s24 + $0x11f0] ss:$40 sps:$4 sm:$0xff]  }
 0x319   : > { %6915 = vmatpush3.bf16.msra.mxu1 %v8093_v39  ;;  %v8142_v39 = vld [vmem:[%s8641_s24 + $0x1244] ss:$40 sps:$4 sm:$0xff]  }
 0x31a   : > { %5057 = vmatpush1.bf16.msra.mxu0 %v8089_v37  ;;  %6922 = vmatprep.subr.bf16.mxu1 %v8097_v41  ;;  %v8161_v37 = vld [vmem:[%s8652_s25 + $0x188] sm:$0xff]  }
 0x31b   : > { %5069 = vmatprep.subr.bf16.mxu0 %v8096_v40  ;;  %v8162_v40 = vld [vmem:[%s8652_s25 + $0x1d0] sm:$0xff]  }
 0x31c   : > { %5856 = vmatmul.mubr.bf16.vlgmr.msra.gmra.mrb[16].mxu1 %v9301_v51  ;;  %v8104_v51 = vld [vmem:[%s8641_s24 + $0xfc0] ss:$40 sps:$4 sm:$0xff]  }
 0x31d   : > { %5059 = vmatmul.mubr.bf16.vlgmr.msra.gmra.mrb[8].mxu0 %v8812_v17  ;;  %6923 = vmatpush3.bf16.msra.mxu1 %v8098_v11  ;;  %v8108_v17 = vld [vmem:[%s8652_s25 + $0x110] sm:$0xff]   ;;  %v8145_v11 = vld [vmem:[%s8641_s24 + $0x1294] ss:$40 sps:$4 sm:$0xff]  }
 0x31e   : > { %5070 = vmatpush1.bf16.msra.mxu0 %v8094_v24  ;;  %6924 = vmatprep.subr.bf16.mxu1 %v8102_v43  ;;  %v8140_v41 = vld [vmem:[%s8641_s24 + $0x1240] ss:$40 sps:$4 sm:$0xff]   ;;  %v8143_v43 = vld [vmem:[%s8641_s24 + $0x1290] ss:$40 sps:$4 sm:$0xff]  }
 0x31f   : > { %5071 = vmatprep.subr.bf16.mxu0 %v8101_v42  ;;  %5101 = vmatprep.mubr.bf16.mxu0 %v8828_v26  ;;  %v8116_v26 = vld [vmem:[%s8641_s24 + $0x1064] ss:$40 sps:$4 sm:$0xff]  }
 0x320   : > { %v8163_v24 = vld [vmem:[%s8652_s25 + $0x190] sm:$0xff]   ;;  %v8164_v42 = vld [vmem:[%s8652_s25 + $0x1d8] sm:$0xff]  }
 0x321   : > { %6925 = vmatpush3.bf16.msra.mxu1 %v8103_v44  ;;  %v8148_v44 = vld [vmem:[%s8641_s24 + $0x12e4] ss:$40 sps:$4 sm:$0xff]  }
 0x322   : > { %5072 = vmatpush1.bf16.msra.mxu0 %v8099_v0  ;;  %6926 = vmatprep.subr.bf16.mxu1 %v8107_v38  ;;  %v8165_v0 = vld [vmem:[%s8652_s25 + $0x198] sm:$0xff]   ;;  %v8146_v38 = vld [vmem:[%s8641_s24 + $0x12e0] ss:$40 sps:$4 sm:$0xff]  }
 0x323   : > { %5073 = vmatprep.subr.bf16.mxu0 %v8106_v45  ;;  %v8166_v45 = vld [vmem:[%s8652_s25 + $0x1e0] sm:$0xff]  }
 0x325   : > { %6927 = vmatpush3.bf16.msra.mxu1 %v8108_v17  ;;  %v8151_v17 = vld [vmem:[%s8641_s24 + $0x1334] ss:$40 sps:$4 sm:$0xff]  }
 0x326   : > { %5074 = vmatpush1.bf16.msra.mxu0 %v8104_v51  ;;  %6928 = vmatprep.subr.bf16.mxu1 %v8112_v47  ;;  %v8167_v51 = vld [vmem:[%s8652_s25 + $0x1a0] sm:$0xff]  }
 0x327   : > { %5075 = vmatprep.subr.bf16.mxu0 %v8111_v46  ;;  %v8168_v46 = vld [vmem:[%s8652_s25 + $0x1e8] sm:$0xff]   ;;  %v8149_v47 = vld [vmem:[%s8641_s24 + $0x1330] ss:$40 sps:$4 sm:$0xff]  }
 0x329   : > { %6929 = vmatpush3.bf16.msra.mxu1 %v8113_v49  ;;  %v8154_v49 = vld [vmem:[%s8641_s24 + $0x1384] ss:$40 sps:$4 sm:$0xff]  }
 0x32a   : > { %5076 = vmatpush1.bf16.msra.mxu0 %v8109_v48  ;;  %6930 = vmatprep.subr.bf16.mxu1 %v8117_v2  ;;  %v8169_v48 = vld [vmem:[%s8652_s25 + $0x1a8] sm:$0xff]  }
 0x32b   : > { %5077 = vmatprep.subr.bf16.mxu0 %v8116_v26  ;;  %v8170_v26 = vld [vmem:[%s8652_s25 + $0x1f0] sm:$0xff]  }
 0x32c   : > { %v8152_v2 = vld [vmem:[%s8641_s24 + $0x1380] ss:$40 sps:$4 sm:$0xff]  }
 0x32d   : > { %6931 = vmatpush3.bf16.msra.mxu1 %v8118_v3  ;;  %v8172_v3 = vld [vmem:[%s8652_s25 + $0x1f8] sm:$0xff]  }
 0x32e   : > { %5078 = vmatpush1.bf16.msra.mxu0 %v8114_v52  ;;  %6932 = vmatprep.subr.bf16.mxu1 %v8122_v57  ;;  %v8157_v52 = vld [vmem:[%s8641_s24 + $0x13d4] ss:$40 sps:$4 sm:$0xff]  }
 0x32f   : > { %5079 = vmatprep.subr.bf16.mxu0 %v8121_v4  ;;  %v8173_v4 = vld [vmem:[%s8652_s25 + $0x1b8] sm:$0xff]   ;;  %v8174_v57 = vld [vmem:[%s8652_s25 + $0x240] sm:$0xff]  }
 0x330   : > { %v4759_v1 = vpop.f32.mrb[4].mxu0 }
 0x331   : > { %v7000_v5 = vadd.f32 %v4759_v1, %v981_v59  ;;  %v4761_v10 = vpop.f32.mrb[5].mxu0  ;;  %6933 = vmatpush3.bf16.msra.mxu1 %v8123_v60 }
 0x332   : > { %v7001_v6 = vadd.f32 %v4761_v10, %v985_v53  ;;  %v4763_v8 = vpop.f32.mrb[6].mxu0  ;;  %5080 = vmatpush1.bf16.msra.mxu0 %v8119_v7  ;;  %6934 = vmatprep.subr.bf16.mxu1 %v8127_v63 }
 0x333   : > { %v7002_v13 = vadd.f32 %v4763_v8, %v981_v59  ;;  %v4765_v61 = vpop.f32.mrb[7].mxu0  ;;  %5081 = vmatprep.subr.bf16.mxu0 %v8126_v62  ;;  %v5116_v16 = vmax.f32 %v7000_v5, 0.0  ;;  %v988_v59 = vsub.s32 6, %v9116_v15 }
 0x334   : > { %v7003_v55 = vadd.f32 %v4765_v61, %v985_v53  ;;  %v5117_v19 = vmax.f32 %v7001_v6, 0.0  ;;  %v992_v53 = vsub.s32 7, %v9116_v15 }
 0x335   : > { %v5126_v18 = vmax.f32 %v7002_v13, 0.0  ;;  %6935 = vmatpush3.bf16.msra.mxu1 %v8128_v12  ;;  %v989_v7 = vrot.slane %v9435_v58, %v988_v59 }
 0x336   : > { %v5127_v20 = vmax.f32 %v7003_v55, 0.0  ;;  %5082 = vmatpush1.bf16.msra.mxu0 %v8124_v9  ;;  %6936 = vmatprep.subr.bf16.mxu1 %v8132_v14  ;;  %v993_v60 = vrot.slane %v9435_v58, %v992_v53  ;;  %v8175_v14 = vld [vmem:[%s8652_s25 + $0x200] sm:$0xff]   ;;  %v8176_v55 = vld [vmem:[%s8652_s25 + $0x248] sm:$0xff]  }
 0x337   : > { %v5136_v29 = vpack.c.bf16 %v5126_v18, %v5116_v16  ;;  %5083 = vmatprep.subr.bf16.mxu0 %v8131_v54  ;;  %v8177_v16 = vld [vmem:[%s8652_s25 + $0x208] sm:$0xff]   ;;  %v8178_v18 = vld [vmem:[%s8652_s25 + $0x250] sm:$0xff]  }
 0x338   : > { %v5137_v32 = vpack.c.bf16 %v5127_v20, %v5117_v19  ;;  %v8179_v19 = vld [vmem:[%s8652_s25 + $0x210] sm:$0xff]   ;;  %v8180_v20 = vld [vmem:[%s8652_s25 + $0x258] sm:$0xff]  }
 0x339   : > { %6937 = vmatpush3.bf16.msra.mxu1 %v8133_v28  ;;  %v8182_v28 = vld [vmem:[%s8652_s25 + $0x260] sm:$0xff]  }
 0x33a   : > { %5084 = vmatpush1.bf16.msra.mxu0 %v8129_v27  ;;  %5896 = vmatprep.mubr.bf16.mxu1 %v5137_v32  ;;  %v8181_v27 = vld [vmem:[%s8652_s25 + $0x218] sm:$0xff]   ;;  %v8185_v32 = vld [vmem:[%s8652_s25 + $0x228] sm:$0xff]  }
 0x33b   : > { %5085 = vmatprep.subr.bf16.mxu0 %v8136_v31  ;;  %6944 = vmatprep.subr.bf16.mxu1 %v8158_v33  ;;  %v8184_v31 = vld [vmem:[%s8652_s25 + $0x268] sm:$0xff]   ;;  %v8186_v33 = vld [vmem:[%s8652_s25 + $0x270] sm:$0xff]  }
 0x33c   : > { %5897 = vmatmul.mubr.bf16.vlgmr.msra.gmra.mrb[20].mxu1 %v5136_v29  ;;  %v8183_v29 = vld [vmem:[%s8652_s25 + $0x220] sm:$0xff]  }
 0x33d   : > { %6945 = vmatpush3.bf16.msra.mxu1 %v8159_v35  ;;  %v8187_v35 = vld [vmem:[%s8652_s25 + $0x230] sm:$0xff]  }
 0x33e   : > { %5086 = vmatpush1.bf16.msra.mxu0 %v8134_v34  ;;  %6946 = vmatprep.subr.bf16.mxu1 %v8160_v22  ;;  %v8188_v22 = vld [vmem:[%s8652_s25 + $0x278] sm:$0xff]  }
 0x33f   : > { %5087 = vmatprep.subr.bf16.mxu0 %v8139_v36 }
 0x341   : > { %6947 = vmatpush3.bf16.msra.mxu1 %v8161_v37 }
 0x342   : > { %5088 = vmatpush1.bf16.msra.mxu0 %v8137_v23  ;;  %6948 = vmatprep.subr.bf16.mxu1 %v8162_v40 }
 0x343   : > { %5089 = vmatprep.subr.bf16.mxu0 %v8142_v39 }
 0x345   : > { %6949 = vmatpush3.bf16.msra.mxu1 %v8163_v24 }
 0x346   : > { %5090 = vmatpush1.bf16.msra.mxu0 %v8140_v41  ;;  %6950 = vmatprep.subr.bf16.mxu1 %v8164_v42  ;;  %v8189_v41 = vld [vmem:[%s8652_s25 + $0x238] sm:$0xff]  }
 0x347   : > { %5091 = vmatprep.subr.bf16.mxu0 %v8145_v11 }
 0x349   : > { %6951 = vmatpush3.bf16.msra.mxu1 %v8165_v0 }
 0x34a   : > { %5092 = vmatpush1.bf16.msra.mxu0 %v8143_v43  ;;  %6952 = vmatprep.subr.bf16.mxu1 %v8166_v45 }
 0x34b   : > { %5093 = vmatprep.subr.bf16.mxu0 %v8148_v44 }
 0x34d   : > { %6953 = vmatpush3.bf16.msra.mxu1 %v8167_v51 }
 0x34e   : > { %5094 = vmatpush1.bf16.msra.mxu0 %v8146_v38  ;;  %6954 = vmatprep.subr.bf16.mxu1 %v8168_v46 }
 0x34f   : > { %5095 = vmatprep.subr.bf16.mxu0 %v8151_v17 }
 0x351   : > { %6955 = vmatpush3.bf16.msra.mxu1 %v8169_v48 }
 0x352   : > { %5096 = vmatpush1.bf16.msra.mxu0 %v8149_v47  ;;  %6956 = vmatprep.subr.bf16.mxu1 %v8170_v26 }
 0x353   : > { %5097 = vmatprep.subr.bf16.mxu0 %v8154_v49 }
 0x355   : > { %6957 = vmatpush3.bf16.msra.mxu1 %v8171_v50  ;;  %v959_v50 = vld [vmem:[%s8649_s19 + $0x8] sm:$0x3] }
 0x356   : > { %5098 = vmatpush1.bf16.msra.mxu0 %v8152_v2  ;;  %6958 = vmatprep.subr.bf16.mxu1 %v8172_v3  ;;  %v1001_v3 = vrot.slane %v959_v50, %v968_v25 }
 0x357   : > { %5099 = vmatprep.subr.bf16.mxu0 %v8157_v52  ;;  %v997_v52 = vrot.slane %v959_v50, %v964_v21 }
 0x359   : > { %6959 = vmatpush3.bf16.msra.mxu1 %v8173_v4 }
 0x35a   : > { %5100 = vmatpush1.bf16.msra.mxu0 %v8155_v56  ;;  %6966 = vmatprep.subr.bf16.mxu1 %v8174_v57 }
 0x35d   : > { %5102 = vmatmul.mubr.bf16.vlgmr.msra.gmra.mrb[8].mxu0 %v8892_v30 }
 0x3af   : > { %v4931_v62 = vpop.f32.mrb[8].mxu1 }
 0x3b0   : > { %v7004_v63 = vadd.f32 %v4931_v62, %v989_v7  ;;  %v4933_v1 = vpop.f32.mrb[9].mxu1 }
 0x3b1   : > { %v7005_v5 = vadd.f32 %v4933_v1, %v993_v60  ;;  %v4935_v10 = vpop.f32.mrb[10].mxu1 }
 0x3b2   : > { %v7006_v6 = vadd.f32 %v4935_v10, %v989_v7  ;;  %v4937_v30 = vpop.f32.mrb[11].mxu1  ;;  %v5118_v9 = vmax.f32 %v7004_v63, 0.0 }
 0x3b3   : > { %v7007_v8 = vadd.f32 %v4937_v30, %v993_v60  ;;  %v5119_v13 = vmax.f32 %v7005_v5, 0.0 }
 0x3b4   : > { %v5128_v12 = vmax.f32 %v7006_v6, 0.0 }
 0x3b5   : > { %v5129_v61 = vmax.f32 %v7007_v8, 0.0 }
 0x3b6   : > { %v5138_v54 = vpack.c.bf16 %v5128_v12, %v5118_v9 }
 0x3b7   : > { %v5139_v58 = vpack.c.bf16 %v5129_v61, %v5119_v13 }
 0x3b9   : > { %5937 = vmatprep.mubr.bf16.mxu1 %v5139_v58 }
 0x3ba   : > { %5938 = vmatmul.mubr.bf16.vlgmr.msra.gmra.mrb[24].mxu1 %v5138_v54 }
 0x3bb   : > { %6967 = vmatpush3.bf16.msra.mxu1 %v8175_v14 }
 0x3bc   : > { %6968 = vmatprep.subr.bf16.mxu1 %v8176_v55 }
 0x3bf   : > { %6969 = vmatpush3.bf16.msra.mxu1 %v8177_v16 }
 0x3c0   : > { %6970 = vmatprep.subr.bf16.mxu1 %v8178_v18 }
 0x3c3   : > { %6971 = vmatpush3.bf16.msra.mxu1 %v8179_v19 }
 0x3c4   : > { %6972 = vmatprep.subr.bf16.mxu1 %v8180_v20 }
 0x3c7   : > { %6973 = vmatpush3.bf16.msra.mxu1 %v8181_v27 }
 0x3c8   : > { %6974 = vmatprep.subr.bf16.mxu1 %v8182_v28 }
 0x3cb   : > { %6975 = vmatpush3.bf16.msra.mxu1 %v8183_v29 }
 0x3cc   : > { %6976 = vmatprep.subr.bf16.mxu1 %v8184_v31 }
 0x3cf   : > { %v6894_v34 = vpop.f32.mrb[12].mxu1  ;;  %6977 = vmatpush3.bf16.msra.mxu1 %v8185_v32 }
 0x3d0   : > { %v6895_v36 = vpop.f32.mrb[13].mxu1  ;;  %6978 = vmatprep.subr.bf16.mxu1 %v8186_v33 }
 0x3d1   : > { %v6896_v23 = vadd.f32 %v6895_v36, %v6894_v34  ;;  %v6897_v37 = vpop.f32.mrb[14].mxu1 }
 0x3d2   : > { %v6898_v39 = vpop.f32.mrb[15].mxu1 }
 0x3d3   : > { %v6899_v40 = vadd.f32 %v6898_v39, %v6897_v37  ;;  %6979 = vmatpush3.bf16.msra.mxu1 %v8187_v35 }
 0x3d4   : > { %6980 = vmatprep.subr.bf16.mxu1 %v8188_v22 }
 0x3d7   : > { %6981 = vmatpush3.bf16.msra.mxu1 %v8189_v41 }
 0x3ef   : > { %v6916_v24 = vpop.f32.mrb[16].mxu1 }
 0x3f0   : > { %v6917_v11 = vpop.f32.mrb[17].mxu1 }
 0x3f1   : > { %v6918_v42 = vadd.f32 %v6917_v11, %v6916_v24  ;;  %v6919_v43 = vpop.f32.mrb[18].mxu1 }
 0x3f2   : > { %v6920_v0 = vpop.f32.mrb[19].mxu1 }
 0x3f3   : > { %v5858_v44 = vadd.f32 %v6918_v42, %v6896_v23  ;;  %v6921_v45 = vadd.f32 %v6920_v0, %v6919_v43 }
 0x3f5   : > { %v5861_v38 = vadd.f32 %v6921_v45, %v6899_v40 }
 0x40f   : > { %v6938_v51 = vpop.f32.mrb[20].mxu1 }
 0x410   : > { %v6939_v17 = vpop.f32.mrb[21].mxu1 }
 0x411   : > { %v6940_v46 = vadd.f32 %v6939_v17, %v6938_v51  ;;  %v6941_v47 = vpop.f32.mrb[22].mxu1 }
 0x412   : > { %v6942_v48 = vpop.f32.mrb[23].mxu1 }
 0x413   : > { %v5899_v49 = vadd.f32 %v6940_v46, %v5858_v44  ;;  %v6943_v26 = vadd.f32 %v6942_v48, %v6941_v47 }
 0x415   : > { %v5902_v2 = vadd.f32 %v6943_v26, %v5861_v38 }
 0x430   : > { %v5103_v56 = vpop.f32.mrb[8].mxu0 }
 0x431   : > { %v7008_v4 = vadd.f32 %v5103_v56, %v997_v52  ;;  %v5105_v57 = vpop.f32.mrb[9].mxu0 }
 0x432   : > { %v7009_v59 = vadd.f32 %v5105_v57, %v1001_v3  ;;  %v5107_v53 = vpop.f32.mrb[10].mxu0 }
 0x433   : > { %v7010_v7 = vadd.f32 %v5107_v53, %v997_v52  ;;  %v5109_v60 = vpop.f32.mrb[11].mxu0  ;;  %v5120_v63 = vmax.f32 %v7008_v4, 0.0 }
 0x434   : > { %v7011_v62 = vadd.f32 %v5109_v60, %v1001_v3  ;;  %v5121_v5 = vmax.f32 %v7009_v59, 0.0 }
 0x435   : > { %v5130_v1 = vmax.f32 %v7010_v7, 0.0 }
 0x436   : > { %v5131_v10 = vmax.f32 %v7011_v62, 0.0 }
 0x437   : > { %v5140_v6 = vpack.c.bf16 %v5130_v1, %v5120_v63 }
 0x438   : > { %v5141_v30 = vpack.c.bf16 %v5131_v10, %v5121_v5 }
 0x43a   : > { %5978 = vmatprep.mubr.bf16.mxu1 %v5141_v30 }
 0x43b   : > { %5979 = vmatmul.mubr.bf16.vlgmr.msra.gmra.mrb[28].mxu1 %v5140_v6 }
 0x48d   : > { %v6960_v15 = vpop.f32.mrb[24].mxu1 }
 0x48e   : > { %v6961_v21 = vpop.f32.mrb[25].mxu1 }
 0x48f   : > { %v6962_v25 = vadd.f32 %v6961_v21, %v6960_v15  ;;  %v6963_v8 = vpop.f32.mrb[26].mxu1 }
 0x490   : > { %v6964_v9 = vpop.f32.mrb[27].mxu1 }
 0x491   : > { %v5940_v12 = vadd.f32 %v6962_v25, %v5899_v49  ;;  %v6965_v13 = vadd.f32 %v6964_v9, %v6963_v8 }
 0x493   : > { %v5943_v61 = vadd.f32 %v6965_v13, %v5902_v2 }
 0x50e   : > { %v6982_v54 = vpop.f32.mrb[28].mxu1 }
 0x50f   : > { %v6983_v58 = vpop.f32.mrb[29].mxu1 }
 0x510   : > { %v6984_v14 = vadd.f32 %v6983_v58, %v6982_v54  ;;  %v6985_v55 = vpop.f32.mrb[30].mxu1 }
 0x511   : > { %v6986_v16 = vpop.f32.mrb[31].mxu1 }
 0x512   : > { %v5981_v18 = vadd.f32 %v6984_v14, %v5940_v12  ;;  %v6987_v19 = vadd.f32 %v6986_v16, %v6985_v55 }
 0x514   : > { %5987 = vst [vmem:[%s305_s8] sm:$0xff] %v5981_v18  ;;  %v5984_v20 = vadd.f32 %v6987_v19, %v5943_v61 }
 0x516   : > { %5988 = vst [vmem:[%s305_s8 + $0x8] sm:$0xff] %v5984_v20 }
 0x517   : > { %8322 = shalt.err (!%p8319_p11)
}
 0x518   : > { %s8323_s1 = scalar_lea.hbm %s9514_s12, 256  ;;  %s8327_s17 = scalar_lea.hbm %s9562_s4, 512 }
 0x519   : > { %p8324_p0 = scmp.ne.s32.totalorder %s9514_s12, %s8323_s1  ;;  %p8328_p10 = scmp.lt.u32.totalorder %s9514_s12, %s9562_s4 }
 0x51a   : > { %p8329_p1 = scmp.lt.u32.totalorder %s8327_s17, %s8323_s1  ;;  %p8331_p4 = scmp.lt.u32.totalorder %s8323_s1, %s9514_s12 }
 0x51b   : > { %p8325_p13 = pnand %p8324_p0, %p9599_p9 }
 0x51c   : > { %p8330_p7 = por %p8329_p1, %p8328_p10 }
 0x51d   : > { %p8326_p8 = pneg %p8325_p13 }
 0x51e   : > { %p8332_p12 = por %p8331_p4, %p8330_p7 }
 0x520   : > { %p8333_p6 = pnand %p8332_p12, %p8326_p8 }
 0x522   : > { %8336 = shalt.err (!%p8333_p6)
}
 0x523   : > { %s8397_s11 = smov 128   ;;  %s8398_s23 = smov 8  }
 0x524   : > { %7084 = dma.vmem_to_hbm [thread:$0]  (%p9599_p9), %s9509_s7, 256, %s9514_s12, %s5990_s21, %s8397_s11, %s8397_s11, %s8398_s23  }
 0x525 PF: > { %s9600_s19 = sld [smem:[#allocation15_spill]]  ;;  %s9601_s22 = sld [smem:[#allocation19_spill]] }
 0x526   : > { %p9603_p5 = scmp.ge.s32.totalorder %s8383_s18, 2 }
 0x52b   : > { %s6018_s25 = sand.u32 1, %s9600_s19   ;;  %p9602_p3 = scmp.ne.s32.totalorder %s9601_s22, 0 }
 0x52c   : > { %s6019_s10 = scalar_lea.sflag [#allocation4], %s6018_s25 }
 0x52d   : > { %p7101_p2 = pnand %p9603_p5, %p9602_p3 }
 0x52f   : > { %8366 = dma.done.wait (!%p7101_p2), %s6019_s10, 256  }
 0x530   : > { %8368 = vsyncadd (!%p7101_p2), %s6019_s10, 4294967040  ;;  %s9604_s18 = sld [smem:[#allocation17_spill]]  ;;  %s9605_s8 = sld [smem:[#allocation16_spill]] }
 0x531   : > { %s9606_s17 = sld [smem:[#allocation18_spill]]  ;;  %s9607_s15 = smov %s8375_s16 }
 0x536   : > { %p21_p11 = scmp.ge.s32.totalorder %s9604_s18, 4   ;;  %s9608_s16 = smov %s9605_s8 }
 0x538   :  { %23 = sbr.rel (!%p21_p11) target bundleno = 10 (0xa), region = 110 }
 0x53f   :  { %6024 = vsyncpa [#allocation3], 1 }
 0x540   :  { %6026 = vsyncpa [#allocation3 + $0x1], 1 }
 0x541   :  { %6027 = vsyncpa [#allocation6], 1 }
 0x542   :  { %6029 = vsyncpa [#allocation6 + $0x1], 1 }
 0x543   :  { %6030 = vsyncpa [#allocation9], 1 }
 0x544   :  { %6032 = vsyncpa [#allocation9 + $0x1], 1 }
 0x545   :  { %6033 = vsyncpa [#allocation4], 1 }
 0x546   :  { %6035 = vsyncpa [#allocation4 + $0x1], 1 }

</bundles_post_ra>
